<compile_context>
chip_gen: v5e
topology: v5e:2x2
jax: 0.10.0
libtpu: 0.0.40
codegen_flags: <defaults>
</compile_context>

<pallas_src>
import functools

import jax
import jax.numpy as jnp
from jax.experimental import pallas as pl
from jax.experimental.pallas import tpu as pltpu


LANE = 128          # lane-dense output width (Cout is zero-padded up to this)
MAX_TM = 512        # M-tile (rows of the im2col matrix) per grid step


def _round_up(x, m):
    return (x + m - 1) // m * m


# ----------------------------------------------------------------------------
# Pallas kernels: (tm, K) @ (K, 128) matmul + bias (+ residual) (+ ReLU)
# Weights already carry the folded BN scale; bias is the folded BN shift.
# bf16 MXU inputs, f32 accumulation, f32 epilogue (safe on v5e as well).
# ----------------------------------------------------------------------------
def _matmul_bias_kernel(p_ref, w_ref, b_ref, o_ref, *, relu):
    acc = jnp.dot(p_ref[...], w_ref[...], preferred_element_type=jnp.float32)
    y = acc + b_ref[...]
    if relu:
        y = jnp.maximum(y, 0.0)
    o_ref[...] = y.astype(o_ref.dtype)


def _matmul_bias_res_kernel(p_ref, w_ref, b_ref, r_ref, o_ref, *, relu):
    acc = jnp.dot(p_ref[...], w_ref[...], preferred_element_type=jnp.float32)
    y = acc + b_ref[...] + r_ref[...]
    if relu:
        y = jnp.maximum(y, 0.0)
    o_ref[...] = y.astype(o_ref.dtype)


def _fused_matmul(patches, w2d, bias, residual=None, relu=True):
    """patches (M, K) bf16, w2d (K, 128) bf16, bias (1, 128) f32,
    residual (M, 128) f32 or None  ->  (M, 128) f32."""
    m, k = patches.shape
    tm = min(MAX_TM, _round_up(m, 16))          # bf16-safe sublane multiple
    m_pad = _round_up(m, tm)
    if m_pad != m:
        patches = jnp.pad(patches, ((0, m_pad - m), (0, 0)))
        if residual is not None:
            residual = jnp.pad(residual, ((0, m_pad - m), (0, 0)))
    grid = (m_pad // tm,)

    in_specs = [
        pl.BlockSpec((tm, k), lambda i: (i, 0)),       # patches: streamed over M
        pl.BlockSpec((k, LANE), lambda i: (0, 0)),     # weights: VMEM-resident
        pl.BlockSpec((1, LANE), lambda i: (0, 0)),     # bias:    VMEM-resident
    ]
    operands = [patches, w2d, bias]
    if residual is None:
        kernel = functools.partial(_matmul_bias_kernel, relu=relu)
    else:
        kernel = functools.partial(_matmul_bias_res_kernel, relu=relu)
        in_specs.append(pl.BlockSpec((tm, LANE), lambda i: (i, 0)))
        operands.append(residual)

    out = pl.pallas_call(
        kernel,
        out_shape=jax.ShapeDtypeStruct((m_pad, LANE), jnp.float32),
        grid=grid,
        in_specs=in_specs,
        out_specs=pl.BlockSpec((tm, LANE), lambda i: (i, 0)),
        compiler_params=pltpu.CompilerParams(
            # M axis is fully independent -> shard across v7x's 2 TensorCores.
            dimension_semantics=("parallel",),
            # Explicit VMEM budget: safe on v5e/v6e (128 MiB) and v7x (64 MiB);
            # working set (2x patch + 2x out + 2x residual tiles + weights) at
            # tm=512 is < 2 MiB, far inside the limit.
            vmem_limit_bytes=32 * 1024 * 1024,
        ),
    )(*operands)
    return out[:m] if m_pad != m else out


# ----------------------------------------------------------------------------
# Wrapper-side patch construction (bf16) and fused conv+BN(+res)(+ReLU)
# ----------------------------------------------------------------------------
def _im2col(x_nhwc, kh, kw, stride, padding):
    """x (N,H,W,C) -> bf16 patch matrix (N*Ho*Wo, kh*kw*C).
    For 1x1 convs this is just a (subsampled) reshape — no patch duplication."""
    n, h, w, c = x_nhwc.shape
    ho = (h + 2 * padding - kh) // stride + 1
    wo = (w + 2 * padding - kw) // stride + 1
    xp = x_nhwc.astype(jnp.bfloat16)
    if padding:
        xp = jnp.pad(xp, ((0, 0), (padding, padding), (padding, padding), (0, 0)))
    cols = []
    for di in range(kh):
        for dj in range(kw):
            cols.append(xp[:, di:di + stride * ho:stride,
                           dj:dj + stride * wo:stride, :])
    p = cols[0] if len(cols) == 1 else jnp.concatenate(cols, axis=-1)
    return p.reshape(n * ho * wo, kh * kw * c), (n, ho, wo)


def conv_bn(x_nhwc, params, stride, relu=True, residual_pad=None):
    """Conv2d + folded BatchNorm (+ residual add) (+ ReLU).

    Returns an (N, Ho, Wo, 128) f32 feature map whose channels >= cout are
    exactly zero, so it can be reused directly (lane-dense) as the residual
    operand of a following conv."""
    kh, cin = params["k"], params["cin"]
    padding = (kh - 1) // 2
    patches, (n, ho, wo) = _im2col(x_nhwc[..., :cin], kh, kh, stride, padding)
    m = n * ho * wo
    res2d = None if residual_pad is None else residual_pad.reshape(m, LANE)
    out2d = _fused_matmul(patches, params["w2d"], params["bias"],
                          residual=res2d, relu=relu)
    return out2d.reshape(n, ho, wo, LANE)


def basic_block(x_pad, params, stride):
    """ResNet BasicBlock: conv-bn-relu, conv-bn + residual add + relu (fused)."""
    identity = x_pad
    out = conv_bn(x_pad, params["conv1"], stride, relu=True)
    if "down" in params:
        identity = conv_bn(x_pad, params["down"], stride, relu=False)
    # Second conv fuses BN bias + residual add + final ReLU inside the kernel.
    return conv_bn(out, params["conv2"], 1, relu=True, residual_pad=identity)


# ----------------------------------------------------------------------------
# Deterministic parameter init.  BN is folded at init:
#   scale = g / sqrt(v + eps); w2d = W * scale; bias = b - m * scale
# and both are zero-padded to 128 output lanes (one-time transform).
# ----------------------------------------------------------------------------
def _init_conv_bn(key, cin, cout, k):
    kw_, kg, kb, km = jax.random.split(key, 4)
    fan_in = cin * k * k
    w = jax.random.normal(kw_, (cout, cin, k, k), jnp.float32) * (2.0 / fan_in) ** 0.5
    gamma = 1.0 + 0.1 * jax.random.normal(kg, (cout,), jnp.float32)
    beta = 0.1 * jax.random.normal(kb, (cout,), jnp.float32)
    mean = 0.1 * jax.random.normal(km, (cout,), jnp.float32)
    var = jnp.ones((cout,), jnp.float32)
    eps = 1e-5
    scale = gamma / jnp.sqrt(var + eps)
    bias = beta - mean * scale
    # PyTorch weight (Cout,Cin,k,k) -> (k,k,Cin,Cout) -> (K,Cout) to match the
    # (di, dj, cin) ordering produced by _im2col; fold BN scale; pad to 128.
    w2d = jnp.transpose(w, (2, 3, 1, 0)).reshape(k * k * cin, cout) * scale[None, :]
    w2d = jnp.pad(w2d, ((0, 0), (0, LANE - cout))).astype(jnp.bfloat16)
    bias_pad = jnp.pad(bias, (0, LANE - cout)).reshape(1, LANE).astype(jnp.float32)
    return {"w2d": w2d, "bias": bias_pad, "k": k, "cin": cin, "cout": cout}


class FeatureExtractor:
    """Synthetic ResNet-style multi-scale feature extractor (eval mode, no grad)."""

    def __init__(self, key, layers=("layer1", "layer2", "layer3")):
        self.layers = list(layers)
        ks = jax.random.split(key, 9)
        self.params = {
            "stem": _init_conv_bn(ks[0], 3, 8, 3),
            "layer1": {"conv1": _init_conv_bn(ks[1], 8, 8, 3),
                       "conv2": _init_conv_bn(ks[2], 8, 8, 3)},
            "layer2": {"conv1": _init_conv_bn(ks[3], 8, 16, 3),
                       "conv2": _init_conv_bn(ks[4], 16, 16, 3),
                       "down": _init_conv_bn(ks[5], 8, 16, 1)},
            "layer3": {"conv1": _init_conv_bn(ks[6], 16, 32, 3),
                       "conv2": _init_conv_bn(ks[7], 32, 32, 3),
                       "down": _init_conv_bn(ks[8], 16, 32, 1)},
        }
        self.out_dims = [8, 16, 32]
        self._channels = {"layer1": 8, "layer2": 16, "layer3": 32}

    def __call__(self, x_nchw):
        # NCHW (PyTorch) -> NHWC once at the API boundary; NHWC (lane-padded to
        # 128 channels) is kept throughout the backbone.
        x = jnp.transpose(x_nchw, (0, 2, 3, 1)).astype(jnp.float32)
        x = conv_bn(x, self.params["stem"], stride=2, relu=True)
        feats = {}
        feats["layer1"] = basic_block(x, self.params["layer1"], stride=1)
        feats["layer2"] = basic_block(feats["layer1"], self.params["layer2"], stride=2)
        feats["layer3"] = basic_block(feats["layer2"], self.params["layer3"], stride=2)
        # dict(zip(layers, features)) semantics of the original forward; strip
        # the lane padding and convert back to NCHW only at the API boundary.
        return {name: jnp.transpose(feats[name][..., :self._channels[name]],
                                    (0, 3, 1, 2))
                for name in self.layers}


if __name__ == "__main__":
    key = jax.random.PRNGKey(0)
    kx, kp = jax.random.split(key)
    x = jax.random.normal(kx, (2, 3, 32, 32), jnp.float32)   # NCHW input

    extractor = FeatureExtractor(kp, layers=["layer1", "layer2", "layer3"])
    feats = jax.jit(lambda inp: extractor(inp))(x)
    feats = jax.block_until_ready(feats)

    assert feats["layer1"].shape == (2, 8, 16, 16)
    assert feats["layer2"].shape == (2, 16, 8, 8)
    assert feats["layer3"].shape == (2, 32, 4, 4)
    assert all(jnp.isfinite(v).all() for v in feats.values())
    print("KERNEL_OK")
</pallas_src>

<mosaic_0001>
module attributes {stable_mosaic.version = 11 : i64} {
  func.func @_matmul_bias_kernel(%arg0: i32, %arg1: memref<512x27xbf16, #tpu.memory_space<vmem>>, %arg2: memref<27x128xbf16, #tpu.memory_space<vmem>>, %arg3: memref<1x128xf32, #tpu.memory_space<vmem>>, %arg4: memref<512x128xf32, #tpu.memory_space<vmem>>) attributes {dimension_semantics = [#tpu.dimension_semantics<parallel>], iteration_bounds = array<i64: 1>, scalar_prefetch = 0 : i64, scratch_operands = 0 : i64, tpu.core_type = #tpu.core_type<tc>, window_params = [{transform_indices = @transform_0, window_bounds = array<i64: 512, 27>}, {pipeline_mode = #tpu.pipeline_mode<synchronous>, transform_indices = @transform_1, window_bounds = array<i64: 27, 128>}, {pipeline_mode = #tpu.pipeline_mode<synchronous>, transform_indices = @transform_2, window_bounds = array<i64: 1, 128>}, {transform_indices = @transform_3, window_bounds = array<i64: 512, 128>}]} {
    %c0 = arith.constant 0 : index
    %c0_0 = arith.constant 0 : index
    %0 = vector.load %arg1[%c0, %c0_0] : memref<512x27xbf16, #tpu.memory_space<vmem>>, vector<512x27xbf16>
    %c0_1 = arith.constant 0 : index
    %c0_2 = arith.constant 0 : index
    %1 = vector.load %arg2[%c0_1, %c0_2] : memref<27x128xbf16, #tpu.memory_space<vmem>>, vector<27x128xbf16>
    %cst = arith.constant dense<0.000000e+00> : vector<512x128xf32>
    %2 = tpu.matmul %0, %1, %cst {dimension_numbers = #tpu.dot_dimension_numbers<[1], [0], [0], [1], [0, 0, 1, 1], [], []>} : vector<512x27xbf16>, vector<27x128xbf16>, vector<512x128xf32> -> vector<512x128xf32>
    %c0_3 = arith.constant 0 : index
    %c0_4 = arith.constant 0 : index
    %3 = vector.load %arg3[%c0_3, %c0_4] : memref<1x128xf32, #tpu.memory_space<vmem>>, vector<1x128xf32>
    %4 = vector.broadcast %3 : vector<1x128xf32> to vector<512x128xf32>
    %5 = arith.addf %2, %4 : vector<512x128xf32>
    %cst_5 = arith.constant 0.000000e+00 : f32
    %6 = vector.broadcast %cst_5 : f32 to vector<512x128xf32>
    %7 = arith.maximumf %5, %6 : vector<512x128xf32>
    %c0_6 = arith.constant 0 : index
    %c0_7 = arith.constant 0 : index
    %8 = vector.load %arg4[%c0_6, %c0_7] : memref<512x128xf32, #tpu.memory_space<vmem>>, vector<512x128xf32>
    tpu.vector_store %arg4[%c0_6, %c0_7], %7 {strides = array<i32>} : memref<512x128xf32, #tpu.memory_space<vmem>>, vector<512x128xf32>,
    return
  }
  func.func @transform_0(%arg0: i32) -> (i32, i32) {
    %c0_i32 = arith.constant 0 : i32
    %c0_i32_0 = arith.constant 0 : i32
    return %arg0, %c0_i32 : i32, i32
  }
  func.func @transform_1(%arg0: i32) -> (i32, i32) {
    %c0_i32 = arith.constant 0 : i32
    %c0_i32_0 = arith.constant 0 : i32
    %c0_i32_1 = arith.constant 0 : i32
    return %c0_i32, %c0_i32_0 : i32, i32
  }
  func.func @transform_2(%arg0: i32) -> (i32, i32) {
    %c0_i32 = arith.constant 0 : i32
    %c0_i32_0 = arith.constant 0 : i32
    %c0_i32_1 = arith.constant 0 : i32
    return %c0_i32, %c0_i32_0 : i32, i32
  }
  func.func @transform_3(%arg0: i32) -> (i32, i32) {
    %c0_i32 = arith.constant 0 : i32
    %c0_i32_0 = arith.constant 0 : i32
    return %arg0, %c0_i32 : i32, i32
  }
}

module attributes {stable_mosaic.version = 11 : i64} {
  func.func @_matmul_bias_kernel(%arg0: i32, %arg1: memref<512x72xbf16, #tpu.memory_space<vmem>>, %arg2: memref<72x128xbf16, #tpu.memory_space<vmem>>, %arg3: memref<1x128xf32, #tpu.memory_space<vmem>>, %arg4: memref<512x128xf32, #tpu.memory_space<vmem>>) attributes {dimension_semantics = [#tpu.dimension_semantics<parallel>], iteration_bounds = array<i64: 1>, scalar_prefetch = 0 : i64, scratch_operands = 0 : i64, tpu.core_type = #tpu.core_type<tc>, window_params = [{transform_indices = @transform_0, window_bounds = array<i64: 512, 72>}, {pipeline_mode = #tpu.pipeline_mode<synchronous>, transform_indices = @transform_1, window_bounds = array<i64: 72, 128>}, {pipeline_mode = #tpu.pipeline_mode<synchronous>, transform_indices = @transform_2, window_bounds = array<i64: 1, 128>}, {transform_indices = @transform_3, window_bounds = array<i64: 512, 128>}]} {
    %c0 = arith.constant 0 : index
    %c0_0 = arith.constant 0 : index
    %0 = vector.load %arg1[%c0, %c0_0] : memref<512x72xbf16, #tpu.memory_space<vmem>>, vector<512x72xbf16>
    %c0_1 = arith.constant 0 : index
    %c0_2 = arith.constant 0 : index
    %1 = vector.load %arg2[%c0_1, %c0_2] : memref<72x128xbf16, #tpu.memory_space<vmem>>, vector<72x128xbf16>
    %cst = arith.constant dense<0.000000e+00> : vector<512x128xf32>
    %2 = tpu.matmul %0, %1, %cst {dimension_numbers = #tpu.dot_dimension_numbers<[1], [0], [0], [1], [0, 0, 1, 1], [], []>} : vector<512x72xbf16>, vector<72x128xbf16>, vector<512x128xf32> -> vector<512x128xf32>
    %c0_3 = arith.constant 0 : index
    %c0_4 = arith.constant 0 : index
    %3 = vector.load %arg3[%c0_3, %c0_4] : memref<1x128xf32, #tpu.memory_space<vmem>>, vector<1x128xf32>
    %4 = vector.broadcast %3 : vector<1x128xf32> to vector<512x128xf32>
    %5 = arith.addf %2, %4 : vector<512x128xf32>
    %cst_5 = arith.constant 0.000000e+00 : f32
    %6 = vector.broadcast %cst_5 : f32 to vector<512x128xf32>
    %7 = arith.maximumf %5, %6 : vector<512x128xf32>
    %c0_6 = arith.constant 0 : index
    %c0_7 = arith.constant 0 : index
    %8 = vector.load %arg4[%c0_6, %c0_7] : memref<512x128xf32, #tpu.memory_space<vmem>>, vector<512x128xf32>
    tpu.vector_store %arg4[%c0_6, %c0_7], %7 {strides = array<i32>} : memref<512x128xf32, #tpu.memory_space<vmem>>, vector<512x128xf32>,
    return
  }
  func.func @transform_0(%arg0: i32) -> (i32, i32) {
    %c0_i32 = arith.constant 0 : i32
    %c0_i32_0 = arith.constant 0 : i32
    return %arg0, %c0_i32 : i32, i32
  }
  func.func @transform_1(%arg0: i32) -> (i32, i32) {
    %c0_i32 = arith.constant 0 : i32
    %c0_i32_0 = arith.constant 0 : i32
    %c0_i32_1 = arith.constant 0 : i32
    return %c0_i32, %c0_i32_0 : i32, i32
  }
  func.func @transform_2(%arg0: i32) -> (i32, i32) {
    %c0_i32 = arith.constant 0 : i32
    %c0_i32_0 = arith.constant 0 : i32
    %c0_i32_1 = arith.constant 0 : i32
    return %c0_i32, %c0_i32_0 : i32, i32
  }
  func.func @transform_3(%arg0: i32) -> (i32, i32) {
    %c0_i32 = arith.constant 0 : i32
    %c0_i32_0 = arith.constant 0 : i32
    return %arg0, %c0_i32 : i32, i32
  }
}

module attributes {stable_mosaic.version = 11 : i64} {
  func.func @_matmul_bias_res_kernel(%arg0: i32, %arg1: memref<512x72xbf16, #tpu.memory_space<vmem>>, %arg2: memref<72x128xbf16, #tpu.memory_space<vmem>>, %arg3: memref<1x128xf32, #tpu.memory_space<vmem>>, %arg4: memref<512x128xf32, #tpu.memory_space<vmem>>, %arg5: memref<512x128xf32, #tpu.memory_space<vmem>>) attributes {dimension_semantics = [#tpu.dimension_semantics<parallel>], iteration_bounds = array<i64: 1>, scalar_prefetch = 0 : i64, scratch_operands = 0 : i64, tpu.core_type = #tpu.core_type<tc>, window_params = [{transform_indices = @transform_0, window_bounds = array<i64: 512, 72>}, {pipeline_mode = #tpu.pipeline_mode<synchronous>, transform_indices = @transform_1, window_bounds = array<i64: 72, 128>}, {pipeline_mode = #tpu.pipeline_mode<synchronous>, transform_indices = @transform_2, window_bounds = array<i64: 1, 128>}, {transform_indices = @transform_3, window_bounds = array<i64: 512, 128>}, {transform_indices = @transform_4, window_bounds = array<i64: 512, 128>}]} {
    %c0 = arith.constant 0 : index
    %c0_0 = arith.constant 0 : index
    %0 = vector.load %arg1[%c0, %c0_0] : memref<512x72xbf16, #tpu.memory_space<vmem>>, vector<512x72xbf16>
    %c0_1 = arith.constant 0 : index
    %c0_2 = arith.constant 0 : index
    %1 = vector.load %arg2[%c0_1, %c0_2] : memref<72x128xbf16, #tpu.memory_space<vmem>>, vector<72x128xbf16>
    %cst = arith.constant dense<0.000000e+00> : vector<512x128xf32>
    %2 = tpu.matmul %0, %1, %cst {dimension_numbers = #tpu.dot_dimension_numbers<[1], [0], [0], [1], [0, 0, 1, 1], [], []>} : vector<512x72xbf16>, vector<72x128xbf16>, vector<512x128xf32> -> vector<512x128xf32>
    %c0_3 = arith.constant 0 : index
    %c0_4 = arith.constant 0 : index
    %3 = vector.load %arg3[%c0_3, %c0_4] : memref<1x128xf32, #tpu.memory_space<vmem>>, vector<1x128xf32>
    %4 = vector.broadcast %3 : vector<1x128xf32> to vector<512x128xf32>
    %5 = arith.addf %2, %4 : vector<512x128xf32>
    %c0_5 = arith.constant 0 : index
    %c0_6 = arith.constant 0 : index
    %6 = vector.load %arg4[%c0_5, %c0_6] : memref<512x128xf32, #tpu.memory_space<vmem>>, vector<512x128xf32>
    %7 = arith.addf %5, %6 : vector<512x128xf32>
    %cst_7 = arith.constant 0.000000e+00 : f32
    %8 = vector.broadcast %cst_7 : f32 to vector<512x128xf32>
    %9 = arith.maximumf %7, %8 : vector<512x128xf32>
    %c0_8 = arith.constant 0 : index
    %c0_9 = arith.constant 0 : index
    %10 = vector.load %arg5[%c0_8, %c0_9] : memref<512x128xf32, #tpu.memory_space<vmem>>, vector<512x128xf32>
    tpu.vector_store %arg5[%c0_8, %c0_9], %9 {strides = array<i32>} : memref<512x128xf32, #tpu.memory_space<vmem>>, vector<512x128xf32>,
    return
  }
  func.func @transform_0(%arg0: i32) -> (i32, i32) {
    %c0_i32 = arith.constant 0 : i32
    %c0_i32_0 = arith.constant 0 : i32
    return %arg0, %c0_i32 : i32, i32
  }
  func.func @transform_1(%arg0: i32) -> (i32, i32) {
    %c0_i32 = arith.constant 0 : i32
    %c0_i32_0 = arith.constant 0 : i32
    %c0_i32_1 = arith.constant 0 : i32
    return %c0_i32, %c0_i32_0 : i32, i32
  }
  func.func @transform_2(%arg0: i32) -> (i32, i32) {
    %c0_i32 = arith.constant 0 : i32
    %c0_i32_0 = arith.constant 0 : i32
    %c0_i32_1 = arith.constant 0 : i32
    return %c0_i32, %c0_i32_0 : i32, i32
  }
  func.func @transform_3(%arg0: i32) -> (i32, i32) {
    %c0_i32 = arith.constant 0 : i32
    %c0_i32_0 = arith.constant 0 : i32
    return %arg0, %c0_i32 : i32, i32
  }
  func.func @transform_4(%arg0: i32) -> (i32, i32) {
    %c0_i32 = arith.constant 0 : i32
    %c0_i32_0 = arith.constant 0 : i32
    return %arg0, %c0_i32 : i32, i32
  }
}

module attributes {stable_mosaic.version = 11 : i64} {
  func.func @_matmul_bias_kernel(%arg0: i32, %arg1: memref<128x8xbf16, #tpu.memory_space<vmem>>, %arg2: memref<8x128xbf16, #tpu.memory_space<vmem>>, %arg3: memref<1x128xf32, #tpu.memory_space<vmem>>, %arg4: memref<128x128xf32, #tpu.memory_space<vmem>>) attributes {dimension_semantics = [#tpu.dimension_semantics<parallel>], iteration_bounds = array<i64: 1>, scalar_prefetch = 0 : i64, scratch_operands = 0 : i64, tpu.core_type = #tpu.core_type<tc>, window_params = [{transform_indices = @transform_0, window_bounds = array<i64: 128, 8>}, {pipeline_mode = #tpu.pipeline_mode<synchronous>, transform_indices = @transform_1, window_bounds = array<i64: 8, 128>}, {pipeline_mode = #tpu.pipeline_mode<synchronous>, transform_indices = @transform_2, window_bounds = array<i64: 1, 128>}, {transform_indices = @transform_3, window_bounds = array<i64: 128, 128>}]} {
    %c0 = arith.constant 0 : index
    %c0_0 = arith.constant 0 : index
    %0 = vector.load %arg1[%c0, %c0_0] : memref<128x8xbf16, #tpu.memory_space<vmem>>, vector<128x8xbf16>
    %c0_1 = arith.constant 0 : index
    %c0_2 = arith.constant 0 : index
    %1 = vector.load %arg2[%c0_1, %c0_2] : memref<8x128xbf16, #tpu.memory_space<vmem>>, vector<8x128xbf16>
    %cst = arith.constant dense<0.000000e+00> : vector<128x128xf32>
    %2 = tpu.matmul %0, %1, %cst {dimension_numbers = #tpu.dot_dimension_numbers<[1], [0], [0], [1], [0, 0, 1, 1], [], []>} : vector<128x8xbf16>, vector<8x128xbf16>, vector<128x128xf32> -> vector<128x128xf32>
    %c0_3 = arith.constant 0 : index
    %c0_4 = arith.constant 0 : index
    %3 = vector.load %arg3[%c0_3, %c0_4] : memref<1x128xf32, #tpu.memory_space<vmem>>, vector<1x128xf32>
    %4 = vector.broadcast %3 : vector<1x128xf32> to vector<128x128xf32>
    %5 = arith.addf %2, %4 : vector<128x128xf32>
    %c0_5 = arith.constant 0 : index
    %c0_6 = arith.constant 0 : index
    %6 = vector.load %arg4[%c0_5, %c0_6] : memref<128x128xf32, #tpu.memory_space<vmem>>, vector<128x128xf32>
    tpu.vector_store %arg4[%c0_5, %c0_6], %5 {strides = array<i32>} : memref<128x128xf32, #tpu.memory_space<vmem>>, vector<128x128xf32>,
    return
  }
  func.func @transform_0(%arg0: i32) -> (i32, i32) {
    %c0_i32 = arith.constant 0 : i32
    %c0_i32_0 = arith.constant 0 : i32
    return %arg0, %c0_i32 : i32, i32
  }
  func.func @transform_1(%arg0: i32) -> (i32, i32) {
    %c0_i32 = arith.constant 0 : i32
    %c0_i32_0 = arith.constant 0 : i32
    %c0_i32_1 = arith.constant 0 : i32
    return %c0_i32, %c0_i32_0 : i32, i32
  }
  func.func @transform_2(%arg0: i32) -> (i32, i32) {
    %c0_i32 = arith.constant 0 : i32
    %c0_i32_0 = arith.constant 0 : i32
    %c0_i32_1 = arith.constant 0 : i32
    return %c0_i32, %c0_i32_0 : i32, i32
  }
  func.func @transform_3(%arg0: i32) -> (i32, i32) {
    %c0_i32 = arith.constant 0 : i32
    %c0_i32_0 = arith.constant 0 : i32
    return %arg0, %c0_i32 : i32, i32
  }
}

module attributes {stable_mosaic.version = 11 : i64} {
  func.func @_matmul_bias_kernel(%arg0: i32, %arg1: memref<128x72xbf16, #tpu.memory_space<vmem>>, %arg2: memref<72x128xbf16, #tpu.memory_space<vmem>>, %arg3: memref<1x128xf32, #tpu.memory_space<vmem>>, %arg4: memref<128x128xf32, #tpu.memory_space<vmem>>) attributes {dimension_semantics = [#tpu.dimension_semantics<parallel>], iteration_bounds = array<i64: 1>, scalar_prefetch = 0 : i64, scratch_operands = 0 : i64, tpu.core_type = #tpu.core_type<tc>, window_params = [{transform_indices = @transform_0, window_bounds = array<i64: 128, 72>}, {pipeline_mode = #tpu.pipeline_mode<synchronous>, transform_indices = @transform_1, window_bounds = array<i64: 72, 128>}, {pipeline_mode = #tpu.pipeline_mode<synchronous>, transform_indices = @transform_2, window_bounds = array<i64: 1, 128>}, {transform_indices = @transform_3, window_bounds = array<i64: 128, 128>}]} {
    %c0 = arith.constant 0 : index
    %c0_0 = arith.constant 0 : index
    %0 = vector.load %arg1[%c0, %c0_0] : memref<128x72xbf16, #tpu.memory_space<vmem>>, vector<128x72xbf16>
    %c0_1 = arith.constant 0 : index
    %c0_2 = arith.constant 0 : index
    %1 = vector.load %arg2[%c0_1, %c0_2] : memref<72x128xbf16, #tpu.memory_space<vmem>>, vector<72x128xbf16>
    %cst = arith.constant dense<0.000000e+00> : vector<128x128xf32>
    %2 = tpu.matmul %0, %1, %cst {dimension_numbers = #tpu.dot_dimension_numbers<[1], [0], [0], [1], [0, 0, 1, 1], [], []>} : vector<128x72xbf16>, vector<72x128xbf16>, vector<128x128xf32> -> vector<128x128xf32>
    %c0_3 = arith.constant 0 : index
    %c0_4 = arith.constant 0 : index
    %3 = vector.load %arg3[%c0_3, %c0_4] : memref<1x128xf32, #tpu.memory_space<vmem>>, vector<1x128xf32>
    %4 = vector.broadcast %3 : vector<1x128xf32> to vector<128x128xf32>
    %5 = arith.addf %2, %4 : vector<128x128xf32>
    %cst_5 = arith.constant 0.000000e+00 : f32
    %6 = vector.broadcast %cst_5 : f32 to vector<128x128xf32>
    %7 = arith.maximumf %5, %6 : vector<128x128xf32>
    %c0_6 = arith.constant 0 : index
    %c0_7 = arith.constant 0 : index
    %8 = vector.load %arg4[%c0_6, %c0_7] : memref<128x128xf32, #tpu.memory_space<vmem>>, vector<128x128xf32>
    tpu.vector_store %arg4[%c0_6, %c0_7], %7 {strides = array<i32>} : memref<128x128xf32, #tpu.memory_space<vmem>>, vector<128x128xf32>,
    return
  }
  func.func @transform_0(%arg0: i32) -> (i32, i32) {
    %c0_i32 = arith.constant 0 : i32
    %c0_i32_0 = arith.constant 0 : i32
    return %arg0, %c0_i32 : i32, i32
  }
  func.func @transform_1(%arg0: i32) -> (i32, i32) {
    %c0_i32 = arith.constant 0 : i32
    %c0_i32_0 = arith.constant 0 : i32
    %c0_i32_1 = arith.constant 0 : i32
    return %c0_i32, %c0_i32_0 : i32, i32
  }
  func.func @transform_2(%arg0: i32) -> (i32, i32) {
    %c0_i32 = arith.constant 0 : i32
    %c0_i32_0 = arith.constant 0 : i32
    %c0_i32_1 = arith.constant 0 : i32
    return %c0_i32, %c0_i32_0 : i32, i32
  }
  func.func @transform_3(%arg0: i32) -> (i32, i32) {
    %c0_i32 = arith.constant 0 : i32
    %c0_i32_0 = arith.constant 0 : i32
    return %arg0, %c0_i32 : i32, i32
  }
}

module attributes {stable_mosaic.version = 11 : i64} {
  func.func @_matmul_bias_res_kernel(%arg0: i32, %arg1: memref<128x144xbf16, #tpu.memory_space<vmem>>, %arg2: memref<144x128xbf16, #tpu.memory_space<vmem>>, %arg3: memref<1x128xf32, #tpu.memory_space<vmem>>, %arg4: memref<128x128xf32, #tpu.memory_space<vmem>>, %arg5: memref<128x128xf32, #tpu.memory_space<vmem>>) attributes {dimension_semantics = [#tpu.dimension_semantics<parallel>], iteration_bounds = array<i64: 1>, scalar_prefetch = 0 : i64, scratch_operands = 0 : i64, tpu.core_type = #tpu.core_type<tc>, window_params = [{transform_indices = @transform_0, window_bounds = array<i64: 128, 144>}, {pipeline_mode = #tpu.pipeline_mode<synchronous>, transform_indices = @transform_1, window_bounds = array<i64: 144, 128>}, {pipeline_mode = #tpu.pipeline_mode<synchronous>, transform_indices = @transform_2, window_bounds = array<i64: 1, 128>}, {transform_indices = @transform_3, window_bounds = array<i64: 128, 128>}, {transform_indices = @transform_4, window_bounds = array<i64: 128, 128>}]} {
    %c0 = arith.constant 0 : index
    %c0_0 = arith.constant 0 : index
    %0 = vector.load %arg1[%c0, %c0_0] : memref<128x144xbf16, #tpu.memory_space<vmem>>, vector<128x144xbf16>
    %c0_1 = arith.constant 0 : index
    %c0_2 = arith.constant 0 : index
    %1 = vector.load %arg2[%c0_1, %c0_2] : memref<144x128xbf16, #tpu.memory_space<vmem>>, vector<144x128xbf16>
    %cst = arith.constant dense<0.000000e+00> : vector<128x128xf32>
    %2 = tpu.matmul %0, %1, %cst {dimension_numbers = #tpu.dot_dimension_numbers<[1], [0], [0], [1], [0, 0, 1, 1], [], []>} : vector<128x144xbf16>, vector<144x128xbf16>, vector<128x128xf32> -> vector<128x128xf32>
    %c0_3 = arith.constant 0 : index
    %c0_4 = arith.constant 0 : index
    %3 = vector.load %arg3[%c0_3, %c0_4] : memref<1x128xf32, #tpu.memory_space<vmem>>, vector<1x128xf32>
    %4 = vector.broadcast %3 : vector<1x128xf32> to vector<128x128xf32>
    %5 = arith.addf %2, %4 : vector<128x128xf32>
    %c0_5 = arith.constant 0 : index
    %c0_6 = arith.constant 0 : index
    %6 = vector.load %arg4[%c0_5, %c0_6] : memref<128x128xf32, #tpu.memory_space<vmem>>, vector<128x128xf32>
    %7 = arith.addf %5, %6 : vector<128x128xf32>
    %cst_7 = arith.constant 0.000000e+00 : f32
    %8 = vector.broadcast %cst_7 : f32 to vector<128x128xf32>
    %9 = arith.maximumf %7, %8 : vector<128x128xf32>
    %c0_8 = arith.constant 0 : index
    %c0_9 = arith.constant 0 : index
    %10 = vector.load %arg5[%c0_8, %c0_9] : memref<128x128xf32, #tpu.memory_space<vmem>>, vector<128x128xf32>
    tpu.vector_store %arg5[%c0_8, %c0_9], %9 {strides = array<i32>} : memref<128x128xf32, #tpu.memory_space<vmem>>, vector<128x128xf32>,
    return
  }
  func.func @transform_0(%arg0: i32) -> (i32, i32) {
    %c0_i32 = arith.constant 0 : i32
    %c0_i32_0 = arith.constant 0 : i32
    return %arg0, %c0_i32 : i32, i32
  }
  func.func @transform_1(%arg0: i32) -> (i32, i32) {
    %c0_i32 = arith.constant 0 : i32
    %c0_i32_0 = arith.constant 0 : i32
    %c0_i32_1 = arith.constant 0 : i32
    return %c0_i32, %c0_i32_0 : i32, i32
  }
  func.func @transform_2(%arg0: i32) -> (i32, i32) {
    %c0_i32 = arith.constant 0 : i32
    %c0_i32_0 = arith.constant 0 : i32
    %c0_i32_1 = arith.constant 0 : i32
    return %c0_i32, %c0_i32_0 : i32, i32
  }
  func.func @transform_3(%arg0: i32) -> (i32, i32) {
    %c0_i32 = arith.constant 0 : i32
    %c0_i32_0 = arith.constant 0 : i32
    return %arg0, %c0_i32 : i32, i32
  }
  func.func @transform_4(%arg0: i32) -> (i32, i32) {
    %c0_i32 = arith.constant 0 : i32
    %c0_i32_0 = arith.constant 0 : i32
    return %arg0, %c0_i32 : i32, i32
  }
}

module attributes {stable_mosaic.version = 11 : i64} {
  func.func @_matmul_bias_kernel(%arg0: i32, %arg1: memref<32x16xbf16, #tpu.memory_space<vmem>>, %arg2: memref<16x128xbf16, #tpu.memory_space<vmem>>, %arg3: memref<1x128xf32, #tpu.memory_space<vmem>>, %arg4: memref<32x128xf32, #tpu.memory_space<vmem>>) attributes {dimension_semantics = [#tpu.dimension_semantics<parallel>], iteration_bounds = array<i64: 1>, scalar_prefetch = 0 : i64, scratch_operands = 0 : i64, tpu.core_type = #tpu.core_type<tc>, window_params = [{transform_indices = @transform_0, window_bounds = array<i64: 32, 16>}, {pipeline_mode = #tpu.pipeline_mode<synchronous>, transform_indices = @transform_1, window_bounds = array<i64: 16, 128>}, {pipeline_mode = #tpu.pipeline_mode<synchronous>, transform_indices = @transform_2, window_bounds = array<i64: 1, 128>}, {transform_indices = @transform_3, window_bounds = array<i64: 32, 128>}]} {
    %c0 = arith.constant 0 : index
    %c0_0 = arith.constant 0 : index
    %0 = vector.load %arg1[%c0, %c0_0] : memref<32x16xbf16, #tpu.memory_space<vmem>>, vector<32x16xbf16>
    %c0_1 = arith.constant 0 : index
    %c0_2 = arith.constant 0 : index
    %1 = vector.load %arg2[%c0_1, %c0_2] : memref<16x128xbf16, #tpu.memory_space<vmem>>, vector<16x128xbf16>
    %cst = arith.constant dense<0.000000e+00> : vector<32x128xf32>
    %2 = tpu.matmul %0, %1, %cst {dimension_numbers = #tpu.dot_dimension_numbers<[1], [0], [0], [1], [0, 0, 1, 1], [], []>} : vector<32x16xbf16>, vector<16x128xbf16>, vector<32x128xf32> -> vector<32x128xf32>
    %c0_3 = arith.constant 0 : index
    %c0_4 = arith.constant 0 : index
    %3 = vector.load %arg3[%c0_3, %c0_4] : memref<1x128xf32, #tpu.memory_space<vmem>>, vector<1x128xf32>
    %4 = vector.broadcast %3 : vector<1x128xf32> to vector<32x128xf32>
    %5 = arith.addf %2, %4 : vector<32x128xf32>
    %c0_5 = arith.constant 0 : index
    %c0_6 = arith.constant 0 : index
    %6 = vector.load %arg4[%c0_5, %c0_6] : memref<32x128xf32, #tpu.memory_space<vmem>>, vector<32x128xf32>
    tpu.vector_store %arg4[%c0_5, %c0_6], %5 {strides = array<i32>} : memref<32x128xf32, #tpu.memory_space<vmem>>, vector<32x128xf32>,
    return
  }
  func.func @transform_0(%arg0: i32) -> (i32, i32) {
    %c0_i32 = arith.constant 0 : i32
    %c0_i32_0 = arith.constant 0 : i32
    return %arg0, %c0_i32 : i32, i32
  }
  func.func @transform_1(%arg0: i32) -> (i32, i32) {
    %c0_i32 = arith.constant 0 : i32
    %c0_i32_0 = arith.constant 0 : i32
    %c0_i32_1 = arith.constant 0 : i32
    return %c0_i32, %c0_i32_0 : i32, i32
  }
  func.func @transform_2(%arg0: i32) -> (i32, i32) {
    %c0_i32 = arith.constant 0 : i32
    %c0_i32_0 = arith.constant 0 : i32
    %c0_i32_1 = arith.constant 0 : i32
    return %c0_i32, %c0_i32_0 : i32, i32
  }
  func.func @transform_3(%arg0: i32) -> (i32, i32) {
    %c0_i32 = arith.constant 0 : i32
    %c0_i32_0 = arith.constant 0 : i32
    return %arg0, %c0_i32 : i32, i32
  }
}

module attributes {stable_mosaic.version = 11 : i64} {
  func.func @_matmul_bias_kernel(%arg0: i32, %arg1: memref<32x144xbf16, #tpu.memory_space<vmem>>, %arg2: memref<144x128xbf16, #tpu.memory_space<vmem>>, %arg3: memref<1x128xf32, #tpu.memory_space<vmem>>, %arg4: memref<32x128xf32, #tpu.memory_space<vmem>>) attributes {dimension_semantics = [#tpu.dimension_semantics<parallel>], iteration_bounds = array<i64: 1>, scalar_prefetch = 0 : i64, scratch_operands = 0 : i64, tpu.core_type = #tpu.core_type<tc>, window_params = [{transform_indices = @transform_0, window_bounds = array<i64: 32, 144>}, {pipeline_mode = #tpu.pipeline_mode<synchronous>, transform_indices = @transform_1, window_bounds = array<i64: 144, 128>}, {pipeline_mode = #tpu.pipeline_mode<synchronous>, transform_indices = @transform_2, window_bounds = array<i64: 1, 128>}, {transform_indices = @transform_3, window_bounds = array<i64: 32, 128>}]} {
    %c0 = arith.constant 0 : index
    %c0_0 = arith.constant 0 : index
    %0 = vector.load %arg1[%c0, %c0_0] : memref<32x144xbf16, #tpu.memory_space<vmem>>, vector<32x144xbf16>
    %c0_1 = arith.constant 0 : index
    %c0_2 = arith.constant 0 : index
    %1 = vector.load %arg2[%c0_1, %c0_2] : memref<144x128xbf16, #tpu.memory_space<vmem>>, vector<144x128xbf16>
    %cst = arith.constant dense<0.000000e+00> : vector<32x128xf32>
    %2 = tpu.matmul %0, %1, %cst {dimension_numbers = #tpu.dot_dimension_numbers<[1], [0], [0], [1], [0, 0, 1, 1], [], []>} : vector<32x144xbf16>, vector<144x128xbf16>, vector<32x128xf32> -> vector<32x128xf32>
    %c0_3 = arith.constant 0 : index
    %c0_4 = arith.constant 0 : index
    %3 = vector.load %arg3[%c0_3, %c0_4] : memref<1x128xf32, #tpu.memory_space<vmem>>, vector<1x128xf32>
    %4 = vector.broadcast %3 : vector<1x128xf32> to vector<32x128xf32>
    %5 = arith.addf %2, %4 : vector<32x128xf32>
    %cst_5 = arith.constant 0.000000e+00 : f32
    %6 = vector.broadcast %cst_5 : f32 to vector<32x128xf32>
    %7 = arith.maximumf %5, %6 : vector<32x128xf32>
    %c0_6 = arith.constant 0 : index
    %c0_7 = arith.constant 0 : index
    %8 = vector.load %arg4[%c0_6, %c0_7] : memref<32x128xf32, #tpu.memory_space<vmem>>, vector<32x128xf32>
    tpu.vector_store %arg4[%c0_6, %c0_7], %7 {strides = array<i32>} : memref<32x128xf32, #tpu.memory_space<vmem>>, vector<32x128xf32>,
    return
  }
  func.func @transform_0(%arg0: i32) -> (i32, i32) {
    %c0_i32 = arith.constant 0 : i32
    %c0_i32_0 = arith.constant 0 : i32
    return %arg0, %c0_i32 : i32, i32
  }
  func.func @transform_1(%arg0: i32) -> (i32, i32) {
    %c0_i32 = arith.constant 0 : i32
    %c0_i32_0 = arith.constant 0 : i32
    %c0_i32_1 = arith.constant 0 : i32
    return %c0_i32, %c0_i32_0 : i32, i32
  }
  func.func @transform_2(%arg0: i32) -> (i32, i32) {
    %c0_i32 = arith.constant 0 : i32
    %c0_i32_0 = arith.constant 0 : i32
    %c0_i32_1 = arith.constant 0 : i32
    return %c0_i32, %c0_i32_0 : i32, i32
  }
  func.func @transform_3(%arg0: i32) -> (i32, i32) {
    %c0_i32 = arith.constant 0 : i32
    %c0_i32_0 = arith.constant 0 : i32
    return %arg0, %c0_i32 : i32, i32
  }
}

module attributes {stable_mosaic.version = 11 : i64} {
  func.func @_matmul_bias_res_kernel(%arg0: i32, %arg1: memref<32x288xbf16, #tpu.memory_space<vmem>>, %arg2: memref<288x128xbf16, #tpu.memory_space<vmem>>, %arg3: memref<1x128xf32, #tpu.memory_space<vmem>>, %arg4: memref<32x128xf32, #tpu.memory_space<vmem>>, %arg5: memref<32x128xf32, #tpu.memory_space<vmem>>) attributes {dimension_semantics = [#tpu.dimension_semantics<parallel>], iteration_bounds = array<i64: 1>, scalar_prefetch = 0 : i64, scratch_operands = 0 : i64, tpu.core_type = #tpu.core_type<tc>, window_params = [{transform_indices = @transform_0, window_bounds = array<i64: 32, 288>}, {pipeline_mode = #tpu.pipeline_mode<synchronous>, transform_indices = @transform_1, window_bounds = array<i64: 288, 128>}, {pipeline_mode = #tpu.pipeline_mode<synchronous>, transform_indices = @transform_2, window_bounds = array<i64: 1, 128>}, {transform_indices = @transform_3, window_bounds = array<i64: 32, 128>}, {transform_indices = @transform_4, window_bounds = array<i64: 32, 128>}]} {
    %c0 = arith.constant 0 : index
    %c0_0 = arith.constant 0 : index
    %0 = vector.load %arg1[%c0, %c0_0] : memref<32x288xbf16, #tpu.memory_space<vmem>>, vector<32x288xbf16>
    %c0_1 = arith.constant 0 : index
    %c0_2 = arith.constant 0 : index
    %1 = vector.load %arg2[%c0_1, %c0_2] : memref<288x128xbf16, #tpu.memory_space<vmem>>, vector<288x128xbf16>
    %cst = arith.constant dense<0.000000e+00> : vector<32x128xf32>
    %2 = tpu.matmul %0, %1, %cst {dimension_numbers = #tpu.dot_dimension_numbers<[1], [0], [0], [1], [0, 0, 1, 1], [], []>} : vector<32x288xbf16>, vector<288x128xbf16>, vector<32x128xf32> -> vector<32x128xf32>
    %c0_3 = arith.constant 0 : index
    %c0_4 = arith.constant 0 : index
    %3 = vector.load %arg3[%c0_3, %c0_4] : memref<1x128xf32, #tpu.memory_space<vmem>>, vector<1x128xf32>
    %4 = vector.broadcast %3 : vector<1x128xf32> to vector<32x128xf32>
    %5 = arith.addf %2, %4 : vector<32x128xf32>
    %c0_5 = arith.constant 0 : index
    %c0_6 = arith.constant 0 : index
    %6 = vector.load %arg4[%c0_5, %c0_6] : memref<32x128xf32, #tpu.memory_space<vmem>>, vector<32x128xf32>
    %7 = arith.addf %5, %6 : vector<32x128xf32>
    %cst_7 = arith.constant 0.000000e+00 : f32
    %8 = vector.broadcast %cst_7 : f32 to vector<32x128xf32>
    %9 = arith.maximumf %7, %8 : vector<32x128xf32>
    %c0_8 = arith.constant 0 : index
    %c0_9 = arith.constant 0 : index
    %10 = vector.load %arg5[%c0_8, %c0_9] : memref<32x128xf32, #tpu.memory_space<vmem>>, vector<32x128xf32>
    tpu.vector_store %arg5[%c0_8, %c0_9], %9 {strides = array<i32>} : memref<32x128xf32, #tpu.memory_space<vmem>>, vector<32x128xf32>,
    return
  }
  func.func @transform_0(%arg0: i32) -> (i32, i32) {
    %c0_i32 = arith.constant 0 : i32
    %c0_i32_0 = arith.constant 0 : i32
    return %arg0, %c0_i32 : i32, i32
  }
  func.func @transform_1(%arg0: i32) -> (i32, i32) {
    %c0_i32 = arith.constant 0 : i32
    %c0_i32_0 = arith.constant 0 : i32
    %c0_i32_1 = arith.constant 0 : i32
    return %c0_i32, %c0_i32_0 : i32, i32
  }
  func.func @transform_2(%arg0: i32) -> (i32, i32) {
    %c0_i32 = arith.constant 0 : i32
    %c0_i32_0 = arith.constant 0 : i32
    %c0_i32_1 = arith.constant 0 : i32
    return %c0_i32, %c0_i32_0 : i32, i32
  }
  func.func @transform_3(%arg0: i32) -> (i32, i32) {
    %c0_i32 = arith.constant 0 : i32
    %c0_i32_0 = arith.constant 0 : i32
    return %arg0, %c0_i32 : i32, i32
  }
  func.func @transform_4(%arg0: i32) -> (i32, i32) {
    %c0_i32 = arith.constant 0 : i32
    %c0_i32_0 = arith.constant 0 : i32
    return %arg0, %c0_i32 : i32, i32
  }
}

</mosaic_0001>

<bundles_post_ra>
// kernel: _lambda_.9
= control target key start
LH: loop header
LB: loop body
LE: loop exit
PB: predicated region body
PF: predicated region fallthrough
CT: control target
= control target key end

     0   :  { %vm355_vm0 = vcmask 1044480   ;;  %vm356_vm1 = vcmask 1045504   ;;  %v873_v2 = vmov 65535   ;;  %vm258_vm2 = vcmask 220160   ;;  %s1292_s1 = inlined_call_operand.vmem [shape: bf16[27,128], index: 1, kind: input, shape index: {}]   ;;  %s1293_s2 = inlined_call_operand.vmem [shape: f32[1,128], index: 2, kind: input, shape index: {}]   ;;  %s1294_s0 = inlined_call_operand.vmem [shape: bf16[512,27], index: 0, kind: input, shape index: {}]   ;;  %s1295_s3 = inlined_call_operand.vmem [shape: f32[512,128], index: 3, kind: output, shape index: {}]  }
   0x1   :  { %v797_v0 = vld [vmem:[%s1292_s1 + $0x8] sm:$0xf]  ;;  %v864_v1 = vld [vmem:[%s1292_s1 + $0x8] sm:$0x30]  ;;  %v357_v3 = vsel %vm355_vm0, 4294967295, %v873_v2  ;;  %v863_v7 = vld [vmem:[%s1292_s1] sm:$0xff] }
   0x2   :  { %v798_v4 = vor.u32 %v864_v1, %v797_v0  ;;  %v358_v5 = vsel %vm356_vm1, %v357_v3, 0  ;;  %v831_v8 = vld [vmem:[%s1294_s0] sm:$0xff]  ;;  %v832_v12 = vld [vmem:[%s1294_s0 + $0x8] sm:$0xff]  ;;  %v833_v16 = vld [vmem:[%s1294_s0 + $0x10] sm:$0xff] }
   0x3   :  { %v839_v9 = vld [vmem:[%s1294_s0 + $0x40] sm:$0xff]  ;;  %v840_v13 = vld [vmem:[%s1294_s0 + $0x48] sm:$0xff]  ;;  %v841_v17 = vld [vmem:[%s1294_s0 + $0x50] sm:$0xff] }
   0x4   :  { %v360_v6 = vand.u32 %v798_v4, %v358_v5  ;;  %v847_v10 = vld [vmem:[%s1294_s0 + $0x80] sm:$0xff]  ;;  %v848_v14 = vld [vmem:[%s1294_s0 + $0x88] sm:$0xff]  ;;  %v849_v18 = vld [vmem:[%s1294_s0 + $0x90] sm:$0xff] }
   0x5   :  { %v855_v11 = vld [vmem:[%s1294_s0 + $0xc0] sm:$0xff]  ;;  %v856_v15 = vld [vmem:[%s1294_s0 + $0xc8] sm:$0xff]  ;;  %v857_v19 = vld [vmem:[%s1294_s0 + $0xd0] sm:$0xff] }
   0x6   :  { %368 = vmatpush.bf16.msra.mxu0 %v360_v6  ;;  %865 = vmatpush.bf16.msra.mxu1 %v360_v6  ;;  %v834_v20 = vld [vmem:[%s1294_s0 + $0x18] sm:$0xff]  ;;  %v835_v24 = vld [vmem:[%s1294_s0 + $0x20] sm:$0xff]  ;;  %v836_v28 = vld [vmem:[%s1294_s0 + $0x28] sm:$0xff] }
   0x7   :  { %866 = vmatpush.bf16.msra.mxu2 %v360_v6  ;;  %867 = vmatpush.bf16.msra.mxu3 %v360_v6  ;;  %v842_v21 = vld [vmem:[%s1294_s0 + $0x58] sm:$0xff]  ;;  %v843_v25 = vld [vmem:[%s1294_s0 + $0x60] sm:$0xff]  ;;  %v844_v29 = vld [vmem:[%s1294_s0 + $0x68] sm:$0xff] }
   0x8   :  { %v850_v22 = vld [vmem:[%s1294_s0 + $0x98] sm:$0xff]  ;;  %v851_v26 = vld [vmem:[%s1294_s0 + $0xa0] sm:$0xff]  ;;  %v852_v30 = vld [vmem:[%s1294_s0 + $0xa8] sm:$0xff] }
   0x9   :  { %v858_v23 = vld [vmem:[%s1294_s0 + $0xd8] sm:$0xff]  ;;  %v859_v27 = vld [vmem:[%s1294_s0 + $0xe0] sm:$0xff]  ;;  %v860_v31 = vld [vmem:[%s1294_s0 + $0xe8] sm:$0xff] }
   0xa   :  { %369 = vmatpush.bf16.msra.mxu0 %v863_v7  ;;  %868 = vmatpush.bf16.msra.mxu1 %v863_v7  ;;  %v837_v32 = vld [vmem:[%s1294_s0 + $0x30] sm:$0xff]  ;;  %v838_v36 = vld [vmem:[%s1294_s0 + $0x38] sm:$0xff]  ;;  %v1034_v40 = vld [vmem:[%s1293_s2] ss:$0 sm:$0xff] }
   0xb   :  { %869 = vmatpush.bf16.msra.mxu2 %v863_v7  ;;  %870 = vmatpush.bf16.msra.mxu3 %v863_v7  ;;  %v845_v33 = vld [vmem:[%s1294_s0 + $0x70] sm:$0xff]  ;;  %v846_v37 = vld [vmem:[%s1294_s0 + $0x78] sm:$0xff] }
   0xc   :  { %v853_v34 = vld [vmem:[%s1294_s0 + $0xb0] sm:$0xff]  ;;  %v854_v38 = vld [vmem:[%s1294_s0 + $0xb8] sm:$0xff] }
   0xd   :  { %799 = vmatmul.msk.bf16.vlgmr.msra.gmra.mxu0 %vm258_vm2, %v831_v8  ;;  %807 = vmatmul.msk.bf16.vlgmr.msra.gmra.mxu1 %vm258_vm2, %v839_v9  ;;  %v861_v35 = vld [vmem:[%s1294_s0 + $0xf0] sm:$0xff]  ;;  %v862_v39 = vld [vmem:[%s1294_s0 + $0xf8] sm:$0xff] }
   0xe   :  { %815 = vmatmul.msk.bf16.vlgmr.msra.gmra.mxu2 %vm258_vm2, %v847_v10  ;;  %823 = vmatmul.msk.bf16.vlgmr.msra.gmra.mxu3 %vm258_vm2, %v855_v11 }
  0x1d   :  { %800 = vmatmul.msk.bf16.gmra.mxu0 %vm258_vm2, %v832_v12  ;;  %808 = vmatmul.msk.bf16.gmra.mxu1 %vm258_vm2, %v840_v13 }
  0x1e   :  { %816 = vmatmul.msk.bf16.gmra.mxu2 %vm258_vm2, %v848_v14  ;;  %824 = vmatmul.msk.bf16.gmra.mxu3 %vm258_vm2, %v856_v15 }
  0x2d   :  { %801 = vmatmul.msk.bf16.gmra.mxu0 %vm258_vm2, %v833_v16  ;;  %809 = vmatmul.msk.bf16.gmra.mxu1 %vm258_vm2, %v841_v17 }
  0x2e   :  { %817 = vmatmul.msk.bf16.gmra.mxu2 %vm258_vm2, %v849_v18  ;;  %825 = vmatmul.msk.bf16.gmra.mxu3 %vm258_vm2, %v857_v19 }
  0x3d   :  { %802 = vmatmul.msk.bf16.gmra.mxu0 %vm258_vm2, %v834_v20  ;;  %810 = vmatmul.msk.bf16.gmra.mxu1 %vm258_vm2, %v842_v21 }
  0x3e   :  { %818 = vmatmul.msk.bf16.gmra.mxu2 %vm258_vm2, %v850_v22  ;;  %826 = vmatmul.msk.bf16.gmra.mxu3 %vm258_vm2, %v858_v23 }
  0x4d   :  { %803 = vmatmul.msk.bf16.gmra.mxu0 %vm258_vm2, %v835_v24  ;;  %811 = vmatmul.msk.bf16.gmra.mxu1 %vm258_vm2, %v843_v25 }
  0x4e   :  { %819 = vmatmul.msk.bf16.gmra.mxu2 %vm258_vm2, %v851_v26  ;;  %827 = vmatmul.msk.bf16.gmra.mxu3 %vm258_vm2, %v859_v27 }
  0x5d   :  { %804 = vmatmul.msk.bf16.gmra.mxu0 %vm258_vm2, %v836_v28  ;;  %812 = vmatmul.msk.bf16.gmra.mxu1 %vm258_vm2, %v844_v29 }
  0x5e   :  { %820 = vmatmul.msk.bf16.gmra.mxu2 %vm258_vm2, %v852_v30  ;;  %828 = vmatmul.msk.bf16.gmra.mxu3 %vm258_vm2, %v860_v31 }
  0x6d   :  { %805 = vmatmul.msk.bf16.gmra.mxu0 %vm258_vm2, %v837_v32  ;;  %813 = vmatmul.msk.bf16.gmra.mxu1 %vm258_vm2, %v845_v33 }
  0x6e   :  { %821 = vmatmul.msk.bf16.gmra.mxu2 %vm258_vm2, %v853_v34  ;;  %829 = vmatmul.msk.bf16.gmra.mxu3 %vm258_vm2, %v861_v35 }
  0x7d   :  { %806 = vmatmul.msk.bf16.gmra.mxu0 %vm258_vm2, %v838_v36  ;;  %814 = vmatmul.msk.bf16.gmra.mxu1 %vm258_vm2, %v846_v37 }
  0x7e   :  { %822 = vmatmul.msk.bf16.gmra.mxu2 %vm258_vm2, %v854_v38  ;;  %830 = vmatmul.msk.bf16.gmra.mxu3 %vm258_vm2, %v862_v39 }
  0x8a   :  { %v371_v41 = vpop.f32.mrf.mxu0  ;;  %v411_v42 = vpop.f32.mrf.mxu1 }
  0x8b   :  { %v372_v43 = vadd.f32 %v1034_v40, %v371_v41  ;;  %v412_v44 = vadd.f32 %v1034_v40, %v411_v42 }
  0x8d   :  { %v531_v45 = vmax.f32 %v372_v43, 0.0  ;;  %v547_v46 = vmax.f32 %v412_v44, 0.0 }
  0x8f   :  { %595 = vst [vmem:[%s1295_s3] sm:$0xff] %v531_v45 }
  0x90   :  { %611 = vst [vmem:[%s1295_s3 + $0x80] sm:$0xff] %v547_v46 }
  0x91   :  { %v451_v47 = vpop.f32.mrf.mxu2  ;;  %v491_v48 = vpop.f32.mrf.mxu3 }
  0x92   :  { %v452_v49 = vadd.f32 %v1034_v40, %v451_v47  ;;  %v492_v50 = vadd.f32 %v1034_v40, %v491_v48  ;;  %v373_v51 = vpop.f32.mrf.mxu0  ;;  %v413_v52 = vpop.f32.mrf.mxu1 }
  0x93   :  { %v374_v53 = vadd.f32 %v1034_v40, %v373_v51  ;;  %v414_v54 = vadd.f32 %v1034_v40, %v413_v52 }
  0x94   :  { %v563_v55 = vmax.f32 %v452_v49, 0.0  ;;  %v579_v56 = vmax.f32 %v492_v50, 0.0 }
  0x95   :  { %v532_v57 = vmax.f32 %v374_v53, 0.0  ;;  %v548_v58 = vmax.f32 %v414_v54, 0.0 }
  0x96   :  { %627 = vst [vmem:[%s1295_s3 + $0x100] sm:$0xff] %v563_v55 }
  0x97   :  { %643 = vst [vmem:[%s1295_s3 + $0x180] sm:$0xff] %v579_v56 }
  0x98   :  { %596 = vst [vmem:[%s1295_s3 + $0x8] sm:$0xff] %v532_v57 }
  0x99   :  { %612 = vst [vmem:[%s1295_s3 + $0x88] sm:$0xff] %v548_v58  ;;  %v453_v59 = vpop.f32.mrf.mxu2  ;;  %v493_v60 = vpop.f32.mrf.mxu3 }
  0x9a   :  { %v454_v61 = vadd.f32 %v1034_v40, %v453_v59  ;;  %v494_v62 = vadd.f32 %v1034_v40, %v493_v60  ;;  %v376_v63 = vpop.f32.mrf.mxu0  ;;  %v416_v0 = vpop.f32.mrf.mxu1 }
  0x9b   :  { %v377_v1 = vadd.f32 %v1034_v40, %v376_v63  ;;  %v417_v2 = vadd.f32 %v1034_v40, %v416_v0 }
  0x9c   :  { %v564_v3 = vmax.f32 %v454_v61, 0.0  ;;  %v580_v4 = vmax.f32 %v494_v62, 0.0 }
  0x9d   :  { %v533_v5 = vmax.f32 %v377_v1, 0.0  ;;  %v549_v6 = vmax.f32 %v417_v2, 0.0 }
  0x9e   :  { %628 = vst [vmem:[%s1295_s3 + $0x108] sm:$0xff] %v564_v3 }
  0x9f   :  { %644 = vst [vmem:[%s1295_s3 + $0x188] sm:$0xff] %v580_v4 }
  0xa0   :  { %597 = vst [vmem:[%s1295_s3 + $0x10] sm:$0xff] %v533_v5 }
  0xa1   :  { %613 = vst [vmem:[%s1295_s3 + $0x90] sm:$0xff] %v549_v6  ;;  %v456_v7 = vpop.f32.mrf.mxu2  ;;  %v496_v8 = vpop.f32.mrf.mxu3 }
  0xa2   :  { %v457_v9 = vadd.f32 %v1034_v40, %v456_v7  ;;  %v497_v10 = vadd.f32 %v1034_v40, %v496_v8  ;;  %v378_v11 = vpop.f32.mrf.mxu0  ;;  %v418_v12 = vpop.f32.mrf.mxu1 }
  0xa3   :  { %v379_v13 = vadd.f32 %v1034_v40, %v378_v11  ;;  %v419_v14 = vadd.f32 %v1034_v40, %v418_v12 }
  0xa4   :  { %v565_v15 = vmax.f32 %v457_v9, 0.0  ;;  %v581_v16 = vmax.f32 %v497_v10, 0.0 }
  0xa5   :  { %v534_v17 = vmax.f32 %v379_v13, 0.0  ;;  %v550_v18 = vmax.f32 %v419_v14, 0.0 }
  0xa6   :  { %629 = vst [vmem:[%s1295_s3 + $0x110] sm:$0xff] %v565_v15 }
  0xa7   :  { %645 = vst [vmem:[%s1295_s3 + $0x190] sm:$0xff] %v581_v16 }
  0xa8   :  { %598 = vst [vmem:[%s1295_s3 + $0x18] sm:$0xff] %v534_v17 }
  0xa9   :  { %614 = vst [vmem:[%s1295_s3 + $0x98] sm:$0xff] %v550_v18  ;;  %v458_v19 = vpop.f32.mrf.mxu2  ;;  %v498_v20 = vpop.f32.mrf.mxu3 }
  0xaa   :  { %v459_v21 = vadd.f32 %v1034_v40, %v458_v19  ;;  %v499_v22 = vadd.f32 %v1034_v40, %v498_v20  ;;  %v381_v23 = vpop.f32.mrf.mxu0  ;;  %v421_v24 = vpop.f32.mrf.mxu1 }
  0xab   :  { %v382_v25 = vadd.f32 %v1034_v40, %v381_v23  ;;  %v422_v26 = vadd.f32 %v1034_v40, %v421_v24 }
  0xac   :  { %v566_v27 = vmax.f32 %v459_v21, 0.0  ;;  %v582_v28 = vmax.f32 %v499_v22, 0.0 }
  0xad   :  { %v535_v29 = vmax.f32 %v382_v25, 0.0  ;;  %v551_v30 = vmax.f32 %v422_v26, 0.0 }
  0xae   :  { %630 = vst [vmem:[%s1295_s3 + $0x118] sm:$0xff] %v566_v27 }
  0xaf   :  { %646 = vst [vmem:[%s1295_s3 + $0x198] sm:$0xff] %v582_v28 }
  0xb0   :  { %599 = vst [vmem:[%s1295_s3 + $0x20] sm:$0xff] %v535_v29 }
  0xb1   :  { %615 = vst [vmem:[%s1295_s3 + $0xa0] sm:$0xff] %v551_v30  ;;  %v461_v31 = vpop.f32.mrf.mxu2  ;;  %v501_v32 = vpop.f32.mrf.mxu3 }
  0xb2   :  { %v462_v33 = vadd.f32 %v1034_v40, %v461_v31  ;;  %v502_v34 = vadd.f32 %v1034_v40, %v501_v32  ;;  %v383_v35 = vpop.f32.mrf.mxu0  ;;  %v423_v36 = vpop.f32.mrf.mxu1 }
  0xb3   :  { %v384_v37 = vadd.f32 %v1034_v40, %v383_v35  ;;  %v424_v38 = vadd.f32 %v1034_v40, %v423_v36 }
  0xb4   :  { %v567_v39 = vmax.f32 %v462_v33, 0.0  ;;  %v583_v41 = vmax.f32 %v502_v34, 0.0 }
  0xb5   :  { %v536_v42 = vmax.f32 %v384_v37, 0.0  ;;  %v552_v43 = vmax.f32 %v424_v38, 0.0 }
  0xb6   :  { %631 = vst [vmem:[%s1295_s3 + $0x120] sm:$0xff] %v567_v39 }
  0xb7   :  { %647 = vst [vmem:[%s1295_s3 + $0x1a0] sm:$0xff] %v583_v41 }
  0xb8   :  { %600 = vst [vmem:[%s1295_s3 + $0x28] sm:$0xff] %v536_v42 }
  0xb9   :  { %616 = vst [vmem:[%s1295_s3 + $0xa8] sm:$0xff] %v552_v43  ;;  %v463_v44 = vpop.f32.mrf.mxu2  ;;  %v503_v45 = vpop.f32.mrf.mxu3 }
  0xba   :  { %v464_v46 = vadd.f32 %v1034_v40, %v463_v44  ;;  %v504_v47 = vadd.f32 %v1034_v40, %v503_v45  ;;  %v386_v48 = vpop.f32.mrf.mxu0  ;;  %v426_v49 = vpop.f32.mrf.mxu1 }
  0xbb   :  { %v387_v50 = vadd.f32 %v1034_v40, %v386_v48  ;;  %v427_v51 = vadd.f32 %v1034_v40, %v426_v49 }
  0xbc   :  { %v568_v52 = vmax.f32 %v464_v46, 0.0  ;;  %v584_v53 = vmax.f32 %v504_v47, 0.0 }
  0xbd   :  { %v537_v54 = vmax.f32 %v387_v50, 0.0  ;;  %v553_v55 = vmax.f32 %v427_v51, 0.0 }
  0xbe   :  { %632 = vst [vmem:[%s1295_s3 + $0x128] sm:$0xff] %v568_v52 }
  0xbf   :  { %648 = vst [vmem:[%s1295_s3 + $0x1a8] sm:$0xff] %v584_v53 }
  0xc0   :  { %601 = vst [vmem:[%s1295_s3 + $0x30] sm:$0xff] %v537_v54 }
  0xc1   :  { %617 = vst [vmem:[%s1295_s3 + $0xb0] sm:$0xff] %v553_v55  ;;  %v466_v56 = vpop.f32.mrf.mxu2  ;;  %v506_v57 = vpop.f32.mrf.mxu3 }
  0xc2   :  { %v467_v58 = vadd.f32 %v1034_v40, %v466_v56  ;;  %v507_v59 = vadd.f32 %v1034_v40, %v506_v57  ;;  %v388_v60 = vpop.f32.mrf.mxu0  ;;  %v428_v61 = vpop.f32.mrf.mxu1 }
  0xc3   :  { %v389_v62 = vadd.f32 %v1034_v40, %v388_v60  ;;  %v429_v63 = vadd.f32 %v1034_v40, %v428_v61 }
  0xc4   :  { %v569_v0 = vmax.f32 %v467_v58, 0.0  ;;  %v585_v1 = vmax.f32 %v507_v59, 0.0 }
  0xc5   :  { %v538_v2 = vmax.f32 %v389_v62, 0.0  ;;  %v554_v3 = vmax.f32 %v429_v63, 0.0 }
  0xc6   :  { %633 = vst [vmem:[%s1295_s3 + $0x130] sm:$0xff] %v569_v0 }
  0xc7   :  { %649 = vst [vmem:[%s1295_s3 + $0x1b0] sm:$0xff] %v585_v1 }
  0xc8   :  { %602 = vst [vmem:[%s1295_s3 + $0x38] sm:$0xff] %v538_v2 }
  0xc9   :  { %618 = vst [vmem:[%s1295_s3 + $0xb8] sm:$0xff] %v554_v3  ;;  %v468_v4 = vpop.f32.mrf.mxu2  ;;  %v508_v5 = vpop.f32.mrf.mxu3 }
  0xca   :  { %v469_v6 = vadd.f32 %v1034_v40, %v468_v4  ;;  %v509_v7 = vadd.f32 %v1034_v40, %v508_v5  ;;  %v391_v8 = vpop.f32.mrf.mxu0  ;;  %v431_v9 = vpop.f32.mrf.mxu1 }
  0xcb   :  { %v392_v10 = vadd.f32 %v1034_v40, %v391_v8  ;;  %v432_v11 = vadd.f32 %v1034_v40, %v431_v9 }
  0xcc   :  { %v570_v12 = vmax.f32 %v469_v6, 0.0  ;;  %v586_v13 = vmax.f32 %v509_v7, 0.0 }
  0xcd   :  { %v539_v14 = vmax.f32 %v392_v10, 0.0  ;;  %v555_v15 = vmax.f32 %v432_v11, 0.0 }
  0xce   :  { %634 = vst [vmem:[%s1295_s3 + $0x138] sm:$0xff] %v570_v12 }
  0xcf   :  { %650 = vst [vmem:[%s1295_s3 + $0x1b8] sm:$0xff] %v586_v13 }
  0xd0   :  { %603 = vst [vmem:[%s1295_s3 + $0x40] sm:$0xff] %v539_v14 }
  0xd1   :  { %619 = vst [vmem:[%s1295_s3 + $0xc0] sm:$0xff] %v555_v15  ;;  %v471_v16 = vpop.f32.mrf.mxu2  ;;  %v511_v17 = vpop.f32.mrf.mxu3 }
  0xd2   :  { %v472_v18 = vadd.f32 %v1034_v40, %v471_v16  ;;  %v512_v19 = vadd.f32 %v1034_v40, %v511_v17  ;;  %v393_v20 = vpop.f32.mrf.mxu0  ;;  %v433_v21 = vpop.f32.mrf.mxu1 }
  0xd3   :  { %v394_v22 = vadd.f32 %v1034_v40, %v393_v20  ;;  %v434_v23 = vadd.f32 %v1034_v40, %v433_v21 }
  0xd4   :  { %v571_v24 = vmax.f32 %v472_v18, 0.0  ;;  %v587_v25 = vmax.f32 %v512_v19, 0.0 }
  0xd5   :  { %v540_v26 = vmax.f32 %v394_v22, 0.0  ;;  %v556_v27 = vmax.f32 %v434_v23, 0.0 }
  0xd6   :  { %635 = vst [vmem:[%s1295_s3 + $0x140] sm:$0xff] %v571_v24 }
  0xd7   :  { %651 = vst [vmem:[%s1295_s3 + $0x1c0] sm:$0xff] %v587_v25 }
  0xd8   :  { %604 = vst [vmem:[%s1295_s3 + $0x48] sm:$0xff] %v540_v26 }
  0xd9   :  { %620 = vst [vmem:[%s1295_s3 + $0xc8] sm:$0xff] %v556_v27  ;;  %v473_v28 = vpop.f32.mrf.mxu2  ;;  %v513_v29 = vpop.f32.mrf.mxu3 }
  0xda   :  { %v474_v30 = vadd.f32 %v1034_v40, %v473_v28  ;;  %v514_v31 = vadd.f32 %v1034_v40, %v513_v29  ;;  %v396_v32 = vpop.f32.mrf.mxu0  ;;  %v436_v33 = vpop.f32.mrf.mxu1 }
  0xdb   :  { %v397_v34 = vadd.f32 %v1034_v40, %v396_v32  ;;  %v437_v35 = vadd.f32 %v1034_v40, %v436_v33 }
  0xdc   :  { %v572_v36 = vmax.f32 %v474_v30, 0.0  ;;  %v588_v37 = vmax.f32 %v514_v31, 0.0 }
  0xdd   :  { %v541_v38 = vmax.f32 %v397_v34, 0.0  ;;  %v557_v39 = vmax.f32 %v437_v35, 0.0 }
  0xde   :  { %636 = vst [vmem:[%s1295_s3 + $0x148] sm:$0xff] %v572_v36 }
  0xdf   :  { %652 = vst [vmem:[%s1295_s3 + $0x1c8] sm:$0xff] %v588_v37 }
  0xe0   :  { %605 = vst [vmem:[%s1295_s3 + $0x50] sm:$0xff] %v541_v38 }
  0xe1   :  { %621 = vst [vmem:[%s1295_s3 + $0xd0] sm:$0xff] %v557_v39  ;;  %v476_v41 = vpop.f32.mrf.mxu2  ;;  %v516_v42 = vpop.f32.mrf.mxu3 }
  0xe2   :  { %v477_v43 = vadd.f32 %v1034_v40, %v476_v41  ;;  %v517_v44 = vadd.f32 %v1034_v40, %v516_v42  ;;  %v398_v45 = vpop.f32.mrf.mxu0  ;;  %v438_v46 = vpop.f32.mrf.mxu1 }
  0xe3   :  { %v399_v47 = vadd.f32 %v1034_v40, %v398_v45  ;;  %v439_v48 = vadd.f32 %v1034_v40, %v438_v46 }
  0xe4   :  { %v573_v49 = vmax.f32 %v477_v43, 0.0  ;;  %v589_v50 = vmax.f32 %v517_v44, 0.0 }
  0xe5   :  { %v542_v51 = vmax.f32 %v399_v47, 0.0  ;;  %v558_v52 = vmax.f32 %v439_v48, 0.0 }
  0xe6   :  { %637 = vst [vmem:[%s1295_s3 + $0x150] sm:$0xff] %v573_v49 }
  0xe7   :  { %653 = vst [vmem:[%s1295_s3 + $0x1d0] sm:$0xff] %v589_v50 }
  0xe8   :  { %606 = vst [vmem:[%s1295_s3 + $0x58] sm:$0xff] %v542_v51 }
  0xe9   :  { %622 = vst [vmem:[%s1295_s3 + $0xd8] sm:$0xff] %v558_v52  ;;  %v478_v53 = vpop.f32.mrf.mxu2  ;;  %v518_v54 = vpop.f32.mrf.mxu3 }
  0xea   :  { %v479_v55 = vadd.f32 %v1034_v40, %v478_v53  ;;  %v519_v56 = vadd.f32 %v1034_v40, %v518_v54  ;;  %v401_v57 = vpop.f32.mrf.mxu0  ;;  %v441_v58 = vpop.f32.mrf.mxu1 }
  0xeb   :  { %v402_v59 = vadd.f32 %v1034_v40, %v401_v57  ;;  %v442_v60 = vadd.f32 %v1034_v40, %v441_v58 }
  0xec   :  { %v574_v61 = vmax.f32 %v479_v55, 0.0  ;;  %v590_v62 = vmax.f32 %v519_v56, 0.0 }
  0xed   :  { %v543_v63 = vmax.f32 %v402_v59, 0.0  ;;  %v559_v0 = vmax.f32 %v442_v60, 0.0 }
  0xee   :  { %638 = vst [vmem:[%s1295_s3 + $0x158] sm:$0xff] %v574_v61 }
  0xef   :  { %654 = vst [vmem:[%s1295_s3 + $0x1d8] sm:$0xff] %v590_v62 }
  0xf0   :  { %607 = vst [vmem:[%s1295_s3 + $0x60] sm:$0xff] %v543_v63 }
  0xf1   :  { %623 = vst [vmem:[%s1295_s3 + $0xe0] sm:$0xff] %v559_v0  ;;  %v481_v1 = vpop.f32.mrf.mxu2  ;;  %v521_v2 = vpop.f32.mrf.mxu3 }
  0xf2   :  { %v482_v3 = vadd.f32 %v1034_v40, %v481_v1  ;;  %v522_v4 = vadd.f32 %v1034_v40, %v521_v2  ;;  %v403_v5 = vpop.f32.mrf.mxu0  ;;  %v443_v6 = vpop.f32.mrf.mxu1 }
  0xf3   :  { %v404_v7 = vadd.f32 %v1034_v40, %v403_v5  ;;  %v444_v8 = vadd.f32 %v1034_v40, %v443_v6 }
  0xf4   :  { %v575_v9 = vmax.f32 %v482_v3, 0.0  ;;  %v591_v10 = vmax.f32 %v522_v4, 0.0 }
  0xf5   :  { %v544_v11 = vmax.f32 %v404_v7, 0.0  ;;  %v560_v12 = vmax.f32 %v444_v8, 0.0 }
  0xf6   :  { %639 = vst [vmem:[%s1295_s3 + $0x160] sm:$0xff] %v575_v9 }
  0xf7   :  { %655 = vst [vmem:[%s1295_s3 + $0x1e0] sm:$0xff] %v591_v10 }
  0xf8   :  { %608 = vst [vmem:[%s1295_s3 + $0x68] sm:$0xff] %v544_v11 }
  0xf9   :  { %624 = vst [vmem:[%s1295_s3 + $0xe8] sm:$0xff] %v560_v12  ;;  %v483_v13 = vpop.f32.mrf.mxu2  ;;  %v523_v14 = vpop.f32.mrf.mxu3 }
  0xfa   :  { %v484_v15 = vadd.f32 %v1034_v40, %v483_v13  ;;  %v524_v16 = vadd.f32 %v1034_v40, %v523_v14  ;;  %v406_v17 = vpop.f32.mrf.mxu0  ;;  %v446_v18 = vpop.f32.mrf.mxu1 }
  0xfb   :  { %v407_v19 = vadd.f32 %v1034_v40, %v406_v17  ;;  %v447_v20 = vadd.f32 %v1034_v40, %v446_v18 }
  0xfc   :  { %v576_v21 = vmax.f32 %v484_v15, 0.0  ;;  %v592_v22 = vmax.f32 %v524_v16, 0.0 }
  0xfd   :  { %v545_v23 = vmax.f32 %v407_v19, 0.0  ;;  %v561_v24 = vmax.f32 %v447_v20, 0.0 }
  0xfe   :  { %640 = vst [vmem:[%s1295_s3 + $0x168] sm:$0xff] %v576_v21 }
  0xff   :  { %656 = vst [vmem:[%s1295_s3 + $0x1e8] sm:$0xff] %v592_v22 }
 0x100   :  { %609 = vst [vmem:[%s1295_s3 + $0x70] sm:$0xff] %v545_v23 }
 0x101   :  { %625 = vst [vmem:[%s1295_s3 + $0xf0] sm:$0xff] %v561_v24  ;;  %v486_v25 = vpop.f32.mrf.mxu2  ;;  %v526_v26 = vpop.f32.mrf.mxu3 }
 0x102   :  { %v487_v27 = vadd.f32 %v1034_v40, %v486_v25  ;;  %v527_v28 = vadd.f32 %v1034_v40, %v526_v26  ;;  %v408_v29 = vpop.f32.mrf.mxu0  ;;  %v448_v30 = vpop.f32.mrf.mxu1 }
 0x103   :  { %v409_v31 = vadd.f32 %v1034_v40, %v408_v29  ;;  %v449_v32 = vadd.f32 %v1034_v40, %v448_v30 }
 0x104   :  { %v577_v33 = vmax.f32 %v487_v27, 0.0  ;;  %v593_v34 = vmax.f32 %v527_v28, 0.0 }
 0x105   :  { %v546_v35 = vmax.f32 %v409_v31, 0.0  ;;  %v562_v36 = vmax.f32 %v449_v32, 0.0 }
 0x106   :  { %641 = vst [vmem:[%s1295_s3 + $0x170] sm:$0xff] %v577_v33 }
 0x107   :  { %657 = vst [vmem:[%s1295_s3 + $0x1f0] sm:$0xff] %v593_v34 }
 0x108   :  { %610 = vst [vmem:[%s1295_s3 + $0x78] sm:$0xff] %v546_v35 }
 0x109   :  { %626 = vst [vmem:[%s1295_s3 + $0xf8] sm:$0xff] %v562_v36  ;;  %v488_v37 = vpop.f32.mrf.mxu2  ;;  %v528_v38 = vpop.f32.mrf.mxu3 }
 0x10a   :  { %v489_v39 = vadd.f32 %v1034_v40, %v488_v37  ;;  %v529_v41 = vadd.f32 %v1034_v40, %v528_v38 }
 0x10c   :  { %v578_v42 = vmax.f32 %v489_v39, 0.0  ;;  %v594_v43 = vmax.f32 %v529_v41, 0.0 }
 0x10e   :  { %642 = vst [vmem:[%s1295_s3 + $0x178] sm:$0xff] %v578_v42 }
 0x10f   :  { %658 = vst [vmem:[%s1295_s3 + $0x1f8] sm:$0xff] %v594_v43 }

// kernel: _lambda_.10
= control target key start
LH: loop header
LB: loop body
LE: loop exit
PB: predicated region body
PF: predicated region fallthrough
CT: control target
= control target key end

     0   :  { %vm376_vm0 = vcmask 1043456   ;;  %vm279_vm1 = vcmask 588800   ;;  %s1333_s1 = inlined_call_operand.vmem [shape: bf16[72,128], index: 1, kind: input, shape index: {}]   ;;  %s1334_s2 = inlined_call_operand.vmem [shape: f32[1,128], index: 2, kind: input, shape index: {}]   ;;  %s1335_s0 = inlined_call_operand.vmem [shape: bf16[512,72], index: 0, kind: input, shape index: {}]   ;;  %s1336_s3 = inlined_call_operand.vmem [shape: f32[512,128], index: 3, kind: output, shape index: {}]  }
   0x1   :  { %v87_v0 = vld [vmem:[%s1333_s1 + $0x20] sm:$0xf]  ;;  %v892_v4 = vld [vmem:[%s1333_s1 + $0x18] sm:$0xff]  ;;  %v891_v5 = vld [vmem:[%s1333_s1 + $0x10] sm:$0xff] }
   0x2   :  { %v269_v1 = vunpack.c.l.b16 %v87_v0  ;;  %v890_v6 = vld [vmem:[%s1333_s1 + $0x8] sm:$0xff]  ;;  %v889_v7 = vld [vmem:[%s1333_s1] sm:$0xff]  ;;  %v859_v16 = vld [vmem:[%s1335_s0 + $0x10] sm:$0xff] }
   0x3   :  { %v857_v8 = vld [vmem:[%s1335_s0] sm:$0xff]  ;;  %v858_v12 = vld [vmem:[%s1335_s0 + $0x8] sm:$0xff]  ;;  %v867_v17 = vld [vmem:[%s1335_s0 + $0x50] sm:$0xff] }
   0x4   :  { %v274_v2 = vpack.c.b16 %v269_v1, %v269_v1  ;;  %v865_v9 = vld [vmem:[%s1335_s0 + $0x40] sm:$0xff]  ;;  %v866_v13 = vld [vmem:[%s1335_s0 + $0x48] sm:$0xff]  ;;  %v875_v18 = vld [vmem:[%s1335_s0 + $0x90] sm:$0xff] }
   0x5   :  { %v873_v10 = vld [vmem:[%s1335_s0 + $0x80] sm:$0xff]  ;;  %v874_v14 = vld [vmem:[%s1335_s0 + $0x88] sm:$0xff]  ;;  %v883_v19 = vld [vmem:[%s1335_s0 + $0xd0] sm:$0xff] }
   0x6   :  { %v378_v3 = vsel %vm376_vm0, %v274_v2, 0  ;;  %v881_v11 = vld [vmem:[%s1335_s0 + $0xc0] sm:$0xff]  ;;  %v882_v15 = vld [vmem:[%s1335_s0 + $0xc8] sm:$0xff]  ;;  %v860_v20 = vld [vmem:[%s1335_s0 + $0x18] sm:$0xff] }
   0x7   :  { %383 = vmatpush.bf16.msra.mxu0 %v378_v3  ;;  %893 = vmatpush.bf16.msra.mxu1 %v378_v3  ;;  %v868_v21 = vld [vmem:[%s1335_s0 + $0x58] sm:$0xff]  ;;  %v861_v24 = vld [vmem:[%s1335_s0 + $0x20] sm:$0xff]  ;;  %v862_v28 = vld [vmem:[%s1335_s0 + $0x28] sm:$0xff] }
   0x8   :  { %894 = vmatpush.bf16.msra.mxu2 %v378_v3  ;;  %895 = vmatpush.bf16.msra.mxu3 %v378_v3  ;;  %v876_v22 = vld [vmem:[%s1335_s0 + $0x98] sm:$0xff]  ;;  %v869_v25 = vld [vmem:[%s1335_s0 + $0x60] sm:$0xff]  ;;  %v870_v29 = vld [vmem:[%s1335_s0 + $0x68] sm:$0xff] }
   0x9   :  { %v884_v23 = vld [vmem:[%s1335_s0 + $0xd8] sm:$0xff]  ;;  %v877_v26 = vld [vmem:[%s1335_s0 + $0xa0] sm:$0xff]  ;;  %v878_v30 = vld [vmem:[%s1335_s0 + $0xa8] sm:$0xff] }
   0xa   :  { %v885_v27 = vld [vmem:[%s1335_s0 + $0xe0] sm:$0xff]  ;;  %v886_v31 = vld [vmem:[%s1335_s0 + $0xe8] sm:$0xff]  ;;  %v863_v32 = vld [vmem:[%s1335_s0 + $0x30] sm:$0xff] }
   0xb   :  { %384 = vmatpush.bf16.msra.mxu0 %v892_v4  ;;  %896 = vmatpush.bf16.msra.mxu1 %v892_v4  ;;  %v871_v33 = vld [vmem:[%s1335_s0 + $0x70] sm:$0xff]  ;;  %v864_v36 = vld [vmem:[%s1335_s0 + $0x38] sm:$0xff]  ;;  %v1075_v40 = vld [vmem:[%s1334_s2] ss:$0 sm:$0xff] }
   0xc   :  { %897 = vmatpush.bf16.msra.mxu2 %v892_v4  ;;  %898 = vmatpush.bf16.msra.mxu3 %v892_v4  ;;  %v879_v34 = vld [vmem:[%s1335_s0 + $0xb0] sm:$0xff]  ;;  %v872_v37 = vld [vmem:[%s1335_s0 + $0x78] sm:$0xff] }
   0xd   :  { %v887_v35 = vld [vmem:[%s1335_s0 + $0xf0] sm:$0xff]  ;;  %v880_v38 = vld [vmem:[%s1335_s0 + $0xb8] sm:$0xff] }
   0xe   :  { %v888_v39 = vld [vmem:[%s1335_s0 + $0xf8] sm:$0xff] }
   0xf   :  { %385 = vmatpush.bf16.msra.mxu0 %v891_v5  ;;  %899 = vmatpush.bf16.msra.mxu1 %v891_v5 }
  0x10   :  { %900 = vmatpush.bf16.msra.mxu2 %v891_v5  ;;  %901 = vmatpush.bf16.msra.mxu3 %v891_v5 }
  0x13   :  { %386 = vmatpush.bf16.msra.mxu0 %v890_v6  ;;  %902 = vmatpush.bf16.msra.mxu1 %v890_v6 }
  0x14   :  { %903 = vmatpush.bf16.msra.mxu2 %v890_v6  ;;  %904 = vmatpush.bf16.msra.mxu3 %v890_v6 }
  0x17   :  { %387 = vmatpush.bf16.msra.mxu0 %v889_v7  ;;  %905 = vmatpush.bf16.msra.mxu1 %v889_v7 }
  0x18   :  { %906 = vmatpush.bf16.msra.mxu2 %v889_v7  ;;  %907 = vmatpush.bf16.msra.mxu3 %v889_v7 }
  0x1a   :  { %825 = vmatmul.msk.bf16.vlgmr.msra.gmra.mxu0 %vm279_vm1, %v857_v8  ;;  %833 = vmatmul.msk.bf16.vlgmr.msra.gmra.mxu1 %vm279_vm1, %v865_v9 }
  0x1b   :  { %841 = vmatmul.msk.bf16.vlgmr.msra.gmra.mxu2 %vm279_vm1, %v873_v10  ;;  %849 = vmatmul.msk.bf16.vlgmr.msra.gmra.mxu3 %vm279_vm1, %v881_v11 }
  0x2a   :  { %826 = vmatmul.msk.bf16.gmra.mxu0 %vm279_vm1, %v858_v12  ;;  %834 = vmatmul.msk.bf16.gmra.mxu1 %vm279_vm1, %v866_v13 }
  0x2b   :  { %842 = vmatmul.msk.bf16.gmra.mxu2 %vm279_vm1, %v874_v14  ;;  %850 = vmatmul.msk.bf16.gmra.mxu3 %vm279_vm1, %v882_v15 }
  0x3a   :  { %827 = vmatmul.msk.bf16.gmra.mxu0 %vm279_vm1, %v859_v16  ;;  %835 = vmatmul.msk.bf16.gmra.mxu1 %vm279_vm1, %v867_v17 }
  0x3b   :  { %843 = vmatmul.msk.bf16.gmra.mxu2 %vm279_vm1, %v875_v18  ;;  %851 = vmatmul.msk.bf16.gmra.mxu3 %vm279_vm1, %v883_v19 }
  0x4a   :  { %828 = vmatmul.msk.bf16.gmra.mxu0 %vm279_vm1, %v860_v20  ;;  %836 = vmatmul.msk.bf16.gmra.mxu1 %vm279_vm1, %v868_v21 }
  0x4b   :  { %844 = vmatmul.msk.bf16.gmra.mxu2 %vm279_vm1, %v876_v22  ;;  %852 = vmatmul.msk.bf16.gmra.mxu3 %vm279_vm1, %v884_v23 }
  0x5a   :  { %829 = vmatmul.msk.bf16.gmra.mxu0 %vm279_vm1, %v861_v24  ;;  %837 = vmatmul.msk.bf16.gmra.mxu1 %vm279_vm1, %v869_v25 }
  0x5b   :  { %845 = vmatmul.msk.bf16.gmra.mxu2 %vm279_vm1, %v877_v26  ;;  %853 = vmatmul.msk.bf16.gmra.mxu3 %vm279_vm1, %v885_v27 }
  0x6a   :  { %830 = vmatmul.msk.bf16.gmra.mxu0 %vm279_vm1, %v862_v28  ;;  %838 = vmatmul.msk.bf16.gmra.mxu1 %vm279_vm1, %v870_v29 }
  0x6b   :  { %846 = vmatmul.msk.bf16.gmra.mxu2 %vm279_vm1, %v878_v30  ;;  %854 = vmatmul.msk.bf16.gmra.mxu3 %vm279_vm1, %v886_v31 }
  0x7a   :  { %831 = vmatmul.msk.bf16.gmra.mxu0 %vm279_vm1, %v863_v32  ;;  %839 = vmatmul.msk.bf16.gmra.mxu1 %vm279_vm1, %v871_v33 }
  0x7b   :  { %847 = vmatmul.msk.bf16.gmra.mxu2 %vm279_vm1, %v879_v34  ;;  %855 = vmatmul.msk.bf16.gmra.mxu3 %vm279_vm1, %v887_v35 }
  0x8a   :  { %832 = vmatmul.msk.bf16.gmra.mxu0 %vm279_vm1, %v864_v36  ;;  %840 = vmatmul.msk.bf16.gmra.mxu1 %vm279_vm1, %v872_v37 }
  0x8b   :  { %848 = vmatmul.msk.bf16.gmra.mxu2 %vm279_vm1, %v880_v38  ;;  %856 = vmatmul.msk.bf16.gmra.mxu3 %vm279_vm1, %v888_v39 }
  0x97   :  { %v389_v41 = vpop.f32.mrf.mxu0  ;;  %v429_v42 = vpop.f32.mrf.mxu1 }
  0x98   :  { %v390_v43 = vadd.f32 %v1075_v40, %v389_v41  ;;  %v430_v44 = vadd.f32 %v1075_v40, %v429_v42 }
  0x9a   :  { %v549_v45 = vmax.f32 %v390_v43, 0.0  ;;  %v565_v46 = vmax.f32 %v430_v44, 0.0 }
  0x9c   :  { %613 = vst [vmem:[%s1336_s3] sm:$0xff] %v549_v45 }
  0x9d   :  { %629 = vst [vmem:[%s1336_s3 + $0x80] sm:$0xff] %v565_v46 }
  0x9e   :  { %v469_v47 = vpop.f32.mrf.mxu2  ;;  %v509_v48 = vpop.f32.mrf.mxu3 }
  0x9f   :  { %v470_v49 = vadd.f32 %v1075_v40, %v469_v47  ;;  %v510_v50 = vadd.f32 %v1075_v40, %v509_v48  ;;  %v391_v51 = vpop.f32.mrf.mxu0  ;;  %v431_v52 = vpop.f32.mrf.mxu1 }
  0xa0   :  { %v392_v53 = vadd.f32 %v1075_v40, %v391_v51  ;;  %v432_v54 = vadd.f32 %v1075_v40, %v431_v52 }
  0xa1   :  { %v581_v55 = vmax.f32 %v470_v49, 0.0  ;;  %v597_v56 = vmax.f32 %v510_v50, 0.0 }
  0xa2   :  { %v550_v57 = vmax.f32 %v392_v53, 0.0  ;;  %v566_v58 = vmax.f32 %v432_v54, 0.0 }
  0xa3   :  { %645 = vst [vmem:[%s1336_s3 + $0x100] sm:$0xff] %v581_v55 }
  0xa4   :  { %661 = vst [vmem:[%s1336_s3 + $0x180] sm:$0xff] %v597_v56 }
  0xa5   :  { %614 = vst [vmem:[%s1336_s3 + $0x8] sm:$0xff] %v550_v57 }
  0xa6   :  { %630 = vst [vmem:[%s1336_s3 + $0x88] sm:$0xff] %v566_v58  ;;  %v471_v59 = vpop.f32.mrf.mxu2  ;;  %v511_v60 = vpop.f32.mrf.mxu3 }
  0xa7   :  { %v472_v61 = vadd.f32 %v1075_v40, %v471_v59  ;;  %v512_v62 = vadd.f32 %v1075_v40, %v511_v60  ;;  %v394_v63 = vpop.f32.mrf.mxu0  ;;  %v434_v0 = vpop.f32.mrf.mxu1 }
  0xa8   :  { %v395_v1 = vadd.f32 %v1075_v40, %v394_v63  ;;  %v435_v2 = vadd.f32 %v1075_v40, %v434_v0 }
  0xa9   :  { %v582_v3 = vmax.f32 %v472_v61, 0.0  ;;  %v598_v4 = vmax.f32 %v512_v62, 0.0 }
  0xaa   :  { %v551_v5 = vmax.f32 %v395_v1, 0.0  ;;  %v567_v6 = vmax.f32 %v435_v2, 0.0 }
  0xab   :  { %646 = vst [vmem:[%s1336_s3 + $0x108] sm:$0xff] %v582_v3 }
  0xac   :  { %662 = vst [vmem:[%s1336_s3 + $0x188] sm:$0xff] %v598_v4 }
  0xad   :  { %615 = vst [vmem:[%s1336_s3 + $0x10] sm:$0xff] %v551_v5 }
  0xae   :  { %631 = vst [vmem:[%s1336_s3 + $0x90] sm:$0xff] %v567_v6  ;;  %v474_v7 = vpop.f32.mrf.mxu2  ;;  %v514_v8 = vpop.f32.mrf.mxu3 }
  0xaf   :  { %v475_v9 = vadd.f32 %v1075_v40, %v474_v7  ;;  %v515_v10 = vadd.f32 %v1075_v40, %v514_v8  ;;  %v396_v11 = vpop.f32.mrf.mxu0  ;;  %v436_v12 = vpop.f32.mrf.mxu1 }
  0xb0   :  { %v397_v13 = vadd.f32 %v1075_v40, %v396_v11  ;;  %v437_v14 = vadd.f32 %v1075_v40, %v436_v12 }
  0xb1   :  { %v583_v15 = vmax.f32 %v475_v9, 0.0  ;;  %v599_v16 = vmax.f32 %v515_v10, 0.0 }
  0xb2   :  { %v552_v17 = vmax.f32 %v397_v13, 0.0  ;;  %v568_v18 = vmax.f32 %v437_v14, 0.0 }
  0xb3   :  { %647 = vst [vmem:[%s1336_s3 + $0x110] sm:$0xff] %v583_v15 }
  0xb4   :  { %663 = vst [vmem:[%s1336_s3 + $0x190] sm:$0xff] %v599_v16 }
  0xb5   :  { %616 = vst [vmem:[%s1336_s3 + $0x18] sm:$0xff] %v552_v17 }
  0xb6   :  { %632 = vst [vmem:[%s1336_s3 + $0x98] sm:$0xff] %v568_v18  ;;  %v476_v19 = vpop.f32.mrf.mxu2  ;;  %v516_v20 = vpop.f32.mrf.mxu3 }
  0xb7   :  { %v477_v21 = vadd.f32 %v1075_v40, %v476_v19  ;;  %v517_v22 = vadd.f32 %v1075_v40, %v516_v20  ;;  %v399_v23 = vpop.f32.mrf.mxu0  ;;  %v439_v24 = vpop.f32.mrf.mxu1 }
  0xb8   :  { %v400_v25 = vadd.f32 %v1075_v40, %v399_v23  ;;  %v440_v26 = vadd.f32 %v1075_v40, %v439_v24 }
  0xb9   :  { %v584_v27 = vmax.f32 %v477_v21, 0.0  ;;  %v600_v28 = vmax.f32 %v517_v22, 0.0 }
  0xba   :  { %v553_v29 = vmax.f32 %v400_v25, 0.0  ;;  %v569_v30 = vmax.f32 %v440_v26, 0.0 }
  0xbb   :  { %648 = vst [vmem:[%s1336_s3 + $0x118] sm:$0xff] %v584_v27 }
  0xbc   :  { %664 = vst [vmem:[%s1336_s3 + $0x198] sm:$0xff] %v600_v28 }
  0xbd   :  { %617 = vst [vmem:[%s1336_s3 + $0x20] sm:$0xff] %v553_v29 }
  0xbe   :  { %633 = vst [vmem:[%s1336_s3 + $0xa0] sm:$0xff] %v569_v30  ;;  %v479_v31 = vpop.f32.mrf.mxu2  ;;  %v519_v32 = vpop.f32.mrf.mxu3 }
  0xbf   :  { %v480_v33 = vadd.f32 %v1075_v40, %v479_v31  ;;  %v520_v34 = vadd.f32 %v1075_v40, %v519_v32  ;;  %v401_v35 = vpop.f32.mrf.mxu0  ;;  %v441_v36 = vpop.f32.mrf.mxu1 }
  0xc0   :  { %v402_v37 = vadd.f32 %v1075_v40, %v401_v35  ;;  %v442_v38 = vadd.f32 %v1075_v40, %v441_v36 }
  0xc1   :  { %v585_v39 = vmax.f32 %v480_v33, 0.0  ;;  %v601_v41 = vmax.f32 %v520_v34, 0.0 }
  0xc2   :  { %v554_v42 = vmax.f32 %v402_v37, 0.0  ;;  %v570_v43 = vmax.f32 %v442_v38, 0.0 }
  0xc3   :  { %649 = vst [vmem:[%s1336_s3 + $0x120] sm:$0xff] %v585_v39 }
  0xc4   :  { %665 = vst [vmem:[%s1336_s3 + $0x1a0] sm:$0xff] %v601_v41 }
  0xc5   :  { %618 = vst [vmem:[%s1336_s3 + $0x28] sm:$0xff] %v554_v42 }
  0xc6   :  { %634 = vst [vmem:[%s1336_s3 + $0xa8] sm:$0xff] %v570_v43  ;;  %v481_v44 = vpop.f32.mrf.mxu2  ;;  %v521_v45 = vpop.f32.mrf.mxu3 }
  0xc7   :  { %v482_v46 = vadd.f32 %v1075_v40, %v481_v44  ;;  %v522_v47 = vadd.f32 %v1075_v40, %v521_v45  ;;  %v404_v48 = vpop.f32.mrf.mxu0  ;;  %v444_v49 = vpop.f32.mrf.mxu1 }
  0xc8   :  { %v405_v50 = vadd.f32 %v1075_v40, %v404_v48  ;;  %v445_v51 = vadd.f32 %v1075_v40, %v444_v49 }
  0xc9   :  { %v586_v52 = vmax.f32 %v482_v46, 0.0  ;;  %v602_v53 = vmax.f32 %v522_v47, 0.0 }
  0xca   :  { %v555_v54 = vmax.f32 %v405_v50, 0.0  ;;  %v571_v55 = vmax.f32 %v445_v51, 0.0 }
  0xcb   :  { %650 = vst [vmem:[%s1336_s3 + $0x128] sm:$0xff] %v586_v52 }
  0xcc   :  { %666 = vst [vmem:[%s1336_s3 + $0x1a8] sm:$0xff] %v602_v53 }
  0xcd   :  { %619 = vst [vmem:[%s1336_s3 + $0x30] sm:$0xff] %v555_v54 }
  0xce   :  { %635 = vst [vmem:[%s1336_s3 + $0xb0] sm:$0xff] %v571_v55  ;;  %v484_v56 = vpop.f32.mrf.mxu2  ;;  %v524_v57 = vpop.f32.mrf.mxu3 }
  0xcf   :  { %v485_v58 = vadd.f32 %v1075_v40, %v484_v56  ;;  %v525_v59 = vadd.f32 %v1075_v40, %v524_v57  ;;  %v406_v60 = vpop.f32.mrf.mxu0  ;;  %v446_v61 = vpop.f32.mrf.mxu1 }
  0xd0   :  { %v407_v62 = vadd.f32 %v1075_v40, %v406_v60  ;;  %v447_v63 = vadd.f32 %v1075_v40, %v446_v61 }
  0xd1   :  { %v587_v0 = vmax.f32 %v485_v58, 0.0  ;;  %v603_v1 = vmax.f32 %v525_v59, 0.0 }
  0xd2   :  { %v556_v2 = vmax.f32 %v407_v62, 0.0  ;;  %v572_v3 = vmax.f32 %v447_v63, 0.0 }
  0xd3   :  { %651 = vst [vmem:[%s1336_s3 + $0x130] sm:$0xff] %v587_v0 }
  0xd4   :  { %667 = vst [vmem:[%s1336_s3 + $0x1b0] sm:$0xff] %v603_v1 }
  0xd5   :  { %620 = vst [vmem:[%s1336_s3 + $0x38] sm:$0xff] %v556_v2 }
  0xd6   :  { %636 = vst [vmem:[%s1336_s3 + $0xb8] sm:$0xff] %v572_v3  ;;  %v486_v4 = vpop.f32.mrf.mxu2  ;;  %v526_v5 = vpop.f32.mrf.mxu3 }
  0xd7   :  { %v487_v6 = vadd.f32 %v1075_v40, %v486_v4  ;;  %v527_v7 = vadd.f32 %v1075_v40, %v526_v5  ;;  %v409_v8 = vpop.f32.mrf.mxu0  ;;  %v449_v9 = vpop.f32.mrf.mxu1 }
  0xd8   :  { %v410_v10 = vadd.f32 %v1075_v40, %v409_v8  ;;  %v450_v11 = vadd.f32 %v1075_v40, %v449_v9 }
  0xd9   :  { %v588_v12 = vmax.f32 %v487_v6, 0.0  ;;  %v604_v13 = vmax.f32 %v527_v7, 0.0 }
  0xda   :  { %v557_v14 = vmax.f32 %v410_v10, 0.0  ;;  %v573_v15 = vmax.f32 %v450_v11, 0.0 }
  0xdb   :  { %652 = vst [vmem:[%s1336_s3 + $0x138] sm:$0xff] %v588_v12 }
  0xdc   :  { %668 = vst [vmem:[%s1336_s3 + $0x1b8] sm:$0xff] %v604_v13 }
  0xdd   :  { %621 = vst [vmem:[%s1336_s3 + $0x40] sm:$0xff] %v557_v14 }
  0xde   :  { %637 = vst [vmem:[%s1336_s3 + $0xc0] sm:$0xff] %v573_v15  ;;  %v489_v16 = vpop.f32.mrf.mxu2  ;;  %v529_v17 = vpop.f32.mrf.mxu3 }
  0xdf   :  { %v490_v18 = vadd.f32 %v1075_v40, %v489_v16  ;;  %v530_v19 = vadd.f32 %v1075_v40, %v529_v17  ;;  %v411_v20 = vpop.f32.mrf.mxu0  ;;  %v451_v21 = vpop.f32.mrf.mxu1 }
  0xe0   :  { %v412_v22 = vadd.f32 %v1075_v40, %v411_v20  ;;  %v452_v23 = vadd.f32 %v1075_v40, %v451_v21 }
  0xe1   :  { %v589_v24 = vmax.f32 %v490_v18, 0.0  ;;  %v605_v25 = vmax.f32 %v530_v19, 0.0 }
  0xe2   :  { %v558_v26 = vmax.f32 %v412_v22, 0.0  ;;  %v574_v27 = vmax.f32 %v452_v23, 0.0 }
  0xe3   :  { %653 = vst [vmem:[%s1336_s3 + $0x140] sm:$0xff] %v589_v24 }
  0xe4   :  { %669 = vst [vmem:[%s1336_s3 + $0x1c0] sm:$0xff] %v605_v25 }
  0xe5   :  { %622 = vst [vmem:[%s1336_s3 + $0x48] sm:$0xff] %v558_v26 }
  0xe6   :  { %638 = vst [vmem:[%s1336_s3 + $0xc8] sm:$0xff] %v574_v27  ;;  %v491_v28 = vpop.f32.mrf.mxu2  ;;  %v531_v29 = vpop.f32.mrf.mxu3 }
  0xe7   :  { %v492_v30 = vadd.f32 %v1075_v40, %v491_v28  ;;  %v532_v31 = vadd.f32 %v1075_v40, %v531_v29  ;;  %v414_v32 = vpop.f32.mrf.mxu0  ;;  %v454_v33 = vpop.f32.mrf.mxu1 }
  0xe8   :  { %v415_v34 = vadd.f32 %v1075_v40, %v414_v32  ;;  %v455_v35 = vadd.f32 %v1075_v40, %v454_v33 }
  0xe9   :  { %v590_v36 = vmax.f32 %v492_v30, 0.0  ;;  %v606_v37 = vmax.f32 %v532_v31, 0.0 }
  0xea   :  { %v559_v38 = vmax.f32 %v415_v34, 0.0  ;;  %v575_v39 = vmax.f32 %v455_v35, 0.0 }
  0xeb   :  { %654 = vst [vmem:[%s1336_s3 + $0x148] sm:$0xff] %v590_v36 }
  0xec   :  { %670 = vst [vmem:[%s1336_s3 + $0x1c8] sm:$0xff] %v606_v37 }
  0xed   :  { %623 = vst [vmem:[%s1336_s3 + $0x50] sm:$0xff] %v559_v38 }
  0xee   :  { %639 = vst [vmem:[%s1336_s3 + $0xd0] sm:$0xff] %v575_v39  ;;  %v494_v41 = vpop.f32.mrf.mxu2  ;;  %v534_v42 = vpop.f32.mrf.mxu3 }
  0xef   :  { %v495_v43 = vadd.f32 %v1075_v40, %v494_v41  ;;  %v535_v44 = vadd.f32 %v1075_v40, %v534_v42  ;;  %v416_v45 = vpop.f32.mrf.mxu0  ;;  %v456_v46 = vpop.f32.mrf.mxu1 }
  0xf0   :  { %v417_v47 = vadd.f32 %v1075_v40, %v416_v45  ;;  %v457_v48 = vadd.f32 %v1075_v40, %v456_v46 }
  0xf1   :  { %v591_v49 = vmax.f32 %v495_v43, 0.0  ;;  %v607_v50 = vmax.f32 %v535_v44, 0.0 }
  0xf2   :  { %v560_v51 = vmax.f32 %v417_v47, 0.0  ;;  %v576_v52 = vmax.f32 %v457_v48, 0.0 }
  0xf3   :  { %655 = vst [vmem:[%s1336_s3 + $0x150] sm:$0xff] %v591_v49 }
  0xf4   :  { %671 = vst [vmem:[%s1336_s3 + $0x1d0] sm:$0xff] %v607_v50 }
  0xf5   :  { %624 = vst [vmem:[%s1336_s3 + $0x58] sm:$0xff] %v560_v51 }
  0xf6   :  { %640 = vst [vmem:[%s1336_s3 + $0xd8] sm:$0xff] %v576_v52  ;;  %v496_v53 = vpop.f32.mrf.mxu2  ;;  %v536_v54 = vpop.f32.mrf.mxu3 }
  0xf7   :  { %v497_v55 = vadd.f32 %v1075_v40, %v496_v53  ;;  %v537_v56 = vadd.f32 %v1075_v40, %v536_v54  ;;  %v419_v57 = vpop.f32.mrf.mxu0  ;;  %v459_v58 = vpop.f32.mrf.mxu1 }
  0xf8   :  { %v420_v59 = vadd.f32 %v1075_v40, %v419_v57  ;;  %v460_v60 = vadd.f32 %v1075_v40, %v459_v58 }
  0xf9   :  { %v592_v61 = vmax.f32 %v497_v55, 0.0  ;;  %v608_v62 = vmax.f32 %v537_v56, 0.0 }
  0xfa   :  { %v561_v63 = vmax.f32 %v420_v59, 0.0  ;;  %v577_v0 = vmax.f32 %v460_v60, 0.0 }
  0xfb   :  { %656 = vst [vmem:[%s1336_s3 + $0x158] sm:$0xff] %v592_v61 }
  0xfc   :  { %672 = vst [vmem:[%s1336_s3 + $0x1d8] sm:$0xff] %v608_v62 }
  0xfd   :  { %625 = vst [vmem:[%s1336_s3 + $0x60] sm:$0xff] %v561_v63 }
  0xfe   :  { %641 = vst [vmem:[%s1336_s3 + $0xe0] sm:$0xff] %v577_v0  ;;  %v499_v1 = vpop.f32.mrf.mxu2  ;;  %v539_v2 = vpop.f32.mrf.mxu3 }
  0xff   :  { %v500_v3 = vadd.f32 %v1075_v40, %v499_v1  ;;  %v540_v4 = vadd.f32 %v1075_v40, %v539_v2  ;;  %v421_v5 = vpop.f32.mrf.mxu0  ;;  %v461_v6 = vpop.f32.mrf.mxu1 }
 0x100   :  { %v422_v7 = vadd.f32 %v1075_v40, %v421_v5  ;;  %v462_v8 = vadd.f32 %v1075_v40, %v461_v6 }
 0x101   :  { %v593_v9 = vmax.f32 %v500_v3, 0.0  ;;  %v609_v10 = vmax.f32 %v540_v4, 0.0 }
 0x102   :  { %v562_v11 = vmax.f32 %v422_v7, 0.0  ;;  %v578_v12 = vmax.f32 %v462_v8, 0.0 }
 0x103   :  { %657 = vst [vmem:[%s1336_s3 + $0x160] sm:$0xff] %v593_v9 }
 0x104   :  { %673 = vst [vmem:[%s1336_s3 + $0x1e0] sm:$0xff] %v609_v10 }
 0x105   :  { %626 = vst [vmem:[%s1336_s3 + $0x68] sm:$0xff] %v562_v11 }
 0x106   :  { %642 = vst [vmem:[%s1336_s3 + $0xe8] sm:$0xff] %v578_v12  ;;  %v501_v13 = vpop.f32.mrf.mxu2  ;;  %v541_v14 = vpop.f32.mrf.mxu3 }
 0x107   :  { %v502_v15 = vadd.f32 %v1075_v40, %v501_v13  ;;  %v542_v16 = vadd.f32 %v1075_v40, %v541_v14  ;;  %v424_v17 = vpop.f32.mrf.mxu0  ;;  %v464_v18 = vpop.f32.mrf.mxu1 }
 0x108   :  { %v425_v19 = vadd.f32 %v1075_v40, %v424_v17  ;;  %v465_v20 = vadd.f32 %v1075_v40, %v464_v18 }
 0x109   :  { %v594_v21 = vmax.f32 %v502_v15, 0.0  ;;  %v610_v22 = vmax.f32 %v542_v16, 0.0 }
 0x10a   :  { %v563_v23 = vmax.f32 %v425_v19, 0.0  ;;  %v579_v24 = vmax.f32 %v465_v20, 0.0 }
 0x10b   :  { %658 = vst [vmem:[%s1336_s3 + $0x168] sm:$0xff] %v594_v21 }
 0x10c   :  { %674 = vst [vmem:[%s1336_s3 + $0x1e8] sm:$0xff] %v610_v22 }
 0x10d   :  { %627 = vst [vmem:[%s1336_s3 + $0x70] sm:$0xff] %v563_v23 }
 0x10e   :  { %643 = vst [vmem:[%s1336_s3 + $0xf0] sm:$0xff] %v579_v24  ;;  %v504_v25 = vpop.f32.mrf.mxu2  ;;  %v544_v26 = vpop.f32.mrf.mxu3 }
 0x10f   :  { %v505_v27 = vadd.f32 %v1075_v40, %v504_v25  ;;  %v545_v28 = vadd.f32 %v1075_v40, %v544_v26  ;;  %v426_v29 = vpop.f32.mrf.mxu0  ;;  %v466_v30 = vpop.f32.mrf.mxu1 }
 0x110   :  { %v427_v31 = vadd.f32 %v1075_v40, %v426_v29  ;;  %v467_v32 = vadd.f32 %v1075_v40, %v466_v30 }
 0x111   :  { %v595_v33 = vmax.f32 %v505_v27, 0.0  ;;  %v611_v34 = vmax.f32 %v545_v28, 0.0 }
 0x112   :  { %v564_v35 = vmax.f32 %v427_v31, 0.0  ;;  %v580_v36 = vmax.f32 %v467_v32, 0.0 }
 0x113   :  { %659 = vst [vmem:[%s1336_s3 + $0x170] sm:$0xff] %v595_v33 }
 0x114   :  { %675 = vst [vmem:[%s1336_s3 + $0x1f0] sm:$0xff] %v611_v34 }
 0x115   :  { %628 = vst [vmem:[%s1336_s3 + $0x78] sm:$0xff] %v564_v35 }
 0x116   :  { %644 = vst [vmem:[%s1336_s3 + $0xf8] sm:$0xff] %v580_v36  ;;  %v506_v37 = vpop.f32.mrf.mxu2  ;;  %v546_v38 = vpop.f32.mrf.mxu3 }
 0x117   :  { %v507_v39 = vadd.f32 %v1075_v40, %v506_v37  ;;  %v547_v41 = vadd.f32 %v1075_v40, %v546_v38 }
 0x119   :  { %v596_v42 = vmax.f32 %v507_v39, 0.0  ;;  %v612_v43 = vmax.f32 %v547_v41, 0.0 }
 0x11b   :  { %660 = vst [vmem:[%s1336_s3 + $0x178] sm:$0xff] %v596_v42 }
 0x11c   :  { %676 = vst [vmem:[%s1336_s3 + $0x1f8] sm:$0xff] %v612_v43 }

// kernel: _lambda_.11
= control target key start
LH: loop header
LB: loop body
LE: loop exit
PB: predicated region body
PF: predicated region fallthrough
CT: control target
= control target key end

     0   :  { %vm379_vm0 = vcmask 1043456   ;;  %vm282_vm1 = vcmask 588800   ;;  %s1661_s1 = inlined_call_operand.vmem [shape: bf16[72,128], index: 1, kind: input, shape index: {}]   ;;  %s1662_s2 = inlined_call_operand.vmem [shape: f32[1,128], index: 2, kind: input, shape index: {}]   ;;  %s1663_s0 = inlined_call_operand.vmem [shape: bf16[512,72], index: 0, kind: input, shape index: {}]   ;;  %s1664_s3 = inlined_call_operand.vmem [shape: f32[512,128], index: 3, kind: input, shape index: {}]   ;;  %s1665_s4 = inlined_call_operand.vmem [shape: f32[512,128], index: 4, kind: output, shape index: {}]  }
   0x1   :  { %v90_v0 = vld [vmem:[%s1661_s1 + $0x20] sm:$0xf]  ;;  %v1023_v4 = vld [vmem:[%s1661_s1 + $0x18] sm:$0xff]  ;;  %v1022_v5 = vld [vmem:[%s1661_s1 + $0x10] sm:$0xff] }
   0x2   :  { %v272_v1 = vunpack.c.l.b16 %v90_v0  ;;  %v1021_v6 = vld [vmem:[%s1661_s1 + $0x8] sm:$0xff]  ;;  %v1020_v7 = vld [vmem:[%s1661_s1] sm:$0xff]  ;;  %v990_v16 = vld [vmem:[%s1663_s0 + $0x10] sm:$0xff] }
   0x3   :  { %v988_v8 = vld [vmem:[%s1663_s0] sm:$0xff]  ;;  %v989_v12 = vld [vmem:[%s1663_s0 + $0x8] sm:$0xff]  ;;  %v998_v17 = vld [vmem:[%s1663_s0 + $0x50] sm:$0xff] }
   0x4   :  { %v277_v2 = vpack.c.b16 %v272_v1, %v272_v1  ;;  %v996_v9 = vld [vmem:[%s1663_s0 + $0x40] sm:$0xff]  ;;  %v997_v13 = vld [vmem:[%s1663_s0 + $0x48] sm:$0xff]  ;;  %v1006_v18 = vld [vmem:[%s1663_s0 + $0x90] sm:$0xff] }
   0x5   :  { %v1004_v10 = vld [vmem:[%s1663_s0 + $0x80] sm:$0xff]  ;;  %v1005_v14 = vld [vmem:[%s1663_s0 + $0x88] sm:$0xff]  ;;  %v1014_v19 = vld [vmem:[%s1663_s0 + $0xd0] sm:$0xff] }
   0x6   :  { %v381_v3 = vsel %vm379_vm0, %v277_v2, 0  ;;  %v1012_v11 = vld [vmem:[%s1663_s0 + $0xc0] sm:$0xff]  ;;  %v1013_v15 = vld [vmem:[%s1663_s0 + $0xc8] sm:$0xff]  ;;  %v991_v20 = vld [vmem:[%s1663_s0 + $0x18] sm:$0xff] }
   0x7   :  { %386 = vmatpush.bf16.msra.mxu0 %v381_v3  ;;  %1024 = vmatpush.bf16.msra.mxu1 %v381_v3  ;;  %v999_v21 = vld [vmem:[%s1663_s0 + $0x58] sm:$0xff]  ;;  %v992_v24 = vld [vmem:[%s1663_s0 + $0x20] sm:$0xff]  ;;  %v993_v28 = vld [vmem:[%s1663_s0 + $0x28] sm:$0xff] }
   0x8   :  { %1025 = vmatpush.bf16.msra.mxu2 %v381_v3  ;;  %1026 = vmatpush.bf16.msra.mxu3 %v381_v3  ;;  %v1007_v22 = vld [vmem:[%s1663_s0 + $0x98] sm:$0xff]  ;;  %v1000_v25 = vld [vmem:[%s1663_s0 + $0x60] sm:$0xff]  ;;  %v1001_v29 = vld [vmem:[%s1663_s0 + $0x68] sm:$0xff] }
   0x9   :  { %v1015_v23 = vld [vmem:[%s1663_s0 + $0xd8] sm:$0xff]  ;;  %v1008_v26 = vld [vmem:[%s1663_s0 + $0xa0] sm:$0xff]  ;;  %v1009_v30 = vld [vmem:[%s1663_s0 + $0xa8] sm:$0xff] }
   0xa   :  { %v1016_v27 = vld [vmem:[%s1663_s0 + $0xe0] sm:$0xff]  ;;  %v1017_v31 = vld [vmem:[%s1663_s0 + $0xe8] sm:$0xff]  ;;  %v994_v32 = vld [vmem:[%s1663_s0 + $0x30] sm:$0xff] }
   0xb   :  { %387 = vmatpush.bf16.msra.mxu0 %v1023_v4  ;;  %1027 = vmatpush.bf16.msra.mxu1 %v1023_v4  ;;  %v1002_v33 = vld [vmem:[%s1663_s0 + $0x70] sm:$0xff]  ;;  %v995_v36 = vld [vmem:[%s1663_s0 + $0x38] sm:$0xff]  ;;  %v1211_v40 = vld [vmem:[%s1662_s2] ss:$0 sm:$0xff] }
   0xc   :  { %1028 = vmatpush.bf16.msra.mxu2 %v1023_v4  ;;  %1029 = vmatpush.bf16.msra.mxu3 %v1023_v4  ;;  %v1010_v34 = vld [vmem:[%s1663_s0 + $0xb0] sm:$0xff]  ;;  %v1003_v37 = vld [vmem:[%s1663_s0 + $0x78] sm:$0xff]  ;;  %v552_v42 = vld [vmem:[%s1664_s3] sm:$0xff] }
   0xd   :  { %v1018_v35 = vld [vmem:[%s1663_s0 + $0xf0] sm:$0xff]  ;;  %v1011_v38 = vld [vmem:[%s1663_s0 + $0xb8] sm:$0xff]  ;;  %v568_v44 = vld [vmem:[%s1664_s3 + $0x80] sm:$0xff] }
   0xe   :  { %v1019_v39 = vld [vmem:[%s1663_s0 + $0xf8] sm:$0xff]  ;;  %v584_v52 = vld [vmem:[%s1664_s3 + $0x100] sm:$0xff]  ;;  %v553_v58 = vld [vmem:[%s1664_s3 + $0x8] sm:$0xff] }
   0xf   :  { %388 = vmatpush.bf16.msra.mxu0 %v1022_v5  ;;  %1030 = vmatpush.bf16.msra.mxu1 %v1022_v5  ;;  %v600_v54 = vld [vmem:[%s1664_s3 + $0x180] sm:$0xff]  ;;  %v569_v60 = vld [vmem:[%s1664_s3 + $0x88] sm:$0xff] }
  0x10   :  { %1031 = vmatpush.bf16.msra.mxu2 %v1022_v5  ;;  %1032 = vmatpush.bf16.msra.mxu3 %v1022_v5 }
  0x13   :  { %389 = vmatpush.bf16.msra.mxu0 %v1021_v6  ;;  %1033 = vmatpush.bf16.msra.mxu1 %v1021_v6 }
  0x14   :  { %1034 = vmatpush.bf16.msra.mxu2 %v1021_v6  ;;  %1035 = vmatpush.bf16.msra.mxu3 %v1021_v6 }
  0x17   :  { %390 = vmatpush.bf16.msra.mxu0 %v1020_v7  ;;  %1036 = vmatpush.bf16.msra.mxu1 %v1020_v7 }
  0x18   :  { %1037 = vmatpush.bf16.msra.mxu2 %v1020_v7  ;;  %1038 = vmatpush.bf16.msra.mxu3 %v1020_v7 }
  0x1a   :  { %956 = vmatmul.msk.bf16.vlgmr.msra.gmra.mxu0 %vm282_vm1, %v988_v8  ;;  %964 = vmatmul.msk.bf16.vlgmr.msra.gmra.mxu1 %vm282_vm1, %v996_v9  ;;  %v585_v8 = vld [vmem:[%s1664_s3 + $0x108] sm:$0xff] }
  0x1b   :  { %972 = vmatmul.msk.bf16.vlgmr.msra.gmra.mxu2 %vm282_vm1, %v1004_v10  ;;  %980 = vmatmul.msk.bf16.vlgmr.msra.gmra.mxu3 %vm282_vm1, %v1012_v11  ;;  %v601_v10 = vld [vmem:[%s1664_s3 + $0x188] sm:$0xff] }
  0x2a   :  { %957 = vmatmul.msk.bf16.gmra.mxu0 %vm282_vm1, %v989_v12  ;;  %965 = vmatmul.msk.bf16.gmra.mxu1 %vm282_vm1, %v997_v13 }
  0x2b   :  { %973 = vmatmul.msk.bf16.gmra.mxu2 %vm282_vm1, %v1005_v14  ;;  %981 = vmatmul.msk.bf16.gmra.mxu3 %vm282_vm1, %v1013_v15  ;;  %v554_v14 = vld [vmem:[%s1664_s3 + $0x10] sm:$0xff] }
  0x3a   :  { %958 = vmatmul.msk.bf16.gmra.mxu0 %vm282_vm1, %v990_v16  ;;  %966 = vmatmul.msk.bf16.gmra.mxu1 %vm282_vm1, %v998_v17  ;;  %v570_v16 = vld [vmem:[%s1664_s3 + $0x90] sm:$0xff] }
  0x3b   :  { %974 = vmatmul.msk.bf16.gmra.mxu2 %vm282_vm1, %v1006_v18  ;;  %982 = vmatmul.msk.bf16.gmra.mxu3 %vm282_vm1, %v1014_v19 }
  0x4a   :  { %959 = vmatmul.msk.bf16.gmra.mxu0 %vm282_vm1, %v991_v20  ;;  %967 = vmatmul.msk.bf16.gmra.mxu1 %vm282_vm1, %v999_v21 }
  0x4b   :  { %975 = vmatmul.msk.bf16.gmra.mxu2 %vm282_vm1, %v1007_v22  ;;  %983 = vmatmul.msk.bf16.gmra.mxu3 %vm282_vm1, %v1015_v23 }
  0x5a   :  { %960 = vmatmul.msk.bf16.gmra.mxu0 %vm282_vm1, %v992_v24  ;;  %968 = vmatmul.msk.bf16.gmra.mxu1 %vm282_vm1, %v1000_v25 }
  0x5b   :  { %976 = vmatmul.msk.bf16.gmra.mxu2 %vm282_vm1, %v1008_v26  ;;  %984 = vmatmul.msk.bf16.gmra.mxu3 %vm282_vm1, %v1016_v27 }
  0x6a   :  { %961 = vmatmul.msk.bf16.gmra.mxu0 %vm282_vm1, %v993_v28  ;;  %969 = vmatmul.msk.bf16.gmra.mxu1 %vm282_vm1, %v1001_v29  ;;  %v586_v28 = vld [vmem:[%s1664_s3 + $0x110] sm:$0xff] }
  0x6b   :  { %977 = vmatmul.msk.bf16.gmra.mxu2 %vm282_vm1, %v1009_v30  ;;  %985 = vmatmul.msk.bf16.gmra.mxu3 %vm282_vm1, %v1017_v31  ;;  %v602_v30 = vld [vmem:[%s1664_s3 + $0x190] sm:$0xff] }
  0x7a   :  { %962 = vmatmul.msk.bf16.gmra.mxu0 %vm282_vm1, %v994_v32  ;;  %970 = vmatmul.msk.bf16.gmra.mxu1 %vm282_vm1, %v1002_v33 }
  0x7b   :  { %978 = vmatmul.msk.bf16.gmra.mxu2 %vm282_vm1, %v1010_v34  ;;  %986 = vmatmul.msk.bf16.gmra.mxu3 %vm282_vm1, %v1018_v35  ;;  %v555_v34 = vld [vmem:[%s1664_s3 + $0x18] sm:$0xff] }
  0x8a   :  { %963 = vmatmul.msk.bf16.gmra.mxu0 %vm282_vm1, %v995_v36  ;;  %971 = vmatmul.msk.bf16.gmra.mxu1 %vm282_vm1, %v1003_v37  ;;  %v571_v36 = vld [vmem:[%s1664_s3 + $0x98] sm:$0xff] }
  0x8b   :  { %979 = vmatmul.msk.bf16.gmra.mxu2 %vm282_vm1, %v1011_v38  ;;  %987 = vmatmul.msk.bf16.gmra.mxu3 %vm282_vm1, %v1019_v39 }
  0x97   :  { %v392_v41 = vpop.f32.mrf.mxu0  ;;  %v432_v43 = vpop.f32.mrf.mxu1 }
  0x98   :  { %v393_v45 = vadd.f32 %v1211_v40, %v392_v41  ;;  %v433_v46 = vadd.f32 %v1211_v40, %v432_v43 }
  0x9a   :  { %v616_v47 = vadd.f32 %v552_v42, %v393_v45  ;;  %v632_v48 = vadd.f32 %v568_v44, %v433_v46 }
  0x9c   :  { %v680_v49 = vmax.f32 %v616_v47, 0.0  ;;  %v696_v50 = vmax.f32 %v632_v48, 0.0 }
  0x9e   :  { %744 = vst [vmem:[%s1665_s4] sm:$0xff] %v680_v49  ;;  %v472_v51 = vpop.f32.mrf.mxu2  ;;  %v512_v53 = vpop.f32.mrf.mxu3  ;;  %v587_v49 = vld [vmem:[%s1664_s3 + $0x118] sm:$0xff] }
  0x9f   :  { %760 = vst [vmem:[%s1665_s4 + $0x80] sm:$0xff] %v696_v50  ;;  %v473_v55 = vadd.f32 %v1211_v40, %v472_v51  ;;  %v513_v56 = vadd.f32 %v1211_v40, %v512_v53  ;;  %v394_v57 = vpop.f32.mrf.mxu0  ;;  %v434_v59 = vpop.f32.mrf.mxu1  ;;  %v603_v51 = vld [vmem:[%s1664_s3 + $0x198] sm:$0xff] }
  0xa0   :  { %v395_v61 = vadd.f32 %v1211_v40, %v394_v57  ;;  %v435_v62 = vadd.f32 %v1211_v40, %v434_v59  ;;  %v572_v57 = vld [vmem:[%s1664_s3 + $0xa0] sm:$0xff] }
  0xa1   :  { %v648_v63 = vadd.f32 %v584_v52, %v473_v55  ;;  %v664_v0 = vadd.f32 %v600_v54, %v513_v56  ;;  %v556_v55 = vld [vmem:[%s1664_s3 + $0x20] sm:$0xff] }
  0xa2   :  { %v617_v1 = vadd.f32 %v553_v58, %v395_v61  ;;  %v633_v2 = vadd.f32 %v569_v60, %v435_v62 }
  0xa3   :  { %v712_v3 = vmax.f32 %v648_v63, 0.0  ;;  %v728_v4 = vmax.f32 %v664_v0, 0.0 }
  0xa4   :  { %v681_v5 = vmax.f32 %v617_v1, 0.0  ;;  %v697_v6 = vmax.f32 %v633_v2, 0.0 }
  0xa5   :  { %776 = vst [vmem:[%s1665_s4 + $0x100] sm:$0xff] %v712_v3 }
  0xa6   :  { %792 = vst [vmem:[%s1665_s4 + $0x180] sm:$0xff] %v728_v4  ;;  %v474_v7 = vpop.f32.mrf.mxu2  ;;  %v514_v9 = vpop.f32.mrf.mxu3 }
  0xa7   :  { %745 = vst [vmem:[%s1665_s4 + $0x8] sm:$0xff] %v681_v5  ;;  %v475_v11 = vadd.f32 %v1211_v40, %v474_v7  ;;  %v515_v12 = vadd.f32 %v1211_v40, %v514_v9  ;;  %v397_v13 = vpop.f32.mrf.mxu0  ;;  %v437_v15 = vpop.f32.mrf.mxu1  ;;  %v588_v5 = vld [vmem:[%s1664_s3 + $0x120] sm:$0xff] }
  0xa8   :  { %761 = vst [vmem:[%s1665_s4 + $0x88] sm:$0xff] %v697_v6  ;;  %v398_v17 = vadd.f32 %v1211_v40, %v397_v13  ;;  %v438_v18 = vadd.f32 %v1211_v40, %v437_v15  ;;  %v604_v7 = vld [vmem:[%s1664_s3 + $0x1a0] sm:$0xff]  ;;  %v573_v13 = vld [vmem:[%s1664_s3 + $0xa8] sm:$0xff] }
  0xa9   :  { %v649_v19 = vadd.f32 %v585_v8, %v475_v11  ;;  %v665_v20 = vadd.f32 %v601_v10, %v515_v12  ;;  %v557_v11 = vld [vmem:[%s1664_s3 + $0x28] sm:$0xff] }
  0xaa   :  { %v618_v21 = vadd.f32 %v554_v14, %v398_v17  ;;  %v634_v22 = vadd.f32 %v570_v16, %v438_v18 }
  0xab   :  { %v713_v23 = vmax.f32 %v649_v19, 0.0  ;;  %v729_v24 = vmax.f32 %v665_v20, 0.0 }
  0xac   :  { %v682_v25 = vmax.f32 %v618_v21, 0.0  ;;  %v698_v26 = vmax.f32 %v634_v22, 0.0 }
  0xad   :  { %777 = vst [vmem:[%s1665_s4 + $0x108] sm:$0xff] %v713_v23 }
  0xae   :  { %793 = vst [vmem:[%s1665_s4 + $0x188] sm:$0xff] %v729_v24  ;;  %v477_v27 = vpop.f32.mrf.mxu2  ;;  %v517_v29 = vpop.f32.mrf.mxu3 }
  0xaf   :  { %746 = vst [vmem:[%s1665_s4 + $0x10] sm:$0xff] %v682_v25  ;;  %v478_v31 = vadd.f32 %v1211_v40, %v477_v27  ;;  %v518_v32 = vadd.f32 %v1211_v40, %v517_v29  ;;  %v399_v33 = vpop.f32.mrf.mxu0  ;;  %v439_v35 = vpop.f32.mrf.mxu1  ;;  %v589_v25 = vld [vmem:[%s1664_s3 + $0x128] sm:$0xff] }
  0xb0   :  { %762 = vst [vmem:[%s1665_s4 + $0x90] sm:$0xff] %v698_v26  ;;  %v400_v37 = vadd.f32 %v1211_v40, %v399_v33  ;;  %v440_v38 = vadd.f32 %v1211_v40, %v439_v35  ;;  %v605_v27 = vld [vmem:[%s1664_s3 + $0x1a8] sm:$0xff]  ;;  %v574_v33 = vld [vmem:[%s1664_s3 + $0xb0] sm:$0xff] }
  0xb1   :  { %v650_v39 = vadd.f32 %v586_v28, %v478_v31  ;;  %v666_v41 = vadd.f32 %v602_v30, %v518_v32  ;;  %v558_v31 = vld [vmem:[%s1664_s3 + $0x30] sm:$0xff] }
  0xb2   :  { %v619_v42 = vadd.f32 %v555_v34, %v400_v37  ;;  %v635_v43 = vadd.f32 %v571_v36, %v440_v38 }
  0xb3   :  { %v714_v44 = vmax.f32 %v650_v39, 0.0  ;;  %v730_v45 = vmax.f32 %v666_v41, 0.0 }
  0xb4   :  { %v683_v46 = vmax.f32 %v619_v42, 0.0  ;;  %v699_v47 = vmax.f32 %v635_v43, 0.0 }
  0xb5   :  { %778 = vst [vmem:[%s1665_s4 + $0x110] sm:$0xff] %v714_v44 }
  0xb6   :  { %794 = vst [vmem:[%s1665_s4 + $0x190] sm:$0xff] %v730_v45  ;;  %v479_v48 = vpop.f32.mrf.mxu2  ;;  %v519_v50 = vpop.f32.mrf.mxu3 }
  0xb7   :  { %747 = vst [vmem:[%s1665_s4 + $0x18] sm:$0xff] %v683_v46  ;;  %v480_v52 = vadd.f32 %v1211_v40, %v479_v48  ;;  %v520_v53 = vadd.f32 %v1211_v40, %v519_v50  ;;  %v402_v54 = vpop.f32.mrf.mxu0  ;;  %v442_v56 = vpop.f32.mrf.mxu1  ;;  %v590_v46 = vld [vmem:[%s1664_s3 + $0x130] sm:$0xff] }
  0xb8   :  { %763 = vst [vmem:[%s1665_s4 + $0x98] sm:$0xff] %v699_v47  ;;  %v403_v58 = vadd.f32 %v1211_v40, %v402_v54  ;;  %v443_v59 = vadd.f32 %v1211_v40, %v442_v56  ;;  %v606_v48 = vld [vmem:[%s1664_s3 + $0x1b0] sm:$0xff]  ;;  %v575_v54 = vld [vmem:[%s1664_s3 + $0xb8] sm:$0xff] }
  0xb9   :  { %v651_v60 = vadd.f32 %v587_v49, %v480_v52  ;;  %v667_v61 = vadd.f32 %v603_v51, %v520_v53  ;;  %v559_v52 = vld [vmem:[%s1664_s3 + $0x38] sm:$0xff] }
  0xba   :  { %v620_v62 = vadd.f32 %v556_v55, %v403_v58  ;;  %v636_v63 = vadd.f32 %v572_v57, %v443_v59 }
  0xbb   :  { %v715_v0 = vmax.f32 %v651_v60, 0.0  ;;  %v731_v1 = vmax.f32 %v667_v61, 0.0 }
  0xbc   :  { %v684_v2 = vmax.f32 %v620_v62, 0.0  ;;  %v700_v3 = vmax.f32 %v636_v63, 0.0 }
  0xbd   :  { %779 = vst [vmem:[%s1665_s4 + $0x118] sm:$0xff] %v715_v0 }
  0xbe   :  { %795 = vst [vmem:[%s1665_s4 + $0x198] sm:$0xff] %v731_v1  ;;  %v482_v4 = vpop.f32.mrf.mxu2  ;;  %v522_v6 = vpop.f32.mrf.mxu3 }
  0xbf   :  { %748 = vst [vmem:[%s1665_s4 + $0x20] sm:$0xff] %v684_v2  ;;  %v483_v8 = vadd.f32 %v1211_v40, %v482_v4  ;;  %v523_v9 = vadd.f32 %v1211_v40, %v522_v6  ;;  %v404_v10 = vpop.f32.mrf.mxu0  ;;  %v444_v12 = vpop.f32.mrf.mxu1  ;;  %v591_v2 = vld [vmem:[%s1664_s3 + $0x138] sm:$0xff] }
  0xc0   :  { %764 = vst [vmem:[%s1665_s4 + $0xa0] sm:$0xff] %v700_v3  ;;  %v405_v14 = vadd.f32 %v1211_v40, %v404_v10  ;;  %v445_v15 = vadd.f32 %v1211_v40, %v444_v12  ;;  %v607_v4 = vld [vmem:[%s1664_s3 + $0x1b8] sm:$0xff]  ;;  %v576_v10 = vld [vmem:[%s1664_s3 + $0xc0] sm:$0xff] }
  0xc1   :  { %v652_v16 = vadd.f32 %v588_v5, %v483_v8  ;;  %v668_v17 = vadd.f32 %v604_v7, %v523_v9  ;;  %v560_v8 = vld [vmem:[%s1664_s3 + $0x40] sm:$0xff] }
  0xc2   :  { %v621_v18 = vadd.f32 %v557_v11, %v405_v14  ;;  %v637_v19 = vadd.f32 %v573_v13, %v445_v15 }
  0xc3   :  { %v716_v20 = vmax.f32 %v652_v16, 0.0  ;;  %v732_v21 = vmax.f32 %v668_v17, 0.0 }
  0xc4   :  { %v685_v22 = vmax.f32 %v621_v18, 0.0  ;;  %v701_v23 = vmax.f32 %v637_v19, 0.0 }
  0xc5   :  { %780 = vst [vmem:[%s1665_s4 + $0x120] sm:$0xff] %v716_v20 }
  0xc6   :  { %796 = vst [vmem:[%s1665_s4 + $0x1a0] sm:$0xff] %v732_v21  ;;  %v484_v24 = vpop.f32.mrf.mxu2  ;;  %v524_v26 = vpop.f32.mrf.mxu3 }
  0xc7   :  { %749 = vst [vmem:[%s1665_s4 + $0x28] sm:$0xff] %v685_v22  ;;  %v485_v28 = vadd.f32 %v1211_v40, %v484_v24  ;;  %v525_v29 = vadd.f32 %v1211_v40, %v524_v26  ;;  %v407_v30 = vpop.f32.mrf.mxu0  ;;  %v447_v32 = vpop.f32.mrf.mxu1  ;;  %v592_v22 = vld [vmem:[%s1664_s3 + $0x140] sm:$0xff] }
  0xc8   :  { %765 = vst [vmem:[%s1665_s4 + $0xa8] sm:$0xff] %v701_v23  ;;  %v408_v34 = vadd.f32 %v1211_v40, %v407_v30  ;;  %v448_v35 = vadd.f32 %v1211_v40, %v447_v32  ;;  %v608_v24 = vld [vmem:[%s1664_s3 + $0x1c0] sm:$0xff]  ;;  %v577_v30 = vld [vmem:[%s1664_s3 + $0xc8] sm:$0xff] }
  0xc9   :  { %v653_v36 = vadd.f32 %v589_v25, %v485_v28  ;;  %v669_v37 = vadd.f32 %v605_v27, %v525_v29  ;;  %v561_v28 = vld [vmem:[%s1664_s3 + $0x48] sm:$0xff] }
  0xca   :  { %v622_v38 = vadd.f32 %v558_v31, %v408_v34  ;;  %v638_v39 = vadd.f32 %v574_v33, %v448_v35 }
  0xcb   :  { %v717_v41 = vmax.f32 %v653_v36, 0.0  ;;  %v733_v42 = vmax.f32 %v669_v37, 0.0 }
  0xcc   :  { %v686_v43 = vmax.f32 %v622_v38, 0.0  ;;  %v702_v44 = vmax.f32 %v638_v39, 0.0 }
  0xcd   :  { %781 = vst [vmem:[%s1665_s4 + $0x128] sm:$0xff] %v717_v41 }
  0xce   :  { %797 = vst [vmem:[%s1665_s4 + $0x1a8] sm:$0xff] %v733_v42  ;;  %v487_v45 = vpop.f32.mrf.mxu2  ;;  %v527_v47 = vpop.f32.mrf.mxu3 }
  0xcf   :  { %750 = vst [vmem:[%s1665_s4 + $0x30] sm:$0xff] %v686_v43  ;;  %v488_v49 = vadd.f32 %v1211_v40, %v487_v45  ;;  %v528_v50 = vadd.f32 %v1211_v40, %v527_v47  ;;  %v409_v51 = vpop.f32.mrf.mxu0  ;;  %v449_v53 = vpop.f32.mrf.mxu1  ;;  %v593_v43 = vld [vmem:[%s1664_s3 + $0x148] sm:$0xff] }
  0xd0   :  { %766 = vst [vmem:[%s1665_s4 + $0xb0] sm:$0xff] %v702_v44  ;;  %v410_v55 = vadd.f32 %v1211_v40, %v409_v51  ;;  %v450_v56 = vadd.f32 %v1211_v40, %v449_v53  ;;  %v609_v45 = vld [vmem:[%s1664_s3 + $0x1c8] sm:$0xff]  ;;  %v578_v51 = vld [vmem:[%s1664_s3 + $0xd0] sm:$0xff] }
  0xd1   :  { %v654_v57 = vadd.f32 %v590_v46, %v488_v49  ;;  %v670_v58 = vadd.f32 %v606_v48, %v528_v50  ;;  %v562_v49 = vld [vmem:[%s1664_s3 + $0x50] sm:$0xff] }
  0xd2   :  { %v623_v59 = vadd.f32 %v559_v52, %v410_v55  ;;  %v639_v60 = vadd.f32 %v575_v54, %v450_v56 }
  0xd3   :  { %v718_v61 = vmax.f32 %v654_v57, 0.0  ;;  %v734_v62 = vmax.f32 %v670_v58, 0.0 }
  0xd4   :  { %v687_v63 = vmax.f32 %v623_v59, 0.0  ;;  %v703_v0 = vmax.f32 %v639_v60, 0.0 }
  0xd5   :  { %782 = vst [vmem:[%s1665_s4 + $0x130] sm:$0xff] %v718_v61 }
  0xd6   :  { %798 = vst [vmem:[%s1665_s4 + $0x1b0] sm:$0xff] %v734_v62  ;;  %v489_v1 = vpop.f32.mrf.mxu2  ;;  %v529_v3 = vpop.f32.mrf.mxu3 }
  0xd7   :  { %751 = vst [vmem:[%s1665_s4 + $0x38] sm:$0xff] %v687_v63  ;;  %v490_v5 = vadd.f32 %v1211_v40, %v489_v1  ;;  %v530_v6 = vadd.f32 %v1211_v40, %v529_v3  ;;  %v412_v7 = vpop.f32.mrf.mxu0  ;;  %v452_v9 = vpop.f32.mrf.mxu1  ;;  %v594_v63 = vld [vmem:[%s1664_s3 + $0x150] sm:$0xff] }
  0xd8   :  { %767 = vst [vmem:[%s1665_s4 + $0xb8] sm:$0xff] %v703_v0  ;;  %v413_v11 = vadd.f32 %v1211_v40, %v412_v7  ;;  %v453_v12 = vadd.f32 %v1211_v40, %v452_v9  ;;  %v610_v1 = vld [vmem:[%s1664_s3 + $0x1d0] sm:$0xff]  ;;  %v579_v7 = vld [vmem:[%s1664_s3 + $0xd8] sm:$0xff] }
  0xd9   :  { %v655_v13 = vadd.f32 %v591_v2, %v490_v5  ;;  %v671_v14 = vadd.f32 %v607_v4, %v530_v6  ;;  %v563_v5 = vld [vmem:[%s1664_s3 + $0x58] sm:$0xff] }
  0xda   :  { %v624_v15 = vadd.f32 %v560_v8, %v413_v11  ;;  %v640_v16 = vadd.f32 %v576_v10, %v453_v12 }
  0xdb   :  { %v719_v17 = vmax.f32 %v655_v13, 0.0  ;;  %v735_v18 = vmax.f32 %v671_v14, 0.0 }
  0xdc   :  { %v688_v19 = vmax.f32 %v624_v15, 0.0  ;;  %v704_v20 = vmax.f32 %v640_v16, 0.0 }
  0xdd   :  { %783 = vst [vmem:[%s1665_s4 + $0x138] sm:$0xff] %v719_v17 }
  0xde   :  { %799 = vst [vmem:[%s1665_s4 + $0x1b8] sm:$0xff] %v735_v18  ;;  %v492_v21 = vpop.f32.mrf.mxu2  ;;  %v532_v23 = vpop.f32.mrf.mxu3 }
  0xdf   :  { %752 = vst [vmem:[%s1665_s4 + $0x40] sm:$0xff] %v688_v19  ;;  %v493_v25 = vadd.f32 %v1211_v40, %v492_v21  ;;  %v533_v26 = vadd.f32 %v1211_v40, %v532_v23  ;;  %v414_v27 = vpop.f32.mrf.mxu0  ;;  %v454_v29 = vpop.f32.mrf.mxu1  ;;  %v595_v19 = vld [vmem:[%s1664_s3 + $0x158] sm:$0xff] }
  0xe0   :  { %768 = vst [vmem:[%s1665_s4 + $0xc0] sm:$0xff] %v704_v20  ;;  %v415_v31 = vadd.f32 %v1211_v40, %v414_v27  ;;  %v455_v32 = vadd.f32 %v1211_v40, %v454_v29  ;;  %v611_v21 = vld [vmem:[%s1664_s3 + $0x1d8] sm:$0xff]  ;;  %v580_v27 = vld [vmem:[%s1664_s3 + $0xe0] sm:$0xff] }
  0xe1   :  { %v656_v33 = vadd.f32 %v592_v22, %v493_v25  ;;  %v672_v34 = vadd.f32 %v608_v24, %v533_v26  ;;  %v564_v25 = vld [vmem:[%s1664_s3 + $0x60] sm:$0xff] }
  0xe2   :  { %v625_v35 = vadd.f32 %v561_v28, %v415_v31  ;;  %v641_v36 = vadd.f32 %v577_v30, %v455_v32 }
  0xe3   :  { %v720_v37 = vmax.f32 %v656_v33, 0.0  ;;  %v736_v38 = vmax.f32 %v672_v34, 0.0 }
  0xe4   :  { %v689_v39 = vmax.f32 %v625_v35, 0.0  ;;  %v705_v41 = vmax.f32 %v641_v36, 0.0 }
  0xe5   :  { %784 = vst [vmem:[%s1665_s4 + $0x140] sm:$0xff] %v720_v37 }
  0xe6   :  { %800 = vst [vmem:[%s1665_s4 + $0x1c0] sm:$0xff] %v736_v38  ;;  %v494_v42 = vpop.f32.mrf.mxu2  ;;  %v534_v44 = vpop.f32.mrf.mxu3 }
  0xe7   :  { %753 = vst [vmem:[%s1665_s4 + $0x48] sm:$0xff] %v689_v39  ;;  %v495_v46 = vadd.f32 %v1211_v40, %v494_v42  ;;  %v535_v47 = vadd.f32 %v1211_v40, %v534_v44  ;;  %v417_v48 = vpop.f32.mrf.mxu0  ;;  %v457_v50 = vpop.f32.mrf.mxu1  ;;  %v596_v39 = vld [vmem:[%s1664_s3 + $0x160] sm:$0xff] }
  0xe8   :  { %769 = vst [vmem:[%s1665_s4 + $0xc8] sm:$0xff] %v705_v41  ;;  %v418_v52 = vadd.f32 %v1211_v40, %v417_v48  ;;  %v458_v53 = vadd.f32 %v1211_v40, %v457_v50  ;;  %v612_v42 = vld [vmem:[%s1664_s3 + $0x1e0] sm:$0xff]  ;;  %v581_v48 = vld [vmem:[%s1664_s3 + $0xe8] sm:$0xff] }
  0xe9   :  { %v657_v54 = vadd.f32 %v593_v43, %v495_v46  ;;  %v673_v55 = vadd.f32 %v609_v45, %v535_v47  ;;  %v565_v46 = vld [vmem:[%s1664_s3 + $0x68] sm:$0xff] }
  0xea   :  { %v626_v56 = vadd.f32 %v562_v49, %v418_v52  ;;  %v642_v57 = vadd.f32 %v578_v51, %v458_v53 }
  0xeb   :  { %v721_v58 = vmax.f32 %v657_v54, 0.0  ;;  %v737_v59 = vmax.f32 %v673_v55, 0.0 }
  0xec   :  { %v690_v60 = vmax.f32 %v626_v56, 0.0  ;;  %v706_v61 = vmax.f32 %v642_v57, 0.0 }
  0xed   :  { %785 = vst [vmem:[%s1665_s4 + $0x148] sm:$0xff] %v721_v58 }
  0xee   :  { %801 = vst [vmem:[%s1665_s4 + $0x1c8] sm:$0xff] %v737_v59  ;;  %v497_v62 = vpop.f32.mrf.mxu2  ;;  %v537_v0 = vpop.f32.mrf.mxu3 }
  0xef   :  { %754 = vst [vmem:[%s1665_s4 + $0x50] sm:$0xff] %v690_v60  ;;  %v498_v2 = vadd.f32 %v1211_v40, %v497_v62  ;;  %v538_v3 = vadd.f32 %v1211_v40, %v537_v0  ;;  %v419_v4 = vpop.f32.mrf.mxu0  ;;  %v459_v6 = vpop.f32.mrf.mxu1  ;;  %v597_v60 = vld [vmem:[%s1664_s3 + $0x168] sm:$0xff] }
  0xf0   :  { %770 = vst [vmem:[%s1665_s4 + $0xd0] sm:$0xff] %v706_v61  ;;  %v420_v8 = vadd.f32 %v1211_v40, %v419_v4  ;;  %v460_v9 = vadd.f32 %v1211_v40, %v459_v6  ;;  %v613_v62 = vld [vmem:[%s1664_s3 + $0x1e8] sm:$0xff]  ;;  %v582_v4 = vld [vmem:[%s1664_s3 + $0xf0] sm:$0xff] }
  0xf1   :  { %v658_v10 = vadd.f32 %v594_v63, %v498_v2  ;;  %v674_v11 = vadd.f32 %v610_v1, %v538_v3  ;;  %v566_v2 = vld [vmem:[%s1664_s3 + $0x70] sm:$0xff] }
  0xf2   :  { %v627_v12 = vadd.f32 %v563_v5, %v420_v8  ;;  %v643_v13 = vadd.f32 %v579_v7, %v460_v9 }
  0xf3   :  { %v722_v14 = vmax.f32 %v658_v10, 0.0  ;;  %v738_v15 = vmax.f32 %v674_v11, 0.0 }
  0xf4   :  { %v691_v16 = vmax.f32 %v627_v12, 0.0  ;;  %v707_v17 = vmax.f32 %v643_v13, 0.0 }
  0xf5   :  { %786 = vst [vmem:[%s1665_s4 + $0x150] sm:$0xff] %v722_v14 }
  0xf6   :  { %802 = vst [vmem:[%s1665_s4 + $0x1d0] sm:$0xff] %v738_v15  ;;  %v499_v18 = vpop.f32.mrf.mxu2  ;;  %v539_v20 = vpop.f32.mrf.mxu3 }
  0xf7   :  { %755 = vst [vmem:[%s1665_s4 + $0x58] sm:$0xff] %v691_v16  ;;  %v500_v22 = vadd.f32 %v1211_v40, %v499_v18  ;;  %v540_v23 = vadd.f32 %v1211_v40, %v539_v20  ;;  %v422_v24 = vpop.f32.mrf.mxu0  ;;  %v462_v26 = vpop.f32.mrf.mxu1  ;;  %v598_v16 = vld [vmem:[%s1664_s3 + $0x170] sm:$0xff] }
  0xf8   :  { %771 = vst [vmem:[%s1665_s4 + $0xd8] sm:$0xff] %v707_v17  ;;  %v423_v28 = vadd.f32 %v1211_v40, %v422_v24  ;;  %v463_v29 = vadd.f32 %v1211_v40, %v462_v26  ;;  %v614_v18 = vld [vmem:[%s1664_s3 + $0x1f0] sm:$0xff]  ;;  %v583_v24 = vld [vmem:[%s1664_s3 + $0xf8] sm:$0xff] }
  0xf9   :  { %v659_v30 = vadd.f32 %v595_v19, %v500_v22  ;;  %v675_v31 = vadd.f32 %v611_v21, %v540_v23  ;;  %v567_v22 = vld [vmem:[%s1664_s3 + $0x78] sm:$0xff] }
  0xfa   :  { %v628_v32 = vadd.f32 %v564_v25, %v423_v28  ;;  %v644_v33 = vadd.f32 %v580_v27, %v463_v29 }
  0xfb   :  { %v723_v34 = vmax.f32 %v659_v30, 0.0  ;;  %v739_v35 = vmax.f32 %v675_v31, 0.0 }
  0xfc   :  { %v692_v36 = vmax.f32 %v628_v32, 0.0  ;;  %v708_v37 = vmax.f32 %v644_v33, 0.0 }
  0xfd   :  { %787 = vst [vmem:[%s1665_s4 + $0x158] sm:$0xff] %v723_v34 }
  0xfe   :  { %803 = vst [vmem:[%s1665_s4 + $0x1d8] sm:$0xff] %v739_v35  ;;  %v502_v38 = vpop.f32.mrf.mxu2  ;;  %v542_v41 = vpop.f32.mrf.mxu3 }
  0xff   :  { %756 = vst [vmem:[%s1665_s4 + $0x60] sm:$0xff] %v692_v36  ;;  %v503_v43 = vadd.f32 %v1211_v40, %v502_v38  ;;  %v543_v44 = vadd.f32 %v1211_v40, %v542_v41  ;;  %v424_v45 = vpop.f32.mrf.mxu0  ;;  %v464_v47 = vpop.f32.mrf.mxu1  ;;  %v599_v36 = vld [vmem:[%s1664_s3 + $0x178] sm:$0xff] }
 0x100   :  { %772 = vst [vmem:[%s1665_s4 + $0xe0] sm:$0xff] %v708_v37  ;;  %v425_v49 = vadd.f32 %v1211_v40, %v424_v45  ;;  %v465_v50 = vadd.f32 %v1211_v40, %v464_v47  ;;  %v615_v38 = vld [vmem:[%s1664_s3 + $0x1f8] sm:$0xff] }
 0x101   :  { %v660_v51 = vadd.f32 %v596_v39, %v503_v43  ;;  %v676_v52 = vadd.f32 %v612_v42, %v543_v44 }
 0x102   :  { %v629_v53 = vadd.f32 %v565_v46, %v425_v49  ;;  %v645_v54 = vadd.f32 %v581_v48, %v465_v50 }
 0x103   :  { %v724_v55 = vmax.f32 %v660_v51, 0.0  ;;  %v740_v56 = vmax.f32 %v676_v52, 0.0 }
 0x104   :  { %v693_v57 = vmax.f32 %v629_v53, 0.0  ;;  %v709_v58 = vmax.f32 %v645_v54, 0.0 }
 0x105   :  { %788 = vst [vmem:[%s1665_s4 + $0x160] sm:$0xff] %v724_v55 }
 0x106   :  { %804 = vst [vmem:[%s1665_s4 + $0x1e0] sm:$0xff] %v740_v56  ;;  %v504_v59 = vpop.f32.mrf.mxu2  ;;  %v544_v61 = vpop.f32.mrf.mxu3 }
 0x107   :  { %757 = vst [vmem:[%s1665_s4 + $0x68] sm:$0xff] %v693_v57  ;;  %v505_v63 = vadd.f32 %v1211_v40, %v504_v59  ;;  %v545_v0 = vadd.f32 %v1211_v40, %v544_v61  ;;  %v427_v1 = vpop.f32.mrf.mxu0  ;;  %v467_v3 = vpop.f32.mrf.mxu1 }
 0x108   :  { %773 = vst [vmem:[%s1665_s4 + $0xe8] sm:$0xff] %v709_v58  ;;  %v428_v5 = vadd.f32 %v1211_v40, %v427_v1  ;;  %v468_v6 = vadd.f32 %v1211_v40, %v467_v3 }
 0x109   :  { %v661_v7 = vadd.f32 %v597_v60, %v505_v63  ;;  %v677_v8 = vadd.f32 %v613_v62, %v545_v0 }
 0x10a   :  { %v630_v9 = vadd.f32 %v566_v2, %v428_v5  ;;  %v646_v10 = vadd.f32 %v582_v4, %v468_v6 }
 0x10b   :  { %v725_v11 = vmax.f32 %v661_v7, 0.0  ;;  %v741_v12 = vmax.f32 %v677_v8, 0.0 }
 0x10c   :  { %v694_v13 = vmax.f32 %v630_v9, 0.0  ;;  %v710_v14 = vmax.f32 %v646_v10, 0.0 }
 0x10d   :  { %789 = vst [vmem:[%s1665_s4 + $0x168] sm:$0xff] %v725_v11 }
 0x10e   :  { %805 = vst [vmem:[%s1665_s4 + $0x1e8] sm:$0xff] %v741_v12  ;;  %v507_v15 = vpop.f32.mrf.mxu2  ;;  %v547_v17 = vpop.f32.mrf.mxu3 }
 0x10f   :  { %758 = vst [vmem:[%s1665_s4 + $0x70] sm:$0xff] %v694_v13  ;;  %v508_v19 = vadd.f32 %v1211_v40, %v507_v15  ;;  %v548_v20 = vadd.f32 %v1211_v40, %v547_v17  ;;  %v429_v21 = vpop.f32.mrf.mxu0  ;;  %v469_v23 = vpop.f32.mrf.mxu1 }
 0x110   :  { %774 = vst [vmem:[%s1665_s4 + $0xf0] sm:$0xff] %v710_v14  ;;  %v430_v25 = vadd.f32 %v1211_v40, %v429_v21  ;;  %v470_v26 = vadd.f32 %v1211_v40, %v469_v23 }
 0x111   :  { %v662_v27 = vadd.f32 %v598_v16, %v508_v19  ;;  %v678_v28 = vadd.f32 %v614_v18, %v548_v20 }
 0x112   :  { %v631_v29 = vadd.f32 %v567_v22, %v430_v25  ;;  %v647_v30 = vadd.f32 %v583_v24, %v470_v26 }
 0x113   :  { %v726_v31 = vmax.f32 %v662_v27, 0.0  ;;  %v742_v32 = vmax.f32 %v678_v28, 0.0 }
 0x114   :  { %v695_v33 = vmax.f32 %v631_v29, 0.0  ;;  %v711_v34 = vmax.f32 %v647_v30, 0.0 }
 0x115   :  { %790 = vst [vmem:[%s1665_s4 + $0x170] sm:$0xff] %v726_v31 }
 0x116   :  { %806 = vst [vmem:[%s1665_s4 + $0x1f0] sm:$0xff] %v742_v32  ;;  %v509_v35 = vpop.f32.mrf.mxu2  ;;  %v549_v37 = vpop.f32.mrf.mxu3 }
 0x117   :  { %759 = vst [vmem:[%s1665_s4 + $0x78] sm:$0xff] %v695_v33  ;;  %v510_v39 = vadd.f32 %v1211_v40, %v509_v35  ;;  %v550_v41 = vadd.f32 %v1211_v40, %v549_v37 }
 0x118   :  { %775 = vst [vmem:[%s1665_s4 + $0xf8] sm:$0xff] %v711_v34 }
 0x119   :  { %v663_v42 = vadd.f32 %v599_v36, %v510_v39  ;;  %v679_v43 = vadd.f32 %v615_v38, %v550_v41 }
 0x11b   :  { %v727_v44 = vmax.f32 %v663_v42, 0.0  ;;  %v743_v45 = vmax.f32 %v679_v43, 0.0 }
 0x11d   :  { %791 = vst [vmem:[%s1665_s4 + $0x178] sm:$0xff] %v727_v44 }
 0x11e   :  { %807 = vst [vmem:[%s1665_s4 + $0x1f8] sm:$0xff] %v743_v45 }

// kernel: _lambda_.13
= control target key start
LH: loop header
LB: loop body
LE: loop exit
PB: predicated region body
PF: predicated region fallthrough
CT: control target
= control target key end

     0   :  { %vm101_vm0 = vcmask 1043456   ;;  %vm76_vm1 = vcmask 64512   ;;  %s332_s1 = inlined_call_operand.vmem [shape: bf16[8,128], index: 1, kind: input, shape index: {}]   ;;  %s333_s0 = inlined_call_operand.vmem [shape: bf16[128,8], index: 0, kind: input, shape index: {}]   ;;  %s334_s2 = inlined_call_operand.vmem [shape: f32[1,128], index: 2, kind: input, shape index: {}]   ;;  %s335_s3 = inlined_call_operand.vmem [shape: f32[128,128], index: 3, kind: output, shape index: {}]  }
   0x1   :  { %v31_v0 = vld [vmem:[%s332_s1] sm:$0xf]  ;;  %v216_v3 = vld [vmem:[%s333_s0 + $0x10] sm:$0xff]  ;;  %v215_v6 = vld [vmem:[%s333_s0 + $0x8] sm:$0xff] }
   0x2   :  { %v103_v1 = vsel %vm101_vm0, %v31_v0, 0  ;;  %v214_v2 = vld [vmem:[%s333_s0] sm:$0xff]  ;;  %v220_v5 = vld [vmem:[%s333_s0 + $0x30] sm:$0xff]  ;;  %v217_v7 = vld [vmem:[%s333_s0 + $0x18] sm:$0xff] }
   0x3   :  { %112 = vmatpush.bf16.msra.mxu0 %v103_v1  ;;  %222 = vmatpush.bf16.msra.mxu1 %v103_v1  ;;  %v218_v4 = vld [vmem:[%s333_s0 + $0x20] sm:$0xff]  ;;  %v219_v8 = vld [vmem:[%s333_s0 + $0x28] sm:$0xff]  ;;  %v221_v9 = vld [vmem:[%s333_s0 + $0x38] sm:$0xff] }
   0x4   :  { %223 = vmatpush.bf16.msra.mxu2 %v103_v1  ;;  %224 = vmatpush.bf16.msra.mxu3 %v103_v1  ;;  %v225_v10 = vld [vmem:[%s334_s2] ss:$0 sm:$0xff] }
   0x6   :  { %206 = vmatmul.msk.bf16.vlgmr.msra.gmra.mxu0 %vm76_vm1, %v214_v2  ;;  %208 = vmatmul.msk.bf16.vlgmr.msra.gmra.mxu1 %vm76_vm1, %v216_v3 }
   0x7   :  { %210 = vmatmul.msk.bf16.vlgmr.msra.gmra.mxu2 %vm76_vm1, %v218_v4  ;;  %212 = vmatmul.msk.bf16.vlgmr.msra.gmra.mxu3 %vm76_vm1, %v220_v5 }
  0x16   :  { %207 = vmatmul.msk.bf16.gmra.mxu0 %vm76_vm1, %v215_v6  ;;  %209 = vmatmul.msk.bf16.gmra.mxu1 %vm76_vm1, %v217_v7 }
  0x17   :  { %211 = vmatmul.msk.bf16.gmra.mxu2 %vm76_vm1, %v219_v8  ;;  %213 = vmatmul.msk.bf16.gmra.mxu3 %vm76_vm1, %v221_v9 }
  0x83   :  { %v114_v11 = vpop.f32.mrf.mxu0  ;;  %v124_v12 = vpop.f32.mrf.mxu1 }
  0x84   :  { %v115_v13 = vadd.f32 %v225_v10, %v114_v11  ;;  %v125_v14 = vadd.f32 %v225_v10, %v124_v12 }
  0x86   :  { %154 = vst [vmem:[%s335_s3] sm:$0xff] %v115_v13 }
  0x87   :  { %158 = vst [vmem:[%s335_s3 + $0x20] sm:$0xff] %v125_v14 }
  0x8a   :  { %v134_v15 = vpop.f32.mrf.mxu2  ;;  %v144_v16 = vpop.f32.mrf.mxu3 }
  0x8b   :  { %v135_v17 = vadd.f32 %v225_v10, %v134_v15  ;;  %v145_v18 = vadd.f32 %v225_v10, %v144_v16  ;;  %v116_v19 = vpop.f32.mrf.mxu0  ;;  %v126_v20 = vpop.f32.mrf.mxu1 }
  0x8c   :  { %v117_v21 = vadd.f32 %v225_v10, %v116_v19  ;;  %v127_v22 = vadd.f32 %v225_v10, %v126_v20 }
  0x8d   :  { %162 = vst [vmem:[%s335_s3 + $0x40] sm:$0xff] %v135_v17 }
  0x8e   :  { %166 = vst [vmem:[%s335_s3 + $0x60] sm:$0xff] %v145_v18 }
  0x8f   :  { %155 = vst [vmem:[%s335_s3 + $0x8] sm:$0xff] %v117_v21 }
  0x90   :  { %159 = vst [vmem:[%s335_s3 + $0x28] sm:$0xff] %v127_v22 }
  0x92   :  { %v136_v23 = vpop.f32.mrf.mxu2  ;;  %v146_v24 = vpop.f32.mrf.mxu3 }
  0x93   :  { %v137_v25 = vadd.f32 %v225_v10, %v136_v23  ;;  %v147_v26 = vadd.f32 %v225_v10, %v146_v24  ;;  %v119_v27 = vpop.f32.mrf.mxu0  ;;  %v129_v28 = vpop.f32.mrf.mxu1 }
  0x94   :  { %v120_v29 = vadd.f32 %v225_v10, %v119_v27  ;;  %v130_v30 = vadd.f32 %v225_v10, %v129_v28 }
  0x95   :  { %163 = vst [vmem:[%s335_s3 + $0x48] sm:$0xff] %v137_v25 }
  0x96   :  { %167 = vst [vmem:[%s335_s3 + $0x68] sm:$0xff] %v147_v26 }
  0x97   :  { %156 = vst [vmem:[%s335_s3 + $0x10] sm:$0xff] %v120_v29 }
  0x98   :  { %160 = vst [vmem:[%s335_s3 + $0x30] sm:$0xff] %v130_v30 }
  0x9a   :  { %v139_v31 = vpop.f32.mrf.mxu2  ;;  %v149_v32 = vpop.f32.mrf.mxu3 }
  0x9b   :  { %v140_v33 = vadd.f32 %v225_v10, %v139_v31  ;;  %v150_v34 = vadd.f32 %v225_v10, %v149_v32  ;;  %v121_v35 = vpop.f32.mrf.mxu0  ;;  %v131_v36 = vpop.f32.mrf.mxu1 }
  0x9c   :  { %v122_v37 = vadd.f32 %v225_v10, %v121_v35  ;;  %v132_v38 = vadd.f32 %v225_v10, %v131_v36 }
  0x9d   :  { %164 = vst [vmem:[%s335_s3 + $0x50] sm:$0xff] %v140_v33 }
  0x9e   :  { %168 = vst [vmem:[%s335_s3 + $0x70] sm:$0xff] %v150_v34 }
  0x9f   :  { %157 = vst [vmem:[%s335_s3 + $0x18] sm:$0xff] %v122_v37 }
  0xa0   :  { %161 = vst [vmem:[%s335_s3 + $0x38] sm:$0xff] %v132_v38 }
  0xa2   :  { %v141_v39 = vpop.f32.mrf.mxu2  ;;  %v151_v40 = vpop.f32.mrf.mxu3 }
  0xa3   :  { %v142_v41 = vadd.f32 %v225_v10, %v141_v39  ;;  %v152_v42 = vadd.f32 %v225_v10, %v151_v40 }
  0xa5   :  { %165 = vst [vmem:[%s335_s3 + $0x58] sm:$0xff] %v142_v41 }
  0xa6   :  { %169 = vst [vmem:[%s335_s3 + $0x78] sm:$0xff] %v152_v42 }

// kernel: _lambda_.12
= control target key start
LH: loop header
LB: loop body
LE: loop exit
PB: predicated region body
PF: predicated region fallthrough
CT: control target
= control target key end

     0   :  { %vm136_vm0 = vcmask 1043456   ;;  %vm111_vm1 = vcmask 588800   ;;  %s427_s1 = inlined_call_operand.vmem [shape: bf16[72,128], index: 1, kind: input, shape index: {}]   ;;  %s428_s2 = inlined_call_operand.vmem [shape: f32[1,128], index: 2, kind: input, shape index: {}]   ;;  %s429_s0 = inlined_call_operand.vmem [shape: bf16[128,72], index: 0, kind: input, shape index: {}]   ;;  %s430_s3 = inlined_call_operand.vmem [shape: f32[128,128], index: 3, kind: output, shape index: {}]  }
   0x1   :  { %v39_v0 = vld [vmem:[%s427_s1 + $0x20] sm:$0xf]  ;;  %v292_v4 = vld [vmem:[%s427_s1 + $0x18] sm:$0xff]  ;;  %v291_v5 = vld [vmem:[%s427_s1 + $0x10] sm:$0xff] }
   0x2   :  { %v101_v1 = vunpack.c.l.b16 %v39_v0  ;;  %v290_v6 = vld [vmem:[%s427_s1 + $0x8] sm:$0xff]  ;;  %v289_v7 = vld [vmem:[%s427_s1] sm:$0xff]  ;;  %v283_v9 = vld [vmem:[%s429_s0 + $0x10] sm:$0xff] }
   0x3   :  { %v281_v8 = vld [vmem:[%s429_s0] sm:$0xff]  ;;  %v287_v11 = vld [vmem:[%s429_s0 + $0x30] sm:$0xff]  ;;  %v282_v12 = vld [vmem:[%s429_s0 + $0x8] sm:$0xff] }
   0x4   :  { %v106_v2 = vpack.c.b16 %v101_v1, %v101_v1  ;;  %v285_v10 = vld [vmem:[%s429_s0 + $0x20] sm:$0xff]  ;;  %v284_v13 = vld [vmem:[%s429_s0 + $0x18] sm:$0xff]  ;;  %v286_v14 = vld [vmem:[%s429_s0 + $0x28] sm:$0xff] }
   0x5   :  { %v288_v15 = vld [vmem:[%s429_s0 + $0x38] sm:$0xff]  ;;  %v308_v16 = vld [vmem:[%s428_s2] ss:$0 sm:$0xff] }
   0x6   :  { %v138_v3 = vsel %vm136_vm0, %v106_v2, 0 }
   0x7   :  { %143 = vmatpush.bf16.msra.mxu0 %v138_v3  ;;  %293 = vmatpush.bf16.msra.mxu1 %v138_v3 }
   0x8   :  { %294 = vmatpush.bf16.msra.mxu2 %v138_v3  ;;  %295 = vmatpush.bf16.msra.mxu3 %v138_v3 }
   0xb   :  { %144 = vmatpush.bf16.msra.mxu0 %v292_v4  ;;  %296 = vmatpush.bf16.msra.mxu1 %v292_v4 }
   0xc   :  { %297 = vmatpush.bf16.msra.mxu2 %v292_v4  ;;  %298 = vmatpush.bf16.msra.mxu3 %v292_v4 }
   0xf   :  { %145 = vmatpush.bf16.msra.mxu0 %v291_v5  ;;  %299 = vmatpush.bf16.msra.mxu1 %v291_v5 }
  0x10   :  { %300 = vmatpush.bf16.msra.mxu2 %v291_v5  ;;  %301 = vmatpush.bf16.msra.mxu3 %v291_v5 }
  0x13   :  { %146 = vmatpush.bf16.msra.mxu0 %v290_v6  ;;  %302 = vmatpush.bf16.msra.mxu1 %v290_v6 }
  0x14   :  { %303 = vmatpush.bf16.msra.mxu2 %v290_v6  ;;  %304 = vmatpush.bf16.msra.mxu3 %v290_v6 }
  0x17   :  { %147 = vmatpush.bf16.msra.mxu0 %v289_v7  ;;  %305 = vmatpush.bf16.msra.mxu1 %v289_v7 }
  0x18   :  { %306 = vmatpush.bf16.msra.mxu2 %v289_v7  ;;  %307 = vmatpush.bf16.msra.mxu3 %v289_v7 }
  0x1a   :  { %273 = vmatmul.msk.bf16.vlgmr.msra.gmra.mxu0 %vm111_vm1, %v281_v8  ;;  %275 = vmatmul.msk.bf16.vlgmr.msra.gmra.mxu1 %vm111_vm1, %v283_v9 }
  0x1b   :  { %277 = vmatmul.msk.bf16.vlgmr.msra.gmra.mxu2 %vm111_vm1, %v285_v10  ;;  %279 = vmatmul.msk.bf16.vlgmr.msra.gmra.mxu3 %vm111_vm1, %v287_v11 }
  0x2a   :  { %274 = vmatmul.msk.bf16.gmra.mxu0 %vm111_vm1, %v282_v12  ;;  %276 = vmatmul.msk.bf16.gmra.mxu1 %vm111_vm1, %v284_v13 }
  0x2b   :  { %278 = vmatmul.msk.bf16.gmra.mxu2 %vm111_vm1, %v286_v14  ;;  %280 = vmatmul.msk.bf16.gmra.mxu3 %vm111_vm1, %v288_v15 }
  0x97   :  { %v149_v17 = vpop.f32.mrf.mxu0  ;;  %v159_v18 = vpop.f32.mrf.mxu1 }
  0x98   :  { %v150_v19 = vadd.f32 %v308_v16, %v149_v17  ;;  %v160_v20 = vadd.f32 %v308_v16, %v159_v18 }
  0x9a   :  { %v189_v21 = vmax.f32 %v150_v19, 0.0  ;;  %v193_v22 = vmax.f32 %v160_v20, 0.0 }
  0x9c   :  { %205 = vst [vmem:[%s430_s3] sm:$0xff] %v189_v21 }
  0x9d   :  { %209 = vst [vmem:[%s430_s3 + $0x20] sm:$0xff] %v193_v22 }
  0x9e   :  { %v169_v23 = vpop.f32.mrf.mxu2  ;;  %v179_v24 = vpop.f32.mrf.mxu3 }
  0x9f   :  { %v170_v25 = vadd.f32 %v308_v16, %v169_v23  ;;  %v180_v26 = vadd.f32 %v308_v16, %v179_v24  ;;  %v151_v27 = vpop.f32.mrf.mxu0  ;;  %v161_v28 = vpop.f32.mrf.mxu1 }
  0xa0   :  { %v152_v29 = vadd.f32 %v308_v16, %v151_v27  ;;  %v162_v30 = vadd.f32 %v308_v16, %v161_v28 }
  0xa1   :  { %v197_v31 = vmax.f32 %v170_v25, 0.0  ;;  %v201_v32 = vmax.f32 %v180_v26, 0.0 }
  0xa2   :  { %v190_v33 = vmax.f32 %v152_v29, 0.0  ;;  %v194_v34 = vmax.f32 %v162_v30, 0.0 }
  0xa3   :  { %213 = vst [vmem:[%s430_s3 + $0x40] sm:$0xff] %v197_v31 }
  0xa4   :  { %217 = vst [vmem:[%s430_s3 + $0x60] sm:$0xff] %v201_v32 }
  0xa5   :  { %206 = vst [vmem:[%s430_s3 + $0x8] sm:$0xff] %v190_v33 }
  0xa6   :  { %210 = vst [vmem:[%s430_s3 + $0x28] sm:$0xff] %v194_v34  ;;  %v171_v35 = vpop.f32.mrf.mxu2  ;;  %v181_v36 = vpop.f32.mrf.mxu3 }
  0xa7   :  { %v172_v37 = vadd.f32 %v308_v16, %v171_v35  ;;  %v182_v38 = vadd.f32 %v308_v16, %v181_v36  ;;  %v154_v39 = vpop.f32.mrf.mxu0  ;;  %v164_v40 = vpop.f32.mrf.mxu1 }
  0xa8   :  { %v155_v41 = vadd.f32 %v308_v16, %v154_v39  ;;  %v165_v42 = vadd.f32 %v308_v16, %v164_v40 }
  0xa9   :  { %v198_v43 = vmax.f32 %v172_v37, 0.0  ;;  %v202_v44 = vmax.f32 %v182_v38, 0.0 }
  0xaa   :  { %v191_v45 = vmax.f32 %v155_v41, 0.0  ;;  %v195_v46 = vmax.f32 %v165_v42, 0.0 }
  0xab   :  { %214 = vst [vmem:[%s430_s3 + $0x48] sm:$0xff] %v198_v43 }
  0xac   :  { %218 = vst [vmem:[%s430_s3 + $0x68] sm:$0xff] %v202_v44 }
  0xad   :  { %207 = vst [vmem:[%s430_s3 + $0x10] sm:$0xff] %v191_v45 }
  0xae   :  { %211 = vst [vmem:[%s430_s3 + $0x30] sm:$0xff] %v195_v46  ;;  %v174_v47 = vpop.f32.mrf.mxu2  ;;  %v184_v48 = vpop.f32.mrf.mxu3 }
  0xaf   :  { %v175_v49 = vadd.f32 %v308_v16, %v174_v47  ;;  %v185_v50 = vadd.f32 %v308_v16, %v184_v48  ;;  %v156_v51 = vpop.f32.mrf.mxu0  ;;  %v166_v52 = vpop.f32.mrf.mxu1 }
  0xb0   :  { %v157_v53 = vadd.f32 %v308_v16, %v156_v51  ;;  %v167_v54 = vadd.f32 %v308_v16, %v166_v52 }
  0xb1   :  { %v199_v55 = vmax.f32 %v175_v49, 0.0  ;;  %v203_v56 = vmax.f32 %v185_v50, 0.0 }
  0xb2   :  { %v192_v57 = vmax.f32 %v157_v53, 0.0  ;;  %v196_v58 = vmax.f32 %v167_v54, 0.0 }
  0xb3   :  { %215 = vst [vmem:[%s430_s3 + $0x50] sm:$0xff] %v199_v55 }
  0xb4   :  { %219 = vst [vmem:[%s430_s3 + $0x70] sm:$0xff] %v203_v56 }
  0xb5   :  { %208 = vst [vmem:[%s430_s3 + $0x18] sm:$0xff] %v192_v57 }
  0xb6   :  { %212 = vst [vmem:[%s430_s3 + $0x38] sm:$0xff] %v196_v58  ;;  %v176_v59 = vpop.f32.mrf.mxu2  ;;  %v186_v60 = vpop.f32.mrf.mxu3 }
  0xb7   :  { %v177_v61 = vadd.f32 %v308_v16, %v176_v59  ;;  %v187_v62 = vadd.f32 %v308_v16, %v186_v60 }
  0xb9   :  { %v200_v63 = vmax.f32 %v177_v61, 0.0  ;;  %v204_v0 = vmax.f32 %v187_v62, 0.0 }
  0xbb   :  { %216 = vst [vmem:[%s430_s3 + $0x58] sm:$0xff] %v200_v63 }
  0xbc   :  { %220 = vst [vmem:[%s430_s3 + $0x78] sm:$0xff] %v204_v0 }

// kernel: _lambda_.16
= control target key start
LH: loop header
LB: loop body
LE: loop exit
PB: predicated region body
PF: predicated region fallthrough
CT: control target
= control target key end

     0   :  { %vm41_vm0 = vcmask 130048   ;;  %s138_s1 = inlined_call_operand.vmem [shape: bf16[16,128], index: 1, kind: input, shape index: {}]   ;;  %s139_s0 = inlined_call_operand.vmem [shape: bf16[32,16], index: 0, kind: input, shape index: {}]   ;;  %s140_s2 = inlined_call_operand.vmem [shape: f32[1,128], index: 2, kind: input, shape index: {}]   ;;  %s141_s3 = inlined_call_operand.vmem [shape: f32[32,128], index: 3, kind: output, shape index: {}]  }
   0x1   :  { %v91_v0 = vld [vmem:[%s138_s1] sm:$0xff]  ;;  %v90_v2 = vld [vmem:[%s139_s0 + $0x8] sm:$0xff] }
   0x2   :  { %v89_v1 = vld [vmem:[%s139_s0] sm:$0xff]  ;;  %55 = vmatpush.bf16.msra.mxu0 %v91_v0  ;;  %92 = vmatpush.bf16.msra.mxu1 %v91_v0 }
   0x3   :  { %v93_v3 = vld [vmem:[%s140_s2] ss:$0 sm:$0xff] }
   0x5   :  { %87 = vmatmul.msk.bf16.vlgmr.msra.gmra.mxu0 %vm41_vm0, %v89_v1  ;;  %88 = vmatmul.msk.bf16.vlgmr.msra.gmra.mxu1 %vm41_vm0, %v90_v2 }
  0x82   :  { %v57_v4 = vpop.f32.mrf.mxu0  ;;  %v62_v5 = vpop.f32.mrf.mxu1 }
  0x83   :  { %v58_v6 = vadd.f32 %v93_v3, %v57_v4  ;;  %v63_v7 = vadd.f32 %v93_v3, %v62_v5 }
  0x85   :  { %67 = vst [vmem:[%s141_s3] sm:$0xff] %v58_v6 }
  0x86   :  { %69 = vst [vmem:[%s141_s3 + $0x10] sm:$0xff] %v63_v7 }
  0x8a   :  { %v59_v8 = vpop.f32.mrf.mxu0  ;;  %v64_v9 = vpop.f32.mrf.mxu1 }
  0x8b   :  { %v60_v10 = vadd.f32 %v93_v3, %v59_v8  ;;  %v65_v11 = vadd.f32 %v93_v3, %v64_v9 }
  0x8d   :  { %68 = vst [vmem:[%s141_s3 + $0x8] sm:$0xff] %v60_v10 }
  0x8e   :  { %70 = vst [vmem:[%s141_s3 + $0x18] sm:$0xff] %v65_v11 }

// kernel: _lambda_.14
= control target key start
LH: loop header
LB: loop body
LE: loop exit
PB: predicated region body
PF: predicated region fallthrough
CT: control target
= control target key end

     0   :  { %vm182_vm0 = vcmask 130048   ;;  %s795_s1 = inlined_call_operand.vmem [shape: bf16[144,128], index: 1, kind: input, shape index: {}]   ;;  %s796_s0 = inlined_call_operand.vmem [shape: bf16[128,144], index: 0, kind: input, shape index: {}]   ;;  %s797_s2 = inlined_call_operand.vmem [shape: f32[1,128], index: 2, kind: input, shape index: {}]   ;;  %s798_s3 = inlined_call_operand.vmem [shape: f32[128,128], index: 3, kind: input, shape index: {}]   ;;  %s799_s4 = inlined_call_operand.vmem [shape: f32[128,128], index: 4, kind: output, shape index: {}]  }
   0x1   :  { %v504_v0 = vld [vmem:[%s795_s1 + $0x38] sm:$0xff]  ;;  %v505_v1 = vld [vmem:[%s795_s1 + $0x40] sm:$0xff]  ;;  %v377_v3 = vld [vmem:[%s796_s0 + $0x8] sm:$0xf0] }
   0x2   :  { %v481_v2 = vld [vmem:[%s796_s0 + $0x4] sm:$0xf]  ;;  %207 = vmatpush.bf16.msra.mxu0 %v504_v0  ;;  %506 = vmatpush.bf16.msra.mxu2 %v504_v0  ;;  %v503_v5 = vld [vmem:[%s795_s1 + $0x30] sm:$0xff]  ;;  %v502_v6 = vld [vmem:[%s795_s1 + $0x28] sm:$0xff] }
   0x3   :  { %v380_v4 = vor.u32 %v481_v2, %v377_v3  ;;  %263 = vmatpush.bf16.msra.mxu1 %v505_v1  ;;  %514 = vmatpush.bf16.msra.mxu3 %v505_v1  ;;  %v491_v7 = vld [vmem:[%s796_s0 + $0x54] sm:$0xf]  ;;  %v417_v8 = vld [vmem:[%s796_s0 + $0x58] sm:$0xf0]  ;;  %v501_v10 = vld [vmem:[%s795_s1 + $0x20] sm:$0xff] }
   0x4   :  { %v420_v9 = vor.u32 %v491_v7, %v417_v8  ;;  %v500_v11 = vld [vmem:[%s795_s1 + $0x18] sm:$0xff]  ;;  %v483_v12 = vld [vmem:[%s796_s0 + $0x14] sm:$0xf]  ;;  %v498_v16 = vld [vmem:[%s795_s1 + $0x8] sm:$0xff] }
   0x5   :  { %v385_v13 = vld [vmem:[%s796_s0 + $0x18] sm:$0xf0]  ;;  %v499_v15 = vld [vmem:[%s795_s1 + $0x10] sm:$0xff]  ;;  %v493_v17 = vld [vmem:[%s796_s0 + $0x64] sm:$0xf] }
   0x6   :  { %473 = vmatmul.msk.bf16.vlgmr.msra.gmra.mxu1 %vm182_vm0, %v380_v4  ;;  %208 = vmatpush.bf16.msra.mxu0 %v503_v5  ;;  %v388_v14 = vor.u32 %v483_v12, %v385_v13  ;;  %v425_v18 = vld [vmem:[%s796_s0 + $0x68] sm:$0xf0]  ;;  %v497_v20 = vld [vmem:[%s795_s1] sm:$0xff]  ;;  %v482_v22 = vld [vmem:[%s796_s0 + $0x4] sm:$0xf0] }
   0x7   :  { %507 = vmatpush.bf16.msra.mxu2 %v503_v5  ;;  %478 = vmatmul.msk.bf16.vlgmr.msra.gmra.mxu3 %vm182_vm0, %v420_v9  ;;  %v428_v19 = vor.u32 %v493_v17, %v425_v18  ;;  %v375_v21 = vld [vmem:[%s796_s0] sm:$0xf]  ;;  %v490_v24 = vld [vmem:[%s796_s0 + $0x44] sm:$0xf0]  ;;  %v485_v27 = vld [vmem:[%s796_s0 + $0x24] sm:$0xf] }
   0x8   :  { %v407_v23 = vld [vmem:[%s796_s0 + $0x40] sm:$0xf]  ;;  %v376_v25 = vor.u32 %v482_v22, %v375_v21  ;;  %v393_v28 = vld [vmem:[%s796_s0 + $0x28] sm:$0xf0]  ;;  %v495_v30 = vld [vmem:[%s796_s0 + $0x74] sm:$0xf] }
   0x9   :  { %v408_v26 = vor.u32 %v490_v24, %v407_v23  ;;  %v396_v29 = vor.u32 %v485_v27, %v393_v28  ;;  %v433_v31 = vld [vmem:[%s796_s0 + $0x78] sm:$0xf0]  ;;  %v383_v33 = vld [vmem:[%s796_s0 + $0x10] sm:$0xf]  ;;  %v484_v34 = vld [vmem:[%s796_s0 + $0x14] sm:$0xf0] }
   0xa   :  { %209 = vmatpush.bf16.msra.mxu0 %v502_v6  ;;  %v436_v32 = vor.u32 %v495_v30, %v433_v31  ;;  %v415_v35 = vld [vmem:[%s796_s0 + $0x50] sm:$0xf]  ;;  %v492_v36 = vld [vmem:[%s796_s0 + $0x54] sm:$0xf0]  ;;  %v384_v37 = vor.u32 %v484_v34, %v383_v33  ;;  %v487_v39 = vld [vmem:[%s796_s0 + $0x34] sm:$0xf] }
   0xb   :  { %508 = vmatpush.bf16.msra.mxu2 %v502_v6  ;;  %v416_v38 = vor.u32 %v492_v36, %v415_v35  ;;  %v401_v40 = vld [vmem:[%s796_s0 + $0x38] sm:$0xf0]  ;;  %v391_v42 = vld [vmem:[%s796_s0 + $0x20] sm:$0xf]  ;;  %v486_v43 = vld [vmem:[%s796_s0 + $0x24] sm:$0xf0] }
   0xc   :  { %v404_v41 = vor.u32 %v487_v39, %v401_v40  ;;  %v423_v44 = vld [vmem:[%s796_s0 + $0x60] sm:$0xf]  ;;  %v494_v45 = vld [vmem:[%s796_s0 + $0x64] sm:$0xf0]  ;;  %v392_v46 = vor.u32 %v486_v43, %v391_v42  ;;  %v489_v48 = vld [vmem:[%s796_s0 + $0x44] sm:$0xf] }
   0xd   :  { %v424_v47 = vor.u32 %v494_v45, %v423_v44  ;;  %v409_v49 = vld [vmem:[%s796_s0 + $0x48] sm:$0xf0]  ;;  %v399_v51 = vld [vmem:[%s796_s0 + $0x30] sm:$0xf]  ;;  %v488_v52 = vld [vmem:[%s796_s0 + $0x34] sm:$0xf0] }
   0xe   :  { %210 = vmatpush.bf16.msra.mxu0 %v501_v10  ;;  %v412_v50 = vor.u32 %v489_v48, %v409_v49  ;;  %v431_v53 = vld [vmem:[%s796_s0 + $0x70] sm:$0xf]  ;;  %v496_v54 = vld [vmem:[%s796_s0 + $0x74] sm:$0xf0]  ;;  %v400_v55 = vor.u32 %v488_v52, %v399_v51  ;;  %v675_v61 = vld [vmem:[%s797_s2] ss:$0 sm:$0xff] }
   0xf   :  { %509 = vmatpush.bf16.msra.mxu2 %v501_v10  ;;  %v432_v56 = vor.u32 %v496_v54, %v431_v53  ;;  %v305_v0 = vld [vmem:[%s798_s3] sm:$0xff]  ;;  %v306_v8 = vld [vmem:[%s798_s3 + $0x8] sm:$0xff]  ;;  %v307_v17 = vld [vmem:[%s798_s3 + $0x10] sm:$0xff] }
  0x10   :  { %v316_v39 = vld [vmem:[%s798_s3 + $0x58] sm:$0xff]  ;;  %v309_v42 = vld [vmem:[%s798_s3 + $0x20] sm:$0xff] }
  0x11   :  { %v313_v49 = vld [vmem:[%s798_s3 + $0x40] sm:$0xff] }
  0x12   :  { %211 = vmatpush.bf16.msra.mxu0 %v500_v11 }
  0x13   :  { %510 = vmatpush.bf16.msra.mxu2 %v500_v11 }
  0x16   :  { %474 = vmatmul.msk.bf16.gmra.mxu1 %vm182_vm0, %v388_v14  ;;  %212 = vmatpush.bf16.msra.mxu0 %v499_v15 }
  0x17   :  { %511 = vmatpush.bf16.msra.mxu2 %v499_v15  ;;  %479 = vmatmul.msk.bf16.gmra.mxu3 %vm182_vm0, %v428_v19 }
  0x1a   :  { %213 = vmatpush.bf16.msra.mxu0 %v498_v16 }
  0x1b   :  { %512 = vmatpush.bf16.msra.mxu2 %v498_v16 }
  0x1e   :  { %214 = vmatpush.bf16.msra.mxu0 %v497_v20 }
  0x1f   :  { %513 = vmatpush.bf16.msra.mxu2 %v497_v20 }
  0x21   :  { %215 = vmatmul.bf16.vlgmr.msra.gmra.mxu0 %v376_v25  ;;  %v315_v25 = vld [vmem:[%s798_s3 + $0x50] sm:$0xff] }
  0x22   :  { %235 = vmatmul.bf16.vlgmr.msra.gmra.mxu2 %v408_v26 }
  0x26   :  { %475 = vmatmul.msk.bf16.gmra.mxu1 %vm182_vm0, %v396_v29  ;;  %v308_v29 = vld [vmem:[%s798_s3 + $0x18] sm:$0xff] }
  0x27   :  { %480 = vmatmul.msk.bf16.gmra.mxu3 %vm182_vm0, %v436_v32 }
  0x31   :  { %220 = vmatmul.bf16.gmra.mxu0 %v384_v37 }
  0x32   :  { %240 = vmatmul.bf16.gmra.mxu2 %v416_v38 }
  0x36   :  { %476 = vmatmul.msk.bf16.gmra.mxu1 %vm182_vm0, %v404_v41 }
  0x41   :  { %225 = vmatmul.bf16.gmra.mxu0 %v392_v46 }
  0x42   :  { %245 = vmatmul.bf16.gmra.mxu2 %v424_v47 }
  0x46   :  { %477 = vmatmul.msk.bf16.gmra.mxu1 %vm182_vm0, %v412_v50 }
  0x51   :  { %230 = vmatmul.bf16.gmra.mxu0 %v400_v55 }
  0x52   :  { %250 = vmatmul.bf16.gmra.mxu2 %v432_v56 }
  0x83   :  { %v265_v57 = vpop.f32.mrf.mxu1 }
  0x8a   :  { %v290_v14 = vpop.f32.mrf.mxu3 }
  0x8b   :  { %v267_v58 = vpop.f32.mrf.mxu1 }
  0x92   :  { %v292_v27 = vpop.f32.mrf.mxu3 }
  0x93   :  { %v270_v59 = vpop.f32.mrf.mxu1 }
  0x9a   :  { %v295_v44 = vpop.f32.mrf.mxu3 }
  0x9b   :  { %v272_v60 = vpop.f32.mrf.mxu1 }
  0x9e   :  { %v216_v62 = vpop.f32.mrf.mxu0 }
  0x9f   :  { %v217_v63 = vadd.f32 %v675_v61, %v216_v62  ;;  %v310_v62 = vld [vmem:[%s798_s3 + $0x28] sm:$0xff] }
  0xa1   :  { %v266_v1 = vadd.f32 %v265_v57, %v217_v63  ;;  %v317_v57 = vld [vmem:[%s798_s3 + $0x60] sm:$0xff] }
  0xa3   :  { %v321_v2 = vadd.f32 %v305_v0, %v266_v1  ;;  %v275_v3 = vpop.f32.mrf.mxu1 }
  0xa5   :  { %v337_v4 = vmax.f32 %v321_v2, 0.0  ;;  %v236_v5 = vpop.f32.mrf.mxu2 }
  0xa6   :  { %v218_v6 = vpop.f32.mrf.mxu0  ;;  %v237_v45 = vadd.f32 %v675_v61, %v236_v5  ;;  %v314_v5 = vld [vmem:[%s798_s3 + $0x48] sm:$0xff] }
  0xa7   :  { %353 = vst [vmem:[%s799_s4] sm:$0xff] %v337_v4  ;;  %v219_v7 = vadd.f32 %v675_v61, %v218_v6 }
  0xa9   :  { %v268_v9 = vadd.f32 %v267_v58, %v219_v7 }
  0xab   :  { %v322_v10 = vadd.f32 %v306_v8, %v268_v9  ;;  %v277_v11 = vpop.f32.mrf.mxu1 }
  0xad   :  { %v338_v12 = vmax.f32 %v322_v10, 0.0  ;;  %v238_v13 = vpop.f32.mrf.mxu2 }
  0xae   :  { %v221_v15 = vpop.f32.mrf.mxu0  ;;  %v239_v0 = vadd.f32 %v675_v61, %v238_v13  ;;  %v318_v13 = vld [vmem:[%s798_s3 + $0x68] sm:$0xff] }
  0xaf   :  { %354 = vst [vmem:[%s799_s4 + $0x8] sm:$0xff] %v338_v12  ;;  %v222_v16 = vadd.f32 %v675_v61, %v221_v15 }
  0xb1   :  { %v271_v18 = vadd.f32 %v270_v59, %v222_v16 }
  0xb3   :  { %v323_v19 = vadd.f32 %v307_v17, %v271_v18  ;;  %v695_v20 = vpop.f32.mrf.mxu1  ;;  %v311_v17 = vld [vmem:[%s798_s3 + $0x30] sm:$0xff] }
  0xb5   :  { %v339_v21 = vmax.f32 %v323_v19, 0.0  ;;  %v241_v22 = vpop.f32.mrf.mxu2 }
  0xb6   :  { %v242_v23 = vadd.f32 %v675_v61, %v241_v22  ;;  %v223_v24 = vpop.f32.mrf.mxu0 }
  0xb7   :  { %355 = vst [vmem:[%s799_s4 + $0x10] sm:$0xff] %v339_v21  ;;  %v224_v26 = vadd.f32 %v675_v61, %v223_v24 }
  0xb8   :  { %v291_v28 = vadd.f32 %v290_v14, %v242_v23 }
  0xb9   :  { %v273_v30 = vadd.f32 %v272_v60, %v224_v26 }
  0xba   :  { %v331_v31 = vadd.f32 %v315_v25, %v291_v28 }
  0xbb   :  { %v324_v32 = vadd.f32 %v308_v29, %v273_v30  ;;  %v708_v33 = vpop.f32.mrf.mxu1  ;;  %v312_v30 = vld [vmem:[%s798_s3 + $0x38] sm:$0xff] }
  0xbc   :  { %v347_v34 = vmax.f32 %v331_v31, 0.0 }
  0xbd   :  { %v340_v35 = vmax.f32 %v324_v32, 0.0  ;;  %v243_v36 = vpop.f32.mrf.mxu2 }
  0xbe   :  { %363 = vst [vmem:[%s799_s4 + $0x50] sm:$0xff] %v347_v34  ;;  %v244_v37 = vadd.f32 %v675_v61, %v243_v36  ;;  %v226_v38 = vpop.f32.mrf.mxu0 }
  0xbf   :  { %356 = vst [vmem:[%s799_s4 + $0x18] sm:$0xff] %v340_v35  ;;  %v227_v40 = vadd.f32 %v675_v61, %v226_v38 }
  0xc0   :  { %v293_v41 = vadd.f32 %v292_v27, %v244_v37 }
  0xc1   :  { %v276_v43 = vadd.f32 %v275_v3, %v227_v40  ;;  %v297_v3 = vpop.f32.mrf.mxu3 }
  0xc2   :  { %v332_v46 = vadd.f32 %v316_v39, %v293_v41 }
  0xc3   :  { %v325_v47 = vadd.f32 %v309_v42, %v276_v43  ;;  %v285_v48 = vpop.f32.mrf.mxu1 }
  0xc4   :  { %v348_v50 = vmax.f32 %v332_v46, 0.0  ;;  %v286_v51 = vadd.f32 %v285_v48, %v237_v45 }
  0xc5   :  { %v341_v52 = vmax.f32 %v325_v47, 0.0  ;;  %v246_v53 = vpop.f32.mrf.mxu2 }
  0xc6   :  { %364 = vst [vmem:[%s799_s4 + $0x58] sm:$0xff] %v348_v50  ;;  %v329_v54 = vadd.f32 %v313_v49, %v286_v51  ;;  %v247_v55 = vadd.f32 %v675_v61, %v246_v53  ;;  %v228_v56 = vpop.f32.mrf.mxu0 }
  0xc7   :  { %357 = vst [vmem:[%s799_s4 + $0x20] sm:$0xff] %v341_v52  ;;  %v229_v58 = vadd.f32 %v675_v61, %v228_v56 }
  0xc8   :  { %v345_v59 = vmax.f32 %v329_v54, 0.0  ;;  %v296_v60 = vadd.f32 %v295_v44, %v247_v55 }
  0xc9   :  { %v278_v63 = vadd.f32 %v277_v11, %v229_v58  ;;  %v300_v24 = vpop.f32.mrf.mxu3 }
  0xca   :  { %361 = vst [vmem:[%s799_s4 + $0x40] sm:$0xff] %v345_v59  ;;  %v333_v1 = vadd.f32 %v317_v57, %v296_v60 }
  0xcb   :  { %v326_v2 = vadd.f32 %v310_v62, %v278_v63  ;;  %v287_v4 = vpop.f32.mrf.mxu1 }
  0xcc   :  { %v349_v6 = vmax.f32 %v333_v1, 0.0  ;;  %v288_v7 = vadd.f32 %v287_v4, %v239_v0 }
  0xcd   :  { %v342_v8 = vmax.f32 %v326_v2, 0.0  ;;  %v248_v9 = vpop.f32.mrf.mxu2 }
  0xce   :  { %365 = vst [vmem:[%s799_s4 + $0x60] sm:$0xff] %v349_v6  ;;  %v330_v10 = vadd.f32 %v314_v5, %v288_v7  ;;  %v249_v11 = vadd.f32 %v675_v61, %v248_v9  ;;  %v231_v12 = vpop.f32.mrf.mxu0 }
  0xcf   :  { %358 = vst [vmem:[%s799_s4 + $0x28] sm:$0xff] %v342_v8  ;;  %v232_v14 = vadd.f32 %v675_v61, %v231_v12 }
  0xd0   :  { %v346_v15 = vmax.f32 %v330_v10, 0.0  ;;  %v298_v16 = vadd.f32 %v297_v3, %v249_v11 }
  0xd1   :  { %v281_v18 = vadd.f32 %v695_v20, %v232_v14  ;;  %v319_v20 = vld [vmem:[%s798_s3 + $0x70] sm:$0xff]  ;;  %v302_v39 = vpop.f32.mrf.mxu3 }
  0xd2   :  { %362 = vst [vmem:[%s799_s4 + $0x48] sm:$0xff] %v346_v15  ;;  %v334_v19 = vadd.f32 %v318_v13, %v298_v16 }
  0xd3   :  { %v327_v21 = vadd.f32 %v311_v17, %v281_v18 }
  0xd4   :  { %v350_v22 = vmax.f32 %v334_v19, 0.0 }
  0xd5   :  { %v343_v23 = vmax.f32 %v327_v21, 0.0  ;;  %v251_v25 = vpop.f32.mrf.mxu2 }
  0xd6   :  { %366 = vst [vmem:[%s799_s4 + $0x68] sm:$0xff] %v350_v22  ;;  %v252_v26 = vadd.f32 %v675_v61, %v251_v25  ;;  %v233_v27 = vpop.f32.mrf.mxu0 }
  0xd7   :  { %359 = vst [vmem:[%s799_s4 + $0x30] sm:$0xff] %v343_v23  ;;  %v234_v28 = vadd.f32 %v675_v61, %v233_v27 }
  0xd8   :  { %v301_v29 = vadd.f32 %v300_v24, %v252_v26 }
  0xd9   :  { %v283_v31 = vadd.f32 %v708_v33, %v234_v28  ;;  %v320_v33 = vld [vmem:[%s798_s3 + $0x78] sm:$0xff] }
  0xda   :  { %v335_v32 = vadd.f32 %v319_v20, %v301_v29 }
  0xdb   :  { %v328_v34 = vadd.f32 %v312_v30, %v283_v31 }
  0xdc   :  { %v351_v35 = vmax.f32 %v335_v32, 0.0 }
  0xdd   :  { %v344_v36 = vmax.f32 %v328_v34, 0.0  ;;  %v253_v37 = vpop.f32.mrf.mxu2 }
  0xde   :  { %367 = vst [vmem:[%s799_s4 + $0x70] sm:$0xff] %v351_v35  ;;  %v254_v38 = vadd.f32 %v675_v61, %v253_v37 }
  0xdf   :  { %360 = vst [vmem:[%s799_s4 + $0x38] sm:$0xff] %v344_v36 }
  0xe0   :  { %v303_v40 = vadd.f32 %v302_v39, %v254_v38 }
  0xe2   :  { %v336_v41 = vadd.f32 %v320_v33, %v303_v40 }
  0xe4   :  { %v352_v42 = vmax.f32 %v336_v41, 0.0 }
  0xe6   :  { %368 = vst [vmem:[%s799_s4 + $0x78] sm:$0xff] %v352_v42 }

// kernel: _lambda_.15
= control target key start
LH: loop header
LB: loop body
LE: loop exit
PB: predicated region body
PF: predicated region fallthrough
CT: control target
= control target key end

     0   :  { %vm113_vm0 = vcmask 130048   ;;  %s334_s1 = inlined_call_operand.vmem [shape: bf16[144,128], index: 1, kind: input, shape index: {}]   ;;  %s335_s0 = inlined_call_operand.vmem [shape: bf16[32,144], index: 0, kind: input, shape index: {}]   ;;  %s336_s2 = inlined_call_operand.vmem [shape: f32[1,128], index: 2, kind: input, shape index: {}]   ;;  %s337_s3 = inlined_call_operand.vmem [shape: f32[32,128], index: 3, kind: output, shape index: {}]  }
   0x1   :  { %v235_v0 = vld [vmem:[%s334_s1 + $0x38] sm:$0xff]  ;;  %v236_v1 = vld [vmem:[%s334_s1 + $0x40] sm:$0xff]  ;;  %v234_v3 = vld [vmem:[%s334_s1 + $0x30] sm:$0xff] }
   0x2   :  { %v224_v2 = vld [vmem:[%s335_s0 + $0x4] sm:$0xf]  ;;  %120 = vmatpush.bf16.msra.mxu0 %v235_v0  ;;  %237 = vmatpush.bf16.msra.mxu2 %v235_v0  ;;  %v174_v4 = vld [vmem:[%s335_s0 + $0x8] sm:$0xf0]  ;;  %v231_v8 = vld [vmem:[%s334_s1 + $0x18] sm:$0xff] }
   0x3   :  { %146 = vmatpush.bf16.msra.mxu1 %v236_v1  ;;  %v177_v5 = vor.u32 %v224_v2, %v174_v4  ;;  %v233_v6 = vld [vmem:[%s334_s1 + $0x28] sm:$0xff]  ;;  %v232_v7 = vld [vmem:[%s334_s1 + $0x20] sm:$0xff]  ;;  %v226_v9 = vld [vmem:[%s335_s0 + $0x14] sm:$0xf] }
   0x4   :  { %v182_v10 = vld [vmem:[%s335_s0 + $0x18] sm:$0xf0]  ;;  %v230_v11 = vld [vmem:[%s334_s1 + $0x10] sm:$0xff]  ;;  %v229_v13 = vld [vmem:[%s334_s1 + $0x8] sm:$0xff] }
   0x5   :  { %v185_v12 = vor.u32 %v226_v9, %v182_v10  ;;  %v228_v14 = vld [vmem:[%s334_s1] sm:$0xff]  ;;  %v225_v16 = vld [vmem:[%s335_s0 + $0x4] sm:$0xf0]  ;;  %v180_v17 = vld [vmem:[%s335_s0 + $0x10] sm:$0xf] }
   0x6   :  { %121 = vmatpush.bf16.msra.mxu0 %v234_v3  ;;  %238 = vmatpush.bf16.msra.mxu2 %v234_v3  ;;  %v172_v15 = vld [vmem:[%s335_s0] sm:$0xf]  ;;  %v227_v18 = vld [vmem:[%s335_s0 + $0x14] sm:$0xf0] }
   0x7   :  { %222 = vmatmul.msk.bf16.vlgmr.msra.gmra.mxu1 %vm113_vm0, %v177_v5  ;;  %v173_v19 = vor.u32 %v225_v16, %v172_v15  ;;  %v181_v20 = vor.u32 %v227_v18, %v180_v17  ;;  %v245_v23 = vld [vmem:[%s336_s2] ss:$0 sm:$0xff] }
   0xa   :  { %122 = vmatpush.bf16.msra.mxu0 %v233_v6  ;;  %239 = vmatpush.bf16.msra.mxu2 %v233_v6 }
   0xe   :  { %123 = vmatpush.bf16.msra.mxu0 %v232_v7  ;;  %240 = vmatpush.bf16.msra.mxu2 %v232_v7 }
  0x12   :  { %124 = vmatpush.bf16.msra.mxu0 %v231_v8  ;;  %241 = vmatpush.bf16.msra.mxu2 %v231_v8 }
  0x16   :  { %125 = vmatpush.bf16.msra.mxu0 %v230_v11  ;;  %242 = vmatpush.bf16.msra.mxu2 %v230_v11 }
  0x17   :  { %223 = vmatmul.msk.bf16.gmra.mxu1 %vm113_vm0, %v185_v12 }
  0x1a   :  { %126 = vmatpush.bf16.msra.mxu0 %v229_v13  ;;  %243 = vmatpush.bf16.msra.mxu2 %v229_v13 }
  0x1e   :  { %127 = vmatpush.bf16.msra.mxu0 %v228_v14  ;;  %244 = vmatpush.bf16.msra.mxu2 %v228_v14 }
  0x21   :  { %128 = vmatmul.bf16.vlgmr.msra.gmra.mxu0 %v173_v19  ;;  %133 = vmatmul.bf16.vlgmr.msra.gmra.mxu2 %v181_v20 }
  0x84   :  { %v148_v21 = vpop.f32.mrf.mxu1 }
  0x8c   :  { %v150_v22 = vpop.f32.mrf.mxu1 }
  0x94   :  { %v153_v28 = vpop.f32.mrf.mxu1 }
  0x9c   :  { %v155_v39 = vpop.f32.mrf.mxu1 }
  0x9e   :  { %v129_v24 = vpop.f32.mrf.mxu0 }
  0x9f   :  { %v130_v25 = vadd.f32 %v245_v23, %v129_v24 }
  0xa1   :  { %v149_v26 = vadd.f32 %v148_v21, %v130_v25 }
  0xa3   :  { %v158_v27 = vmax.f32 %v149_v26, 0.0 }
  0xa4   :  { %v134_v29 = vpop.f32.mrf.mxu2 }
  0xa5   :  { %162 = vst [vmem:[%s337_s3] sm:$0xff] %v158_v27  ;;  %v135_v30 = vadd.f32 %v245_v23, %v134_v29 }
  0xa6   :  { %v131_v31 = vpop.f32.mrf.mxu0 }
  0xa7   :  { %v154_v32 = vadd.f32 %v153_v28, %v135_v30  ;;  %v132_v33 = vadd.f32 %v245_v23, %v131_v31 }
  0xa9   :  { %v160_v34 = vmax.f32 %v154_v32, 0.0  ;;  %v151_v35 = vadd.f32 %v150_v22, %v132_v33 }
  0xab   :  { %164 = vst [vmem:[%s337_s3 + $0x10] sm:$0xff] %v160_v34  ;;  %v159_v36 = vmax.f32 %v151_v35, 0.0 }
  0xac   :  { %v136_v37 = vpop.f32.mrf.mxu2 }
  0xad   :  { %163 = vst [vmem:[%s337_s3 + $0x8] sm:$0xff] %v159_v36  ;;  %v137_v38 = vadd.f32 %v245_v23, %v136_v37 }
  0xaf   :  { %v156_v40 = vadd.f32 %v155_v39, %v137_v38 }
  0xb1   :  { %v161_v41 = vmax.f32 %v156_v40, 0.0 }
  0xb3   :  { %165 = vst [vmem:[%s337_s3 + $0x18] sm:$0xff] %v161_v41 }

// kernel: _lambda_.17
= control target key start
LH: loop header
LB: loop body
LE: loop exit
PB: predicated region body
PF: predicated region fallthrough
CT: control target
= control target key end

     0   :  { %vm204_vm0 = vcmask 261120   ;;  %s563_s1 = inlined_call_operand.vmem [shape: bf16[288,128], index: 1, kind: input, shape index: {}]   ;;  %s564_s0 = inlined_call_operand.vmem [shape: bf16[32,288], index: 0, kind: input, shape index: {}]   ;;  %s565_s2 = inlined_call_operand.vmem [shape: f32[1,128], index: 2, kind: input, shape index: {}]   ;;  %s566_s3 = inlined_call_operand.vmem [shape: f32[32,128], index: 3, kind: input, shape index: {}]   ;;  %s567_s4 = inlined_call_operand.vmem [shape: f32[32,128], index: 4, kind: output, shape index: {}]  }
   0x1   :  { %v399_v0 = vld [vmem:[%s563_s1 + $0x38] sm:$0xff]  ;;  %v398_v2 = vld [vmem:[%s563_s1 + $0x30] sm:$0xff]  ;;  %v409_v3 = vld [vmem:[%s563_s1 + $0x88] sm:$0xff] }
   0x2   :  { %v407_v1 = vld [vmem:[%s563_s1 + $0x78] sm:$0xff]  ;;  %211 = vmatpush.bf16.msra.mxu0 %v399_v0  ;;  %410 = vmatpush.bf16.msra.mxu3 %v399_v0  ;;  %v406_v4 = vld [vmem:[%s563_s1 + $0x70] sm:$0xff]  ;;  %v408_v5 = vld [vmem:[%s563_s1 + $0x80] sm:$0xff] }
   0x3   :  { %230 = vmatpush.bf16.msra.mxu1 %v407_v1  ;;  %255 = vmatpush.bf16.msra.mxu2 %v409_v3  ;;  %v298_v6 = vld [vmem:[%s564_s0 + $0x8] sm:$0xf]  ;;  %v388_v7 = vld [vmem:[%s564_s0 + $0x10] sm:$0xf0]  ;;  %v396_v11 = vld [vmem:[%s563_s1 + $0x20] sm:$0xff] }
   0x4   :  { %v397_v8 = vld [vmem:[%s563_s1 + $0x28] sm:$0xff]  ;;  %v299_v10 = vor.u32 %v388_v7, %v298_v6  ;;  %v404_v12 = vld [vmem:[%s563_s1 + $0x60] sm:$0xff]  ;;  %v395_v13 = vld [vmem:[%s563_s1 + $0x18] sm:$0xff] }
   0x5   :  { %v405_v9 = vld [vmem:[%s563_s1 + $0x68] sm:$0xff]  ;;  %v403_v14 = vld [vmem:[%s563_s1 + $0x58] sm:$0xff]  ;;  %v394_v15 = vld [vmem:[%s563_s1 + $0x10] sm:$0xff] }
   0x6   :  { %212 = vmatpush.bf16.msra.mxu0 %v398_v2  ;;  %411 = vmatpush.bf16.msra.mxu3 %v398_v2  ;;  %v402_v16 = vld [vmem:[%s563_s1 + $0x50] sm:$0xff]  ;;  %v310_v17 = vld [vmem:[%s564_s0 + $0x20] sm:$0xf]  ;;  %v391_v18 = vld [vmem:[%s564_s0 + $0x28] sm:$0xf0] }
   0x7   :  { %231 = vmatpush.bf16.msra.mxu1 %v406_v4  ;;  %256 = vmatpush.bf16.msra.mxu2 %v408_v5  ;;  %v393_v19 = vld [vmem:[%s563_s1 + $0x8] sm:$0xff]  ;;  %v311_v21 = vor.u32 %v391_v18, %v310_v17  ;;  %v392_v22 = vld [vmem:[%s563_s1] sm:$0xff]  ;;  %v302_v25 = vld [vmem:[%s564_s0 + $0x18] sm:$0xf] }
   0x8   :  { %v401_v20 = vld [vmem:[%s563_s1 + $0x48] sm:$0xff]  ;;  %v290_v23 = vld [vmem:[%s564_s0] sm:$0xf]  ;;  %v390_v26 = vld [vmem:[%s564_s0 + $0x20] sm:$0xf0] }
   0x9   :  { %v387_v24 = vld [vmem:[%s564_s0 + $0x8] sm:$0xf0]  ;;  %v400_v27 = vld [vmem:[%s563_s1 + $0x40] sm:$0xff]  ;;  %v292_v29 = vld [vmem:[%s564_s0 + $0xc] sm:$0xf0]  ;;  %v303_v31 = vor.u32 %v390_v26, %v302_v25 }
   0xa   :  { %213 = vmatpush.bf16.msra.mxu0 %v397_v8  ;;  %412 = vmatpush.bf16.msra.mxu3 %v397_v8  ;;  %v386_v28 = vld [vmem:[%s564_s0 + $0x4] sm:$0xf]  ;;  %v291_v30 = vor.u32 %v387_v24, %v290_v23  ;;  %v389_v33 = vld [vmem:[%s564_s0 + $0x1c] sm:$0xf]  ;;  %v304_v34 = vld [vmem:[%s564_s0 + $0x24] sm:$0xf0] }
   0xb   :  { %232 = vmatpush.bf16.msra.mxu1 %v405_v9  ;;  %384 = vmatmul.msk.bf16.vlgmr.msra.gmra.mxu2 %vm204_vm0, %v299_v10  ;;  %v295_v32 = vor.u32 %v386_v28, %v292_v29  ;;  %v307_v35 = vor.u32 %v389_v33, %v304_v34  ;;  %v418_v37 = vld [vmem:[%s565_s2] ss:$0 sm:$0xff]  ;;  %v269_v52 = vld [vmem:[%s566_s3 + $0x8] sm:$0xff]  ;;  %v270_v60 = vld [vmem:[%s566_s3 + $0x10] sm:$0xff] }
   0xc   :  { %v268_v42 = vld [vmem:[%s566_s3] sm:$0xff]  ;;  %v271_v5 = vld [vmem:[%s566_s3 + $0x18] sm:$0xff] }
   0xe   :  { %214 = vmatpush.bf16.msra.mxu0 %v396_v11  ;;  %413 = vmatpush.bf16.msra.mxu3 %v396_v11 }
   0xf   :  { %233 = vmatpush.bf16.msra.mxu1 %v404_v12 }
  0x12   :  { %215 = vmatpush.bf16.msra.mxu0 %v395_v13  ;;  %414 = vmatpush.bf16.msra.mxu3 %v395_v13 }
  0x13   :  { %234 = vmatpush.bf16.msra.mxu1 %v403_v14 }
  0x16   :  { %216 = vmatpush.bf16.msra.mxu0 %v394_v15  ;;  %415 = vmatpush.bf16.msra.mxu3 %v394_v15 }
  0x17   :  { %235 = vmatpush.bf16.msra.mxu1 %v402_v16 }
  0x1a   :  { %217 = vmatpush.bf16.msra.mxu0 %v393_v19  ;;  %416 = vmatpush.bf16.msra.mxu3 %v393_v19 }
  0x1b   :  { %236 = vmatpush.bf16.msra.mxu1 %v401_v20  ;;  %385 = vmatmul.msk.bf16.gmra.mxu2 %vm204_vm0, %v311_v21 }
  0x1e   :  { %218 = vmatpush.bf16.msra.mxu0 %v392_v22  ;;  %417 = vmatpush.bf16.msra.mxu3 %v392_v22 }
  0x1f   :  { %237 = vmatpush.bf16.msra.mxu1 %v400_v27 }
  0x21   :  { %219 = vmatmul.bf16.vlgmr.msra.gmra.mxu0 %v291_v30  ;;  %224 = vmatmul.bf16.vlgmr.msra.gmra.mxu3 %v303_v31 }
  0x22   :  { %238 = vmatmul.bf16.vlgmr.msra.gmra.mxu1 %v295_v32 }
  0x32   :  { %243 = vmatmul.bf16.gmra.mxu1 %v307_v35 }
  0x8e   :  { %v258_v36 = vpop.f32.mrf.mxu2 }
  0x96   :  { %v260_v45 = vpop.f32.mrf.mxu2 }
  0x9e   :  { %v220_v38 = vpop.f32.mrf.mxu0  ;;  %v263_v57 = vpop.f32.mrf.mxu2 }
  0x9f   :  { %v221_v39 = vadd.f32 %v418_v37, %v220_v38  ;;  %v239_v40 = vpop.f32.mrf.mxu1 }
  0xa1   :  { %v240_v41 = vadd.f32 %v239_v40, %v221_v39 }
  0xa3   :  { %v259_v43 = vadd.f32 %v258_v36, %v240_v41 }
  0xa4   :  { %v225_v50 = vpop.f32.mrf.mxu3 }
  0xa5   :  { %v272_v44 = vadd.f32 %v268_v42, %v259_v43  ;;  %v226_v54 = vadd.f32 %v418_v37, %v225_v50 }
  0xa6   :  { %v222_v46 = vpop.f32.mrf.mxu0  ;;  %v265_v4 = vpop.f32.mrf.mxu2 }
  0xa7   :  { %v276_v47 = vmax.f32 %v272_v44, 0.0  ;;  %v223_v48 = vadd.f32 %v418_v37, %v222_v46  ;;  %v241_v49 = vpop.f32.mrf.mxu1 }
  0xa9   :  { %280 = vst [vmem:[%s567_s4] sm:$0xff] %v276_v47  ;;  %v242_v51 = vadd.f32 %v241_v49, %v223_v48 }
  0xab   :  { %v261_v53 = vadd.f32 %v260_v45, %v242_v51 }
  0xac   :  { %v227_v62 = vpop.f32.mrf.mxu3 }
  0xad   :  { %v273_v55 = vadd.f32 %v269_v52, %v261_v53  ;;  %v228_v0 = vadd.f32 %v418_v37, %v227_v62 }
  0xaf   :  { %v277_v56 = vmax.f32 %v273_v55, 0.0  ;;  %v244_v58 = vpop.f32.mrf.mxu1 }
  0xb0   :  { %v245_v59 = vadd.f32 %v244_v58, %v226_v54 }
  0xb1   :  { %281 = vst [vmem:[%s567_s4 + $0x8] sm:$0xff] %v277_v56 }
  0xb2   :  { %v264_v61 = vadd.f32 %v263_v57, %v245_v59 }
  0xb4   :  { %v274_v63 = vadd.f32 %v270_v60, %v264_v61 }
  0xb6   :  { %v278_v1 = vmax.f32 %v274_v63, 0.0 }
  0xb7   :  { %v246_v2 = vpop.f32.mrf.mxu1 }
  0xb8   :  { %282 = vst [vmem:[%s567_s4 + $0x10] sm:$0xff] %v278_v1  ;;  %v247_v3 = vadd.f32 %v246_v2, %v228_v0 }
  0xba   :  { %v266_v6 = vadd.f32 %v265_v4, %v247_v3 }
  0xbc   :  { %v275_v7 = vadd.f32 %v271_v5, %v266_v6 }
  0xbe   :  { %v279_v8 = vmax.f32 %v275_v7, 0.0 }
  0xc0   :  { %283 = vst [vmem:[%s567_s4 + $0x18] sm:$0xff] %v279_v8 }

</bundles_post_ra>
